<compile_context>
chip_gen: v7x
topology: tpu7x:2x2x1
jax: 0.10.0
libtpu: 0.0.40
codegen_flags: <defaults>
</compile_context>

<pallas_src>
import functools

import numpy as np
import jax
import jax.numpy as jnp
from jax import lax
from jax.experimental import pallas as pl
from jax.experimental.pallas import tpu as pltpu


def _gt_kernel(inv_scale,
               node_ref, edge_ref, src_sel_ref, dst_sel_ref, hsum_ref,
               wqkv_ref, we_ref, w1n_ref, w2n_ref, w1e_ref, w2e_ref,
               node_out_ref, edge_out_ref,
               qkv_acc, wv_acc, z_acc):
    f32 = jnp.float32
    step = pl.program_id(0)
    C = node_ref.shape[1]

    # ---- one-time init: fused Q|K|V projection + zeroed scatter accumulators ----
    @pl.when(step == 0)
    def _init():
        x = node_ref[...]                                            # (N, C)
        qkv_acc[...] = jnp.dot(x, wqkv_ref[...],
                               preferred_element_type=f32)           # (N, 3C)
        wv_acc[...] = jnp.zeros_like(wv_acc)
        z_acc[...] = jnp.zeros_like(z_acc)

    # selectors arrive as bf16 (exact for one-hot); compute in f32
    S = src_sel_ref[...].astype(f32)      # (tE, N) one-hot source selector
    Dm = dst_sel_ref[...].astype(f32)     # (tE, N) one-hot destination selector

    # per-edge gathers of projected node feats via one-hot matmuls (MXU)
    q_dst = jnp.dot(Dm, qkv_acc[:, 0:C], preferred_element_type=f32)       # (tE, C)
    kv_src = jnp.dot(S, qkv_acc[:, C:3 * C], preferred_element_type=f32)   # (tE, 2C)
    k_src = kv_src[:, 0:C]
    v_src = kv_src[:, C:2 * C]

    pe = jnp.dot(edge_ref[...], we_ref[...], preferred_element_type=f32)   # (tE, C)

    # score = clamp(K_src * Q_dst / sqrt(D), -5, 5) * proj_e   (== MHA edge output)
    score = jnp.clip(k_src * q_dst * inv_scale, -5.0, 5.0) * pe            # (tE, C)

    # per-head sum over D + clamp + exp, broadcast back to (tE, C) via a single
    # block-diagonal-ones matmul (exp(clip(x)) repeated == repeat of exp(clip(x)))
    s_full = jnp.exp(jnp.clip(jnp.dot(score, hsum_ref[...],
                                      preferred_element_type=f32), -5.0, 5.0))

    # scatter-add over destination nodes: contract the edge axis of Dm directly
    # (no explicit Dm.T input, MXU handles the transposed contraction)
    dn = (((0,), (0,)), ((), ()))
    wv_acc[...] += lax.dot_general(Dm, v_src * s_full, dn, preferred_element_type=f32)
    z_acc[...] += lax.dot_general(Dm, s_full, dn, preferred_element_type=f32)

    # edge branch: MLP (Linear -> SiLU -> dropout(identity) -> Linear)
    he = jnp.dot(score, w1e_ref[...], preferred_element_type=f32)           # (tE, 2C)
    he = he * jax.nn.sigmoid(he)
    edge_out_ref[...] = jnp.dot(he, w2e_ref[...], preferred_element_type=f32)

    # ---- finalize: attention normalization + node MLP ----
    @pl.when(step == pl.num_programs(0) - 1)
    def _finalize():
        h = wv_acc[...] * pl.reciprocal(z_acc[...] + 1e-6, approx=False)     # (N, C)
        hn = jnp.dot(h, w1n_ref[...], preferred_element_type=f32)            # (N, 2C)
        hn = hn * jax.nn.sigmoid(hn)
        node_out_ref[...] = jnp.dot(hn, w2n_ref[...], preferred_element_type=f32)


def graph_transformer_forward(node_feats, edge_feats, src_idx, dst_idx, params,
                              num_heads, *, tile_e=128):
    N, C = node_feats.shape
    E = edge_feats.shape[0]
    H = num_heads
    assert C % H == 0, "num_hidden_channels must be divisible by num_attention_heads"
    D = C // H

    # Pad the edge dimension to a multiple of the tile. Padded edges get all-zero
    # selector rows (one_hot of -1) -> zero contribution to wV/z; padded edge rows
    # of the output are sliced off.
    if E <= tile_e:
        tE = max(8, ((E + 7) // 8) * 8)
    else:
        tE = tile_e
    E_pad = ((E + tE - 1) // tE) * tE
    pad = E_pad - E

    src_p = src_idx.astype(jnp.int32)
    dst_p = dst_idx.astype(jnp.int32)
    edge_p = edge_feats
    if pad:
        neg = -jnp.ones((pad,), jnp.int32)
        src_p = jnp.concatenate([src_p, neg])
        dst_p = jnp.concatenate([dst_p, neg])
        edge_p = jnp.concatenate([edge_p, jnp.zeros((pad, C), edge_feats.dtype)])

    # bf16 one-hot selectors (exact) -> half the traffic of the largest operands
    S = jax.nn.one_hot(src_p, N, dtype=jnp.bfloat16)      # (E_pad, N)
    Dm = jax.nn.one_hot(dst_p, N, dtype=jnp.bfloat16)     # (E_pad, N)

    # block-diag ones: (score @ hsum)[e, c] = sum_d score[e, head(c), d]
    hsum = jnp.kron(jnp.eye(H, dtype=jnp.float32),
                    jnp.ones((D, D), dtype=jnp.float32))  # (C, C)

    wqkv = jnp.concatenate([params["wq"], params["wk"], params["wv"]], axis=1)  # (C, 3C)

    grid = (E_pad // tE,)
    kernel = functools.partial(_gt_kernel, float(1.0 / np.sqrt(D)))

    # rough per-step VMEM footprint (double-buffered) to size the scoped limit
    est = 2 * (N * C * 4 * 2                    # node in + node out
               + tE * C * 4 * 2                 # edge tile in + out
               + 2 * tE * N * 2                 # bf16 selectors
               + (C * 3 * C + 2 * C * C + 4 * C * 2 * C) * 4)   # weights + hsum
    est += (N * 3 * C + 2 * N * C) * 4          # scratch accumulators
    vmem_limit = int(min(64 * 1024 * 1024, max(16 * 1024 * 1024, 2 * est)))

    node_out, edge_out = pl.pallas_call(
        kernel,
        out_shape=(jax.ShapeDtypeStruct((N, C), jnp.float32),
                   jax.ShapeDtypeStruct((E_pad, C), jnp.float32)),
        grid=grid,
        in_specs=[
            pl.BlockSpec((N, C), lambda i: (0, 0)),          # node feats (resident)
            pl.BlockSpec((tE, C), lambda i: (i, 0)),         # edge feats tile
            pl.BlockSpec((tE, N), lambda i: (i, 0)),         # src one-hot tile (bf16)
            pl.BlockSpec((tE, N), lambda i: (i, 0)),         # dst one-hot tile (bf16)
            pl.BlockSpec((C, C), lambda i: (0, 0)),          # head-sum matrix
            pl.BlockSpec((C, 3 * C), lambda i: (0, 0)),      # fused Wq|Wk|Wv
            pl.BlockSpec((C, C), lambda i: (0, 0)),          # We
            pl.BlockSpec((C, 2 * C), lambda i: (0, 0)),      # W1 node
            pl.BlockSpec((2 * C, C), lambda i: (0, 0)),      # W2 node
            pl.BlockSpec((C, 2 * C), lambda i: (0, 0)),      # W1 edge
            pl.BlockSpec((2 * C, C), lambda i: (0, 0)),      # W2 edge
        ],
        out_specs=(
            pl.BlockSpec((N, C), lambda i: (0, 0)),          # node out (written at last step)
            pl.BlockSpec((tE, C), lambda i: (i, 0)),         # edge out tile
        ),
        scratch_shapes=[
            pltpu.VMEM((N, 3 * C), jnp.float32),             # fused Q|K|V projections
            pltpu.VMEM((N, C), jnp.float32),                 # wV accumulator
            pltpu.VMEM((N, C), jnp.float32),                 # z accumulator
        ],
        compiler_params=pltpu.CompilerParams(
            dimension_semantics=("arbitrary",),
            vmem_limit_bytes=vmem_limit),
    )(node_feats, edge_p, S, Dm, hsum, wqkv,
      params["we"], params["w1n"], params["w2n"], params["w1e"], params["w2e"])

    return node_out, edge_out[:E]


def reference_forward(node_feats, edge_feats, src_idx, dst_idx, params, num_heads):
    """Pure-JAX reference matching the PyTorch/DGL semantics."""
    N, C = node_feats.shape
    H = num_heads
    D = C // H
    qh = (node_feats @ params["wq"]).reshape(N, H, D)
    kh = (node_feats @ params["wk"]).reshape(N, H, D)
    vh = (node_feats @ params["wv"]).reshape(N, H, D)
    pe = (edge_feats @ params["we"]).reshape(-1, H, D)

    score = kh[src_idx] * qh[dst_idx]
    score = jnp.clip(score / np.sqrt(D), -5.0, 5.0)
    score = score * pe
    e_out = score
    s = jnp.exp(jnp.clip(score.sum(-1, keepdims=True), -5.0, 5.0))
    wV = jax.ops.segment_sum(vh[src_idx] * s, dst_idx, num_segments=N)
    z = jax.ops.segment_sum(s, dst_idx, num_segments=N)
    h = (wV / (z + 1e-6)).reshape(N, C)
    e_out = e_out.reshape(-1, C)

    def mlp(x, w1, w2):
        y = x @ w1
        y = y * jax.nn.sigmoid(y)
        return y @ w2

    return (mlp(h, params["w1n"], params["w2n"]),
            mlp(e_out, params["w1e"], params["w2e"]))


if __name__ == "__main__":
    N = 64           # nodes
    E = 200          # edges (not a tile multiple -> exercises padding + 2-step grid)
    C = 128          # num_hidden_channels (lane-dense)
    H = 4            # num_attention_heads

    key = jax.random.PRNGKey(0)
    keys = jax.random.split(key, 12)

    node_feats = jax.random.normal(keys[0], (N, C), dtype=jnp.float32)
    edge_feats = jax.random.normal(keys[1], (E, C), dtype=jnp.float32)
    src_idx = jax.random.randint(keys[2], (E,), 0, N)
    dst_idx = jax.random.randint(keys[3], (E,), 0, N)

    def init_w(k, fan_in, fan_out):
        # deterministic synthetic init (stand-in for glorot_orthogonal)
        return jax.random.normal(k, (fan_in, fan_out), dtype=jnp.float32) / np.sqrt(fan_in)

    params = {
        "wq": init_w(keys[4], C, C),
        "wk": init_w(keys[5], C, C),
        "wv": init_w(keys[6], C, C),
        "we": init_w(keys[7], C, C),
        "w1n": init_w(keys[8], C, 2 * C),
        "w2n": init_w(keys[9], 2 * C, C),
        "w1e": init_w(keys[10], C, 2 * C),
        "w2e": init_w(keys[11], 2 * C, C),
    }

    node_out, edge_out = graph_transformer_forward(
        node_feats, edge_feats, src_idx, dst_idx, params, H, tile_e=128)
    node_out = jax.block_until_ready(node_out)
    edge_out = jax.block_until_ready(edge_out)

    node_ref, edge_ref = reference_forward(
        node_feats, edge_feats, src_idx, dst_idx, params, H)

    np.testing.assert_allclose(np.asarray(node_out), np.asarray(node_ref),
                               rtol=2e-4, atol=2e-4)
    np.testing.assert_allclose(np.asarray(edge_out), np.asarray(edge_ref),
                               rtol=2e-4, atol=2e-4)

    print("KERNEL_OK")
</pallas_src>

<mosaic_0001>
module attributes {stable_mosaic.version = 11 : i64} {
  func.func @_gt_kernel(%arg0: i32, %arg1: memref<64x128xf32, #tpu.memory_space<vmem>>, %arg2: memref<128x128xf32, #tpu.memory_space<vmem>>, %arg3: memref<128x64xbf16, #tpu.memory_space<vmem>>, %arg4: memref<128x64xbf16, #tpu.memory_space<vmem>>, %arg5: memref<128x128xf32, #tpu.memory_space<vmem>>, %arg6: memref<128x384xf32, #tpu.memory_space<vmem>>, %arg7: memref<128x128xf32, #tpu.memory_space<vmem>>, %arg8: memref<128x256xf32, #tpu.memory_space<vmem>>, %arg9: memref<256x128xf32, #tpu.memory_space<vmem>>, %arg10: memref<128x256xf32, #tpu.memory_space<vmem>>, %arg11: memref<256x128xf32, #tpu.memory_space<vmem>>, %arg12: memref<64x128xf32, #tpu.memory_space<vmem>>, %arg13: memref<128x128xf32, #tpu.memory_space<vmem>>, %arg14: memref<64x384xf32, #tpu.memory_space<vmem>>, %arg15: memref<64x128xf32, #tpu.memory_space<vmem>>, %arg16: memref<64x128xf32, #tpu.memory_space<vmem>>) attributes {dimension_semantics = [#tpu.dimension_semantics<arbitrary>], iteration_bounds = array<i64: 2>, scalar_prefetch = 0 : i64, scratch_operands = 3 : i64, tpu.core_type = #tpu.core_type<tc>, window_params = [{pipeline_mode = #tpu.pipeline_mode<synchronous>, transform_indices = @transform_0, window_bounds = array<i64: 64, 128>}, {transform_indices = @transform_1, window_bounds = array<i64: 128, 128>}, {transform_indices = @transform_2, window_bounds = array<i64: 128, 64>}, {transform_indices = @transform_3, window_bounds = array<i64: 128, 64>}, {pipeline_mode = #tpu.pipeline_mode<synchronous>, transform_indices = @transform_4, window_bounds = array<i64: 128, 128>}, {pipeline_mode = #tpu.pipeline_mode<synchronous>, transform_indices = @transform_5, window_bounds = array<i64: 128, 384>}, {pipeline_mode = #tpu.pipeline_mode<synchronous>, transform_indices = @transform_6, window_bounds = array<i64: 128, 128>}, {pipeline_mode = #tpu.pipeline_mode<synchronous>, transform_indices = @transform_7, window_bounds = array<i64: 128, 256>}, {pipeline_mode = #tpu.pipeline_mode<synchronous>, transform_indices = @transform_8, window_bounds = array<i64: 256, 128>}, {pipeline_mode = #tpu.pipeline_mode<synchronous>, transform_indices = @transform_9, window_bounds = array<i64: 128, 256>}, {pipeline_mode = #tpu.pipeline_mode<synchronous>, transform_indices = @transform_10, window_bounds = array<i64: 256, 128>}, {pipeline_mode = #tpu.pipeline_mode<synchronous>, transform_indices = @transform_11, window_bounds = array<i64: 64, 128>}, {transform_indices = @transform_12, window_bounds = array<i64: 128, 128>}]} {
    %c0_i32 = arith.constant 0 : i32
    %0 = arith.cmpi eq, %arg0, %c0_i32 : i32
    %1 = arith.extui %0 : i1 to i32
    %c0_i32_0 = arith.constant 0 : i32
    %2 = arith.cmpi ne, %1, %c0_i32_0 : i32
    scf.if %2 {
      %c0_41 = arith.constant 0 : index
      %c0_42 = arith.constant 0 : index
      %54 = vector.load %arg1[%c0_41, %c0_42] : memref<64x128xf32, #tpu.memory_space<vmem>>, vector<64x128xf32>
      %c0_43 = arith.constant 0 : index
      %c0_44 = arith.constant 0 : index
      %55 = vector.load %arg6[%c0_43, %c0_44] : memref<128x384xf32, #tpu.memory_space<vmem>>, vector<128x384xf32>
      %cst_45 = arith.constant dense<0.000000e+00> : vector<64x384xf32>
      %56 = tpu.matmul %54, %55, %cst_45 {dimension_numbers = #tpu.dot_dimension_numbers<[1], [0], [0], [1], [0, 0, 1, 1], [], []>} : vector<64x128xf32>, vector<128x384xf32>, vector<64x384xf32> -> vector<64x384xf32>
      %c0_46 = arith.constant 0 : index
      %c0_47 = arith.constant 0 : index
      %57 = vector.load %arg14[%c0_46, %c0_47] : memref<64x384xf32, #tpu.memory_space<vmem>>, vector<64x384xf32>
      tpu.vector_store %arg14[%c0_46, %c0_47], %56 {strides = array<i32>} : memref<64x384xf32, #tpu.memory_space<vmem>>, vector<64x384xf32>,
      %cst_48 = arith.constant 0.000000e+00 : f32
      %58 = vector.broadcast %cst_48 : f32 to vector<64x128xf32>
      %c0_49 = arith.constant 0 : index
      %c0_50 = arith.constant 0 : index
      %59 = vector.load %arg15[%c0_49, %c0_50] : memref<64x128xf32, #tpu.memory_space<vmem>>, vector<64x128xf32>
      tpu.vector_store %arg15[%c0_49, %c0_50], %58 {strides = array<i32>} : memref<64x128xf32, #tpu.memory_space<vmem>>, vector<64x128xf32>,
      %cst_51 = arith.constant 0.000000e+00 : f32
      %60 = vector.broadcast %cst_51 : f32 to vector<64x128xf32>
      %c0_52 = arith.constant 0 : index
      %c0_53 = arith.constant 0 : index
      %61 = vector.load %arg16[%c0_52, %c0_53] : memref<64x128xf32, #tpu.memory_space<vmem>>, vector<64x128xf32>
      tpu.vector_store %arg16[%c0_52, %c0_53], %60 {strides = array<i32>} : memref<64x128xf32, #tpu.memory_space<vmem>>, vector<64x128xf32>,
    } else {
    }
    %c0 = arith.constant 0 : index
    %c0_1 = arith.constant 0 : index
    %3 = vector.load %arg3[%c0, %c0_1] : memref<128x64xbf16, #tpu.memory_space<vmem>>, vector<128x64xbf16>
    %4 = arith.extf %3 : vector<128x64xbf16> to vector<128x64xf32>
    %c0_2 = arith.constant 0 : index
    %c0_3 = arith.constant 0 : index
    %5 = vector.load %arg4[%c0_2, %c0_3] : memref<128x64xbf16, #tpu.memory_space<vmem>>, vector<128x64xbf16>
    %6 = arith.extf %5 : vector<128x64xbf16> to vector<128x64xf32>
    %c0_4 = arith.constant 0 : index
    %c0_5 = arith.constant 0 : index
    %7 = vector.load %arg14[%c0_4, %c0_5] : memref<64x384xf32, #tpu.memory_space<vmem>>, vector<64x128xf32>
    %cst = arith.constant dense<0.000000e+00> : vector<128x128xf32>
    %8 = tpu.matmul %6, %7, %cst {dimension_numbers = #tpu.dot_dimension_numbers<[1], [0], [0], [1], [0, 0, 1, 1], [], []>} : vector<128x64xf32>, vector<64x128xf32>, vector<128x128xf32> -> vector<128x128xf32>
    %c0_6 = arith.constant 0 : index
    %c128 = arith.constant 128 : index
    %9 = vector.load %arg14[%c0_6, %c128] : memref<64x384xf32, #tpu.memory_space<vmem>>, vector<64x256xf32>
    %cst_7 = arith.constant dense<0.000000e+00> : vector<128x256xf32>
    %10 = tpu.matmul %4, %9, %cst_7 {dimension_numbers = #tpu.dot_dimension_numbers<[1], [0], [0], [1], [0, 0, 1, 1], [], []>} : vector<128x64xf32>, vector<64x256xf32>, vector<128x256xf32> -> vector<128x256xf32>
    %11 = vector.extract_strided_slice %10 {offsets = [0, 0], sizes = [128, 128], strides = [1, 1]} : vector<128x256xf32> to vector<128x128xf32>
    %12 = vector.extract_strided_slice %10 {offsets = [0, 128], sizes = [128, 128], strides = [1, 1]} : vector<128x256xf32> to vector<128x128xf32>
    %c0_8 = arith.constant 0 : index
    %c0_9 = arith.constant 0 : index
    %13 = vector.load %arg2[%c0_8, %c0_9] : memref<128x128xf32, #tpu.memory_space<vmem>>, vector<128x128xf32>
    %c0_10 = arith.constant 0 : index
    %c0_11 = arith.constant 0 : index
    %14 = vector.load %arg7[%c0_10, %c0_11] : memref<128x128xf32, #tpu.memory_space<vmem>>, vector<128x128xf32>
    %cst_12 = arith.constant dense<0.000000e+00> : vector<128x128xf32>
    %15 = tpu.matmul %13, %14, %cst_12 {dimension_numbers = #tpu.dot_dimension_numbers<[1], [0], [0], [1], [0, 0, 1, 1], [], []>} : vector<128x128xf32>, vector<128x128xf32>, vector<128x128xf32> -> vector<128x128xf32>
    %16 = arith.mulf %11, %8 : vector<128x128xf32>
    %cst_13 = arith.constant 0.176776692 : f32
    %17 = vector.broadcast %cst_13 : f32 to vector<128x128xf32>
    %18 = arith.mulf %16, %17 : vector<128x128xf32>
    %cst_14 = arith.constant -5.000000e+00 : f32
    %cst_15 = arith.constant 5.000000e+00 : f32
    %19 = vector.broadcast %cst_14 : f32 to vector<128x128xf32>
    %20 = arith.maximumf %19, %18 : vector<128x128xf32>
    %21 = vector.broadcast %cst_15 : f32 to vector<128x128xf32>
    %22 = arith.minimumf %21, %20 : vector<128x128xf32>
    %23 = arith.mulf %22, %15 : vector<128x128xf32>
    %c0_16 = arith.constant 0 : index
    %c0_17 = arith.constant 0 : index
    %24 = vector.load %arg5[%c0_16, %c0_17] : memref<128x128xf32, #tpu.memory_space<vmem>>, vector<128x128xf32>
    %cst_18 = arith.constant dense<0.000000e+00> : vector<128x128xf32>
    %25 = tpu.matmul %23, %24, %cst_18 {dimension_numbers = #tpu.dot_dimension_numbers<[1], [0], [0], [1], [0, 0, 1, 1], [], []>} : vector<128x128xf32>, vector<128x128xf32>, vector<128x128xf32> -> vector<128x128xf32>
    %cst_19 = arith.constant -5.000000e+00 : f32
    %cst_20 = arith.constant 5.000000e+00 : f32
    %26 = vector.broadcast %cst_19 : f32 to vector<128x128xf32>
    %27 = arith.maximumf %26, %25 : vector<128x128xf32>
    %28 = vector.broadcast %cst_20 : f32 to vector<128x128xf32>
    %29 = arith.minimumf %28, %27 : vector<128x128xf32>
    %30 = math.exp %29 : vector<128x128xf32>
    %c0_21 = arith.constant 0 : index
    %c0_22 = arith.constant 0 : index
    %31 = vector.load %arg15[%c0_21, %c0_22] : memref<64x128xf32, #tpu.memory_space<vmem>>, vector<64x128xf32>
    %32 = arith.mulf %12, %30 : vector<128x128xf32>
    %cst_23 = arith.constant dense<0.000000e+00> : vector<64x128xf32>
    %33 = tpu.matmul %6, %32, %cst_23 {dimension_numbers = #tpu.dot_dimension_numbers<[0], [0], [1], [1], [0, 1, 1, 1], [], []>} : vector<128x64xf32>, vector<128x128xf32>, vector<64x128xf32> -> vector<64x128xf32>
    %34 = arith.addf %31, %33 : vector<64x128xf32>
    %c0_24 = arith.constant 0 : index
    %c0_25 = arith.constant 0 : index
    %35 = vector.load %arg15[%c0_24, %c0_25] : memref<64x128xf32, #tpu.memory_space<vmem>>, vector<64x128xf32>
    tpu.vector_store %arg15[%c0_24, %c0_25], %34 {strides = array<i32>} : memref<64x128xf32, #tpu.memory_space<vmem>>, vector<64x128xf32>,
    %c0_26 = arith.constant 0 : index
    %c0_27 = arith.constant 0 : index
    %36 = vector.load %arg16[%c0_26, %c0_27] : memref<64x128xf32, #tpu.memory_space<vmem>>, vector<64x128xf32>
    %cst_28 = arith.constant dense<0.000000e+00> : vector<64x128xf32>
    %37 = tpu.matmul %6, %30, %cst_28 {dimension_numbers = #tpu.dot_dimension_numbers<[0], [0], [1], [1], [0, 1, 1, 1], [], []>} : vector<128x64xf32>, vector<128x128xf32>, vector<64x128xf32> -> vector<64x128xf32>
    %38 = arith.addf %36, %37 : vector<64x128xf32>
    %c0_29 = arith.constant 0 : index
    %c0_30 = arith.constant 0 : index
    %39 = vector.load %arg16[%c0_29, %c0_30] : memref<64x128xf32, #tpu.memory_space<vmem>>, vector<64x128xf32>
    tpu.vector_store %arg16[%c0_29, %c0_30], %38 {strides = array<i32>} : memref<64x128xf32, #tpu.memory_space<vmem>>, vector<64x128xf32>,
    %c0_31 = arith.constant 0 : index
    %c0_32 = arith.constant 0 : index
    %40 = vector.load %arg10[%c0_31, %c0_32] : memref<128x256xf32, #tpu.memory_space<vmem>>, vector<128x256xf32>
    %cst_33 = arith.constant dense<0.000000e+00> : vector<128x256xf32>
    %41 = tpu.matmul %23, %40, %cst_33 {dimension_numbers = #tpu.dot_dimension_numbers<[1], [0], [0], [1], [0, 0, 1, 1], [], []>} : vector<128x128xf32>, vector<128x256xf32>, vector<128x256xf32> -> vector<128x256xf32>
    %42 = arith.negf %41 : vector<128x256xf32>
    %43 = math.exp %42 : vector<128x256xf32>
    %cst_34 = arith.constant 1.000000e+00 : f32
    %44 = vector.broadcast %cst_34 : f32 to vector<128x256xf32>
    %45 = arith.addf %44, %43 : vector<128x256xf32>
    %46 = arith.divf %44, %45 : vector<128x256xf32>
    %47 = arith.mulf %41, %46 : vector<128x256xf32>
    %c0_35 = arith.constant 0 : index
    %c0_36 = arith.constant 0 : index
    %48 = vector.load %arg11[%c0_35, %c0_36] : memref<256x128xf32, #tpu.memory_space<vmem>>, vector<256x128xf32>
    %cst_37 = arith.constant dense<0.000000e+00> : vector<128x128xf32>
    %49 = tpu.matmul %47, %48, %cst_37 {dimension_numbers = #tpu.dot_dimension_numbers<[1], [0], [0], [1], [0, 0, 1, 1], [], []>} : vector<128x256xf32>, vector<256x128xf32>, vector<128x128xf32> -> vector<128x128xf32>
    %c0_38 = arith.constant 0 : index
    %c0_39 = arith.constant 0 : index
    %50 = vector.load %arg13[%c0_38, %c0_39] : memref<128x128xf32, #tpu.memory_space<vmem>>, vector<128x128xf32>
    tpu.vector_store %arg13[%c0_38, %c0_39], %49 {strides = array<i32>} : memref<128x128xf32, #tpu.memory_space<vmem>>, vector<128x128xf32>,
    %c1_i32 = arith.constant 1 : i32
    %51 = arith.cmpi eq, %arg0, %c1_i32 : i32
    %52 = arith.extui %51 : i1 to i32
    %c0_i32_40 = arith.constant 0 : i32
    %53 = arith.cmpi ne, %52, %c0_i32_40 : i32
    scf.if %53 {
      %c0_41 = arith.constant 0 : index
      %c0_42 = arith.constant 0 : index
      %54 = vector.load %arg15[%c0_41, %c0_42] : memref<64x128xf32, #tpu.memory_space<vmem>>, vector<64x128xf32>
      %c0_43 = arith.constant 0 : index
      %c0_44 = arith.constant 0 : index
      %55 = vector.load %arg16[%c0_43, %c0_44] : memref<64x128xf32, #tpu.memory_space<vmem>>, vector<64x128xf32>
      %cst_45 = arith.constant 9.99999997E-7 : f32
      %56 = vector.broadcast %cst_45 : f32 to vector<64x128xf32>
      %57 = arith.addf %55, %56 : vector<64x128xf32>
      %58 = tpu.reciprocal %57 : vector<64x128xf32> -> vector<64x128xf32>
      %59 = arith.mulf %54, %58 : vector<64x128xf32>
      %c0_46 = arith.constant 0 : index
      %c0_47 = arith.constant 0 : index
      %60 = vector.load %arg8[%c0_46, %c0_47] : memref<128x256xf32, #tpu.memory_space<vmem>>, vector<128x256xf32>
      %cst_48 = arith.constant dense<0.000000e+00> : vector<64x256xf32>
      %61 = tpu.matmul %59, %60, %cst_48 {dimension_numbers = #tpu.dot_dimension_numbers<[1], [0], [0], [1], [0, 0, 1, 1], [], []>} : vector<64x128xf32>, vector<128x256xf32>, vector<64x256xf32> -> vector<64x256xf32>
      %62 = arith.negf %61 : vector<64x256xf32>
      %63 = math.exp %62 : vector<64x256xf32>
      %cst_49 = arith.constant 1.000000e+00 : f32
      %64 = vector.broadcast %cst_49 : f32 to vector<64x256xf32>
      %65 = arith.addf %64, %63 : vector<64x256xf32>
      %66 = arith.divf %64, %65 : vector<64x256xf32>
      %67 = arith.mulf %61, %66 : vector<64x256xf32>
      %c0_50 = arith.constant 0 : index
      %c0_51 = arith.constant 0 : index
      %68 = vector.load %arg9[%c0_50, %c0_51] : memref<256x128xf32, #tpu.memory_space<vmem>>, vector<256x128xf32>
      %cst_52 = arith.constant dense<0.000000e+00> : vector<64x128xf32>
      %69 = tpu.matmul %67, %68, %cst_52 {dimension_numbers = #tpu.dot_dimension_numbers<[1], [0], [0], [1], [0, 0, 1, 1], [], []>} : vector<64x256xf32>, vector<256x128xf32>, vector<64x128xf32> -> vector<64x128xf32>
      %c0_53 = arith.constant 0 : index
      %c0_54 = arith.constant 0 : index
      %70 = vector.load %arg12[%c0_53, %c0_54] : memref<64x128xf32, #tpu.memory_space<vmem>>, vector<64x128xf32>
      tpu.vector_store %arg12[%c0_53, %c0_54], %69 {strides = array<i32>} : memref<64x128xf32, #tpu.memory_space<vmem>>, vector<64x128xf32>,
    } else {
    }
    return
  }
  func.func @transform_0(%arg0: i32) -> (i32, i32) {
    %c0_i32 = arith.constant 0 : i32
    %c0_i32_0 = arith.constant 0 : i32
    %c0_i32_1 = arith.constant 0 : i32
    return %c0_i32, %c0_i32_0 : i32, i32
  }
  func.func @transform_1(%arg0: i32) -> (i32, i32) {
    %c0_i32 = arith.constant 0 : i32
    %c0_i32_0 = arith.constant 0 : i32
    return %arg0, %c0_i32 : i32, i32
  }
  func.func @transform_2(%arg0: i32) -> (i32, i32) {
    %c0_i32 = arith.constant 0 : i32
    %c0_i32_0 = arith.constant 0 : i32
    return %arg0, %c0_i32 : i32, i32
  }
  func.func @transform_3(%arg0: i32) -> (i32, i32) {
    %c0_i32 = arith.constant 0 : i32
    %c0_i32_0 = arith.constant 0 : i32
    return %arg0, %c0_i32 : i32, i32
  }
  func.func @transform_4(%arg0: i32) -> (i32, i32) {
    %c0_i32 = arith.constant 0 : i32
    %c0_i32_0 = arith.constant 0 : i32
    %c0_i32_1 = arith.constant 0 : i32
    return %c0_i32, %c0_i32_0 : i32, i32
  }
  func.func @transform_5(%arg0: i32) -> (i32, i32) {
    %c0_i32 = arith.constant 0 : i32
    %c0_i32_0 = arith.constant 0 : i32
    %c0_i32_1 = arith.constant 0 : i32
    return %c0_i32, %c0_i32_0 : i32, i32
  }
  func.func @transform_6(%arg0: i32) -> (i32, i32) {
    %c0_i32 = arith.constant 0 : i32
    %c0_i32_0 = arith.constant 0 : i32
    %c0_i32_1 = arith.constant 0 : i32
    return %c0_i32, %c0_i32_0 : i32, i32
  }
  func.func @transform_7(%arg0: i32) -> (i32, i32) {
    %c0_i32 = arith.constant 0 : i32
    %c0_i32_0 = arith.constant 0 : i32
    %c0_i32_1 = arith.constant 0 : i32
    return %c0_i32, %c0_i32_0 : i32, i32
  }
  func.func @transform_8(%arg0: i32) -> (i32, i32) {
    %c0_i32 = arith.constant 0 : i32
    %c0_i32_0 = arith.constant 0 : i32
    %c0_i32_1 = arith.constant 0 : i32
    return %c0_i32, %c0_i32_0 : i32, i32
  }
  func.func @transform_9(%arg0: i32) -> (i32, i32) {
    %c0_i32 = arith.constant 0 : i32
    %c0_i32_0 = arith.constant 0 : i32
    %c0_i32_1 = arith.constant 0 : i32
    return %c0_i32, %c0_i32_0 : i32, i32
  }
  func.func @transform_10(%arg0: i32) -> (i32, i32) {
    %c0_i32 = arith.constant 0 : i32
    %c0_i32_0 = arith.constant 0 : i32
    %c0_i32_1 = arith.constant 0 : i32
    return %c0_i32, %c0_i32_0 : i32, i32
  }
  func.func @transform_11(%arg0: i32) -> (i32, i32) {
    %c0_i32 = arith.constant 0 : i32
    %c0_i32_0 = arith.constant 0 : i32
    %c0_i32_1 = arith.constant 0 : i32
    return %c0_i32, %c0_i32_0 : i32, i32
  }
  func.func @transform_12(%arg0: i32) -> (i32, i32) {
    %c0_i32 = arith.constant 0 : i32
    %c0_i32_0 = arith.constant 0 : i32
    return %arg0, %c0_i32 : i32, i32
  }
}

</mosaic_0001>

<bundles_post_ra>
// kernel: tpu_custom_call.1
= control target key start
LH: loop header
LB: loop body
LE: loop exit
PB: predicated region body
PF: predicated region fallthrough
CT: control target
= control target key end

     0   :  { %s6457_s0 = inlined_call_operand.hbm [shape: f32[64,128], index: 0, kind: input, shape index: {}]   ;;  %s6458_s1 = inlined_call_operand.hbm [shape: f32[256,128], index: 1, kind: input, shape index: {}]   ;;  %s6459_s2 = inlined_call_operand.vmem [shape: bf16[256,64], index: 2, kind: input, shape index: {}]   ;;  %s6460_s3 = inlined_call_operand.vmem [shape: bf16[256,64], index: 3, kind: input, shape index: {}]   ;;  %s6461_s4 = inlined_call_operand.hbm [shape: f32[128,128], index: 4, kind: input, shape index: {}]   ;;  %s6462_s5 = inlined_call_operand.vmem [shape: f32[128,384], index: 5, kind: input, shape index: {}]   ;;  %s6463_s6 = inlined_call_operand.hbm [shape: f32[128,128], index: 6, kind: input, shape index: {}]   ;;  %s6464_s7 = inlined_call_operand.hbm [shape: f32[128,256], index: 7, kind: input, shape index: {}]   ;;  %s6465_s8 = inlined_call_operand.hbm [shape: f32[256,128], index: 8, kind: input, shape index: {}]   ;;  %s6466_s9 = inlined_call_operand.hbm [shape: f32[128,256], index: 9, kind: input, shape index: {}]   ;;  %s6467_s10 = inlined_call_operand.hbm [shape: f32[256,128], index: 10, kind: input, shape index: {}]   ;;  %s6468_s11 = inlined_call_operand.hbm [shape: f32[64,128], index: 11, kind: output, shape index: {0}]   ;;  %s6469_s12 = inlined_call_operand.hbm [shape: f32[256,128], index: 12, kind: output, shape index: {1}]  }
   0x1   :  { %6481 = sst [smem:[#allocation30_spill]] %s6457_s0 }
   0x2   :  { %6482 = sst [smem:[#allocation31_spill]] %s6460_s3 }
   0x3   :  { %6483 = sst [smem:[#allocation32_spill]] %s6461_s4 }
   0x4   :  { %6484 = sst [smem:[#allocation33_spill]] %s6462_s5 }
   0x5   :  { %6485 = sst [smem:[#allocation34_spill]] %s6463_s6 }
   0x6   :  { %6486 = sst [smem:[#allocation35_spill]] %s6464_s7 }
   0x7   :  { %6487 = sst [smem:[#allocation36_spill]] %s6468_s11 }
   0x8   :  { %6488 = sst [smem:[#allocation37_spill]] %s6469_s12 }
   0x9   :  { %18 = vsyncpa [#allocation6], 0 }
   0xa   :  { %19 = vsyncpa [#allocation9], 0 }
   0xb   :  { %21 = vsyncpa [#allocation9 + $0x1], 0 }
   0xc   :  { %22 = vsyncpa [#allocation12], 0 }
   0xd   :  { %23 = vsyncpa [#allocation15], 0 }
   0xe   :  { %24 = vsyncpa [#allocation18], 0 }
   0xf   :  { %25 = vsyncpa [#allocation7], 0 }
  0x10   :  { %26 = vsyncpa [#allocation21], 0 }
  0x11   :  { %28 = vsyncpa [#allocation21 + $0x1], 0  ;;  %s5415_s21 = smov 0   ;;  %s5417_s22 = smov 0  }
  0x12   :  { %s5419_s23 = smov 0   ;;  %s5421_s24 = smov 0  }
  0x13 LB: > { %s5436_s25 = sadd.s32 4294967295, %s5329_s24   ;;  %p3439_p0 = scmp.ge.s32.totalorder %s5329_s24, 1  ;;  %s5329_s24 = sphi %s5421_s24, %s6530_s24   ;;  %s5325_s23 = sphi %s5419_s23, %s6529_s23   ;;  %s5321_s22 = sphi %s5417_s22, %s6528_s22   ;;  %s5317_s21 = sphi %s5415_s21, %s6527_s21  }
  0x14   : > { %p6473_p1 = scmp.eq.s32.totalorder %s5436_s25, 0  ;;  %p332_p2 = scmp.lt.s32.totalorder %s5329_s24, 3 }
  0x15   : > { %s5331_s27 = smov [#allocation10]   ;;  %s5332_s29 = smov [#allocation11]  }
  0x16   : > { %p5442_p4 = pnand %p3439_p0, %p332_p2  ;;  %s357_s28 = sshll.u32 %s5331_s27, 4  ;;  %s5446_s28 = int_to_ptr.vmem [resolvable:$true] %s357_s28 }
  0x17   : > { %s373_s30 = sshll.u32 %s5332_s29, 4  ;;  %s5333_s14 = smov [#allocation14]   ;;  %s5457_s30 = int_to_ptr.vmem [resolvable:$true] %s373_s30 }
  0x18   : > { %s6489_s26 = scalar_select %p5442_p4, 1, 0 }
  0x19   : > { %p4650_p6 = pneg %p5442_p4  ;;  %s399_s15 = sshll.u32 %s5333_s14, 4  ;;  %s5459_s15 = int_to_ptr.vmem [resolvable:$true] %s399_s15 }
  0x1a   : > { %s6491_s4 = sld [smem:[#allocation32_spill]] }
  0x1b   : > { %p5453_p7 = pnand %p4650_p6, %p6473_p1 }
  0x1d   : > { %p5469_p9 = pneg %p5453_p7 }
  0x20   : > { %s4987_s18 = scalar_lea.hbm %s6491_s4, 2048 }
  0x21   : > { %p4988_p8 = scmp.ne.s32.totalorder %s6491_s4, %s4987_s18  ;;  %p4994_p12 = scmp.lt.u32.totalorder %s4987_s18, %s6491_s4 }
  0x23   : > { %p4990_p10 = pnand %p5469_p9, %p4988_p8 }
  0x25   : > { %p4991_p11 = pneg %p4990_p10 }
  0x27   : > { %p4996_p13 = pnand %p4994_p12, %p4991_p11 }
  0x29   : > { %4999 = shalt.err (!%p4996_p13)
}
  0x2a   : > { %s5000_s16 = scalar_lea.vmem %s5446_s28, 2048  ;;  %p5008_p5 = scmp.lt.s32.totalorder %s5446_s28, %s5446_s28 }
  0x2b   : > { %p5001_p0 = scmp.ne.s32.totalorder %s5446_s28, %s5000_s16  ;;  %p5009_p3 = scmp.lt.s32.totalorder %s5000_s16, %s5000_s16 }
  0x2d   : > { %p5003_p2 = pnand %p5001_p0, %p5469_p9  ;;  %p5010_p8 = por %p5009_p3, %p5008_p5 }
  0x2f   : > { %p5004_p6 = pneg %p5003_p2 }
  0x31   : > { %p5011_p10 = pnand %p5010_p8, %p5004_p6 }
  0x33   : > { %5014 = shalt.err (!%p5011_p10)
}
  0x34   : > { %s6475_s17 = smov 128   ;;  %s6477_s18 = smov 8  }
  0x35   : > { %4656 = dma.hbm_to_vmem [thread:$0]  (!%p5453_p7), %s6491_s4, 2048, %s5446_s28, [#allocation9], %s6475_s17, %s6475_s17, %s6477_s18  }
  0x36   : > { %s6493_s6 = sld [smem:[#allocation34_spill]] }
  0x3c   : > { %s5015_s16 = scalar_lea.hbm %s6493_s6, 2048 }
  0x3d   : > { %p5016_p3 = scmp.ne.s32.totalorder %s6493_s6, %s5015_s16  ;;  %p5022_p12 = scmp.lt.u32.totalorder %s5015_s16, %s6493_s6 }
  0x3f   : > { %p5018_p5 = pnand %p5016_p3, %p5469_p9 }
  0x41   : > { %p5019_p11 = pneg %p5018_p5 }
  0x43   : > { %p5024_p13 = pnand %p5022_p12, %p5019_p11 }
  0x45   : > { %5027 = shalt.err (!%p5024_p13)
}
  0x46   : > { %s5028_s28 = scalar_lea.vmem %s5457_s30, 2048  ;;  %p5036_p8 = scmp.lt.s32.totalorder %s5457_s30, %s5457_s30 }
  0x47   : > { %p5029_p0 = scmp.ne.s32.totalorder %s5457_s30, %s5028_s28  ;;  %p5037_p10 = scmp.lt.s32.totalorder %s5028_s28, %s5028_s28 }
  0x49   : > { %p5031_p2 = pnand %p5029_p0, %p5469_p9  ;;  %p5038_p3 = por %p5037_p10, %p5036_p8 }
  0x4b   : > { %p5032_p6 = pneg %p5031_p2 }
  0x4d   : > { %p5039_p5 = pnand %p5038_p3, %p5032_p6 }
  0x4f   : > { %5042 = shalt.err (!%p5039_p5)
}
  0x50   : > { %4659 = dma.hbm_to_vmem [thread:$0]  (!%p5453_p7), %s6493_s6, 2048, %s5457_s30, [#allocation12], %s6475_s17, %s6475_s17, %s6477_s18  }
  0x51   : > { %s5043_s19 = scalar_lea.hbm %s6465_s8, 4096 }
  0x52   : > { %p5044_p11 = scmp.ne.s32.totalorder %s6465_s8, %s5043_s19  ;;  %p5050_p0 = scmp.lt.u32.totalorder %s5043_s19, %s6465_s8 }
  0x54   : > { %p5046_p12 = pnand %p5044_p11, %p5469_p9 }
  0x56   : > { %p5047_p13 = pneg %p5046_p12 }
  0x58   : > { %p5052_p2 = pnand %p5050_p0, %p5047_p13 }
  0x5a   : > { %5055 = shalt.err (!%p5052_p2)
}
  0x5b   : > { %s5056_s30 = scalar_lea.vmem %s5459_s15, 4096  ;;  %p5064_p3 = scmp.lt.s32.totalorder %s5459_s15, %s5459_s15 }
  0x5c   : > { %p5057_p6 = scmp.ne.s32.totalorder %s5459_s15, %s5056_s30  ;;  %p5065_p5 = scmp.lt.s32.totalorder %s5056_s30, %s5056_s30 }
  0x5e   : > { %p5059_p8 = pnand %p5057_p6, %p5469_p9  ;;  %p5066_p11 = por %p5065_p5, %p5064_p3 }
  0x60   : > { %p5060_p10 = pneg %p5059_p8 }
  0x62   : > { %p5067_p12 = pnand %p5066_p11, %p5060_p10 }
  0x64   : > { %5070 = shalt.err (!%p5067_p12)
}
  0x65   : > { %4665 = dma.hbm_to_vmem [thread:$0]  (!%p5453_p7), %s6465_s8, 4096, %s5459_s15, [#allocation15], %s6475_s17, %s6475_s17, %s6477_s18  }
  0x66   : > { %s5336_s5 = smov [#allocation5]   ;;  %s5337_s12 = smov [#allocation13]  }
  0x67   : > { %s344_s11 = sshll.u32 %s5336_s5, 4  ;;  %s386_s19 = sshll.u32 %s5337_s12, 4  ;;  %s345_s11 = int_to_ptr.vmem [resolvable:$true] %s344_s11  ;;  %s387_s19 = int_to_ptr.vmem [resolvable:$true] %s386_s19 }
  0x68   : > { %s6494_s0 = sld [smem:[#allocation30_spill]] }
  0x6e   : > { %s5071_s14 = scalar_lea.hbm %s6494_s0, 1024 }
  0x6f   : > { %p5072_p13 = scmp.ne.s32.totalorder %s6494_s0, %s5071_s14  ;;  %p5078_p6 = scmp.lt.u32.totalorder %s5071_s14, %s6494_s0 }
  0x71   : > { %p5074_p0 = pnand %p5072_p13, %p5469_p9 }
  0x73   : > { %p5075_p2 = pneg %p5074_p0 }
  0x75   : > { %p5080_p8 = pnand %p5078_p6, %p5075_p2 }
  0x77   : > { %5083 = shalt.err (!%p5080_p8)
}
  0x78   : > { %s5084_s15 = scalar_lea.vmem %s345_s11, 1024  ;;  %p5092_p11 = scmp.lt.s32.totalorder %s345_s11, %s345_s11 }
  0x79   : > { %p5085_p10 = scmp.ne.s32.totalorder %s345_s11, %s5084_s15  ;;  %p5093_p12 = scmp.lt.s32.totalorder %s5084_s15, %s5084_s15 }
  0x7b   : > { %p5087_p3 = pnand %p5085_p10, %p5469_p9  ;;  %p5094_p1 = por %p5093_p12, %p5092_p11 }
  0x7d   : > { %p5088_p5 = pneg %p5087_p3 }
  0x7f   : > { %p5095_p4 = pnand %p5094_p1, %p5088_p5 }
  0x81   : > { %5098 = shalt.err (!%p5095_p4)
}
  0x82   : > { %4653 = dma.hbm_to_vmem [thread:$0]  (!%p5453_p7), %s6494_s0, 1024, %s345_s11, [#allocation6], %s6475_s17, %s6475_s17, %s6477_s18  }
  0x83   : > { %s6495_s7 = sld [smem:[#allocation35_spill]] }
  0x89   : > { %s5099_s20 = scalar_lea.hbm %s6495_s7, 4096 }
  0x8a   : > { %p5100_p1 = scmp.ne.s32.totalorder %s6495_s7, %s5099_s20  ;;  %p5106_p0 = scmp.lt.u32.totalorder %s5099_s20, %s6495_s7 }
  0x8c   : > { %p5102_p4 = pnand %p5100_p1, %p5469_p9 }
  0x8e   : > { %p5103_p13 = pneg %p5102_p4 }
  0x90   : > { %p5108_p2 = pnand %p5106_p0, %p5103_p13 }
  0x92   : > { %5111 = shalt.err (!%p5108_p2)
}
  0x93   : > { %s5112_s28 = scalar_lea.vmem %s387_s19, 4096  ;;  %p5120_p3 = scmp.lt.s32.totalorder %s387_s19, %s387_s19 }
  0x94   : > { %p5113_p6 = scmp.ne.s32.totalorder %s387_s19, %s5112_s28  ;;  %p5121_p5 = scmp.lt.s32.totalorder %s5112_s28, %s5112_s28 }
  0x96   : > { %p5115_p8 = pnand %p5113_p6, %p5469_p9  ;;  %p5122_p11 = por %p5121_p5, %p5120_p3 }
  0x98   : > { %p5116_p10 = pneg %p5115_p8 }
  0x9a   : > { %p5123_p12 = pnand %p5122_p11, %p5116_p10 }
  0x9c   : > { %5126 = shalt.err (!%p5123_p12)
}
  0x9d   : > { %s5338_s11 = smov 256   ;;  %s5339_s15 = smov 16  }
  0x9e   : > { %4662 = dma.hbm_to_vmem [thread:$0]  (!%p5453_p7), %s6495_s7, 4096, %s387_s19, [#allocation12], %s5338_s11, %s5338_s11, %s5339_s15  }
  0x9f   : > { %s5340_s5 = smov [#allocation16]   ;;  %s5341_s20 = smov [#allocation17]  }
  0xa0   : > { %s412_s12 = sshll.u32 %s5340_s5, 4  ;;  %s425_s29 = sshll.u32 %s5341_s20, 4  ;;  %s413_s12 = int_to_ptr.vmem [resolvable:$true] %s412_s12  ;;  %s426_s29 = int_to_ptr.vmem [resolvable:$true] %s425_s29 }
  0xa1   : > { %s5127_s30 = scalar_lea.hbm %s6466_s9, 4096 }
  0xa2   : > { %p5128_p1 = scmp.ne.s32.totalorder %s6466_s9, %s5127_s30  ;;  %p5134_p0 = scmp.lt.u32.totalorder %s5127_s30, %s6466_s9 }
  0xa4   : > { %p5130_p4 = pnand %p5128_p1, %p5469_p9 }
  0xa6   : > { %p5131_p13 = pneg %p5130_p4 }
  0xa8   : > { %p5136_p2 = pnand %p5134_p0, %p5131_p13 }
  0xaa   : > { %5139 = shalt.err (!%p5136_p2)
}
  0xab   : > { %s5140_s19 = scalar_lea.vmem %s413_s12, 4096  ;;  %p5148_p3 = scmp.lt.s32.totalorder %s413_s12, %s413_s12 }
  0xac   : > { %p5141_p6 = scmp.ne.s32.totalorder %s413_s12, %s5140_s19  ;;  %p5149_p5 = scmp.lt.s32.totalorder %s5140_s19, %s5140_s19 }
  0xae   : > { %p5143_p8 = pnand %p5141_p6, %p5469_p9  ;;  %p5150_p11 = por %p5149_p5, %p5148_p3 }
  0xb0   : > { %p5144_p10 = pneg %p5143_p8 }
  0xb2   : > { %p5151_p12 = pnand %p5150_p11, %p5144_p10 }
  0xb4   : > { %5154 = shalt.err (!%p5151_p12)
}
  0xb5   : > { %4668 = dma.hbm_to_vmem [thread:$0]  (!%p5453_p7), %s6466_s9, 4096, %s413_s12, [#allocation15], %s5338_s11, %s5338_s11, %s5339_s15  }
  0xb6   : > { %s5155_s3 = scalar_lea.hbm %s6467_s10, 4096 }
  0xb7   : > { %p5156_p1 = scmp.ne.s32.totalorder %s6467_s10, %s5155_s3  ;;  %p5162_p0 = scmp.lt.u32.totalorder %s5155_s3, %s6467_s10 }
  0xb9   : > { %p5158_p4 = pnand %p5156_p1, %p5469_p9 }
  0xbb   : > { %p5159_p13 = pneg %p5158_p4 }
  0xbd   : > { %p5164_p2 = pnand %p5162_p0, %p5159_p13 }
  0xbf   : > { %5167 = shalt.err (!%p5164_p2)
}
  0xc0   : > { %s5168_s30 = scalar_lea.vmem %s426_s29, 4096  ;;  %p5176_p3 = scmp.lt.s32.totalorder %s426_s29, %s426_s29 }
  0xc1   : > { %p5169_p6 = scmp.ne.s32.totalorder %s426_s29, %s5168_s30  ;;  %p5177_p5 = scmp.lt.s32.totalorder %s5168_s30, %s5168_s30 }
  0xc3   : > { %p5171_p8 = pnand %p5169_p6, %p5469_p9  ;;  %p5178_p11 = por %p5177_p5, %p5176_p3 }
  0xc5   : > { %p5172_p10 = pneg %p5171_p8 }
  0xc7   : > { %p5179_p12 = pnand %p5178_p11, %p5172_p10 }
  0xc9   : > { %5182 = shalt.err (!%p5179_p12)
}
  0xca   : > { %s6496_s11 = smov 8   ;;  %s6497_s15 = smov 128  }
  0xcb   : > { %4671 = dma.hbm_to_vmem [thread:$0]  (!%p5453_p7), %s6467_s10, 4096, %s426_s29, [#allocation18], %s6497_s15, %s6497_s15, %s6496_s11  }
  0xcc   : > { %s3438_s13 = sadd.s32 4294967294, %s5329_s24   ;;  %s5625_s27 = sadd.s32 1, %s5329_s24  }
  0xcd   : > { %s62_s19 = sadd.s32 1, %s5325_s23  ;;  %s59_s17 = ssub.s32 %s5329_s24, %s5625_s27 }
  0xce   : > { %p69_p9 = scmp.ne.s32.totalorder %s5325_s23, %s5321_s22  ;;  %p60_p1 = scmp.eq.s32.totalorder %s59_s17, 0 }
  0xcf   : > { %p70_p4 = scmp.eq.s32.totalorder %s5329_s24, 0  ;;  %p75_p13 = scmp.ne.s32.totalorder %s5321_s22, %s5317_s21 }
  0xd0   : > { %p6479_p0 = scmp.eq.s32.totalorder %s5436_s25, 1  ;;  %p6498_p6 = scmp.eq.s32.totalorder %s5436_s25, 0 }
  0xd1   : > { %s5637_s4 = scalar_select %p60_p1, %s5325_s23, %s62_s19  }
  0xd2   : > { %p71_p2 = por %p70_p4, %p69_p9  ;;  %p5641_p8 = por %p6498_p6, %p75_p13 }
  0xd3   : > { %p5647_p7 = por %p6479_p0, %p69_p9  ;;  %p325_p10 = scmp.eq.s32.totalorder %s3438_s13, 1 }
  0xd4   : > { %p4687_p3 = scmp.lt.s32.totalorder %s5329_s24, 2  ;;  %s439_s18 = sand.u32 1, %s5329_s24  }
  0xd5   : > { %s6500_s0 = scalar_select %p5647_p7, 1, 0 }
  0xd6   : > { %p5653_p5 = por %p325_p10, %p75_p13  ;;  %s441_s5 = sand.u32 1, %s5325_s23  }
  0xd7   : > { %s3586_s20 = sshll.u32 %s5329_s24, 11  ;;  %s3448_s14 = sshll.u32 %s441_s5, 7 }
  0xd8   : > { %s6501_s3 = scalar_select %p5653_p5, 1, 0 }
  0xd9   : > { %s5662_s12 = scalar_lea.hbm %s6458_s1, %s3586_s20  ;;  %p5664_p11 = pnand %p4687_p3, %p71_p2 }
  0xda   : > { %s443_s13 = scalar_lea.vmem [#allocation8], %s3448_s14  ;;  %s5670_s17 = scalar_lea.sflag [#allocation9], %s439_s18 }
  0xdb   : > { %s450_s19 = sshll.u32 %s443_s13, 4  ;;  %s5183_s5 = scalar_lea.hbm %s5662_s12, 2048  ;;  %s5668_s19 = int_to_ptr.vmem [resolvable:$true] %s450_s19 }
  0xdc   : > { %p5184_p12 = scmp.ne.s32.totalorder %s5662_s12, %s5183_s5  ;;  %p5185_p9 = pneg %p5664_p11 }
  0xdd   : > { %s5188_s30 = scalar_lea.hbm %s6458_s1, 4096  ;;  %p5189_p13 = scmp.lt.u32.totalorder %s5662_s12, %s6458_s1 }
  0xde   : > { %p5186_p1 = pnand %p5185_p9, %p5184_p12  ;;  %p5190_p2 = scmp.lt.u32.totalorder %s5188_s30, %s5183_s5 }
  0xdf   : > { %p5192_p10 = scmp.lt.u32.totalorder %s5183_s5, %s5662_s12 }
  0xe0   : > { %p5187_p4 = pneg %p5186_p1  ;;  %p5191_p6 = por %p5190_p2, %p5189_p13 }
  0xe2   : > { %p5193_p3 = por %p5192_p10, %p5191_p6 }
  0xe4   : > { %p5194_p0 = pnand %p5193_p3, %p5187_p4 }
  0xe6   : > { %5197 = shalt.err (!%p5194_p0)
}
  0xe7   : > { %s5198_s18 = scalar_lea.vmem %s5668_s19, 2048  ;;  %s5342_s14 = smov [#allocation8]  }
  0xe8   : > { %p5199_p12 = scmp.ne.s32.totalorder %s5668_s19, %s5198_s18  ;;  %s5203_s13 = sshll.u32 %s5342_s14, 4  ;;  %s5204_s13 = int_to_ptr.vmem [resolvable:$false] %s5203_s13 }
  0xe9   : > { %s5205_s6 = scalar_lea.vmem %s5204_s13, 4096  ;;  %p5206_p7 = scmp.lt.s32.totalorder %s5668_s19, %s5204_s13 }
  0xea   : > { %p5201_p1 = pnand %p5199_p12, %p5185_p9  ;;  %p5207_p13 = scmp.lt.s32.totalorder %s5205_s6, %s5198_s18 }
  0xec   : > { %p5202_p5 = pneg %p5201_p1  ;;  %p5208_p2 = por %p5207_p13, %p5206_p7 }
  0xee   : > { %p5209_p6 = pnand %p5208_p2, %p5202_p5 }
  0xf0   : > { %5212 = shalt.err (!%p5209_p6)
}
  0xf1   : > { %4675 = dma.hbm_to_vmem [thread:$0]  (!%p5664_p11), %s5662_s12, 2048, %s5668_s19, %s5670_s17, %s6497_s15, %s6497_s15, %s6496_s11  }
  0xf2   : > { %p6503_p0 = scmp.ne.s32.totalorder %s6489_s26, 0 }
  0xf3   : > { %p6504_p9 = scmp.eq.s32.totalorder (!%p6503_p0), %s5436_s25, 0 }
  0xf4   : > { %480 = sbr.rel (%p6503_p0) target bundleno = 2195 (0x893), region = 64 }
  0xfb   : > { %5284 = dma.done.wait (%p6504_p9), [#allocation6], 1024   ;;  %p6505_p4 = pmov %p6504_p9 }
  0xfc   : > { %s486_s7 = sand.u32 1, %s5436_s25   ;;  %s488_s28 = sand.u32 1, %s5321_s22  }
  0xfd   : > { %5286 = vsyncadd (%p6505_p4), [#allocation6], 4294966272  ;;  %s3453_s5 = sshll.u32 %s488_s28, 7  ;;  %s487_s20 = scalar_lea.sflag [#allocation9], %s486_s7 }
  0xfe   : > { %s5711_s16 = scalar_lea.vmem [#allocation8], %s3453_s5 }
  0xff   : > { %5288 = dma.done.wait (%p5641_p8), %s487_s20, 2048  }
 0x100   : > { %5290 = vsyncadd (%p5641_p8), %s487_s20, 4294965248  ;;  %p6506_p7 = pmov %p6505_p4 }
 0x101   : > { %p6507_p5 = pmov %p6505_p4 }
 0x102   : > { %5292 = dma.done.wait (%p6506_p7), [#allocation9], 2048  }
 0x103   : > { %5294 = vsyncadd (%p6507_p5), [#allocation9], 4294965248  ;;  %p6508_p11 = pmov %p6505_p4 }
 0x104   : > { %p6509_p10 = pmov %p6505_p4 }
 0x105   : > { %5296 = dma.done.wait (%p6508_p11), [#allocation12], 6144  }
 0x106   : > { %5298 = vsyncadd (%p6509_p10), [#allocation12], 4294961152  ;;  %p6510_p3 = pmov %p6505_p4 }
 0x108   : > { %5300 = dma.done.wait (%p6510_p3), [#allocation15], 8192   ;;  %p6511_p12 = pmov %p6510_p3 }
 0x109   : > { %p6512_p8 = pmov %p6510_p3 }
 0x10a   : > { %5302 = vsyncadd (%p6511_p12), [#allocation15], 4294959104 }
 0x10b   : > { %5304 = dma.done.wait (%p6512_p8), [#allocation18], 4096   ;;  %p6513_p1 = pmov %p6510_p3 }
 0x10c   : > { %s3461_s26 = sshll.u32 %s5436_s25, 4  ;;  %s6514_s30 = sld [smem:[#allocation31_spill]] }
 0x10d   : > { %5306 = vsyncadd (%p6513_p1), [#allocation18], 4294963200  ;;  %p567_p13 = scmp.lt.s32.totalorder %s3461_s26, 31  ;;  %s5744_s14 = scalar_lea.vmem [#allocation20], %s3453_s5 }
 0x10e   : > { %p6515_p2 = scmp.ne.s32.totalorder %s5436_s25, 0 }
 0x10f   : > { %s6532_s26 = smov (!%p567_p13, %s3461_s26), 31  ;;  %s6516_s7 = sld [smem:[#allocation33_spill]] (!%p6515_p2)  ;;  %v5343_v7 = vmov (!%p6515_p2), 0.0   ;;  %v583_v44 = vld [vmem:[#allocation5] sm:$0xff] (!%p6515_p2) }
 0x110   : > { %s3462_s11 = sshll.u32 %s6532_s26, 2  ;;  %582 = sbr.rel (%p6515_p2) target bundleno = 554 (0x22a), region = 100  ;;  %703 = vmatprep.mubr.f32.mxu0 (!%p6515_p2), %v5343_v7  ;;  %881 = vst [vmem:[#allocation3] sm:$0xff] (!%p6515_p2), %v5343_v7  ;;  %882 = vst [vmem:[#allocation3 + $0x8] sm:$0xff] (!%p6515_p2), %v5343_v7  ;;  %3994 = vmatprep.mubr.f32.mxu1 (!%p6515_p2), %v583_v44 }
 0x111   : > { %s5737_s12 = scalar_lea.vmem %s6459_s2, %s3462_s11  ;;  %883 = vst [vmem:[#allocation3 + $0x10] sm:$0xff] (!%p6515_p2), %v5343_v7  ;;  %884 = vst [vmem:[#allocation3 + $0x18] sm:$0xff] (!%p6515_p2), %v5343_v7 }
 0x112   : > { %s5742_s18 = scalar_lea.vmem %s6514_s30, %s3462_s11  ;;  %885 = vst [vmem:[#allocation3 + $0x20] sm:$0xff] (!%p6515_p2), %v5343_v7  ;;  %886 = vst [vmem:[#allocation3 + $0x28] sm:$0xff] (!%p6515_p2), %v5343_v7 }
 0x113   : > { %887 = vst [vmem:[#allocation3 + $0x30] sm:$0xff] (!%p6515_p2), %v5343_v7  ;;  %888 = vst [vmem:[#allocation3 + $0x38] sm:$0xff] (!%p6515_p2), %v5343_v7 }
 0x114   : > { %889 = vst [vmem:[#allocation4] sm:$0xff] (!%p6515_p2), %v5343_v7  ;;  %890 = vst [vmem:[#allocation4 + $0x8] sm:$0xff] (!%p6515_p2), %v5343_v7 }
 0x115   : > { %v592_v0 = vld [vmem:[%s6516_s7 + $0x8] sm:$0xff] (!%p6515_p2)  ;;  %v595_v1 = vld [vmem:[%s6516_s7 + $0x20] sm:$0xff] (!%p6515_p2)  ;;  %v594_v4 = vld [vmem:[%s6516_s7 + $0x18] sm:$0xff] (!%p6515_p2)  ;;  %891 = vst [vmem:[#allocation4 + $0x10] sm:$0xff] (!%p6515_p2), %v5343_v7 }
 0x116   : > { %v591_v2 = vld [vmem:[%s6516_s7] sm:$0xff] (!%p6515_p2)  ;;  %v4246_v3 = vpack.c.bf16 (!%p6515_p2), %v595_v1, %v592_v0  ;;  %v598_v5 = vld [vmem:[%s6516_s7 + $0x38] sm:$0xff] (!%p6515_p2)  ;;  %v601_v6 = vld [vmem:[%s6516_s7 + $0x50] sm:$0xff] (!%p6515_p2)  ;;  %892 = vst [vmem:[#allocation4 + $0x18] sm:$0xff] (!%p6515_p2), %v5343_v7 }
 0x117   : > { %893 = vst [vmem:[#allocation4 + $0x20] sm:$0xff] %v5343_v7  ;;  %894 = vst [vmem:[#allocation4 + $0x28] sm:$0xff] %v5343_v7  ;;  %v4248_v8 = vpack.c.bf16 %v594_v4, %v591_v2  ;;  %v4250_v9 = vpack.c.bf16 %v601_v6, %v598_v5  ;;  %v597_v10 = vld [vmem:[%s6516_s7 + $0x30] sm:$0xff]  ;;  %v600_v11 = vld [vmem:[%s6516_s7 + $0x48] sm:$0xff] }
 0x118   : > { %895 = vst [vmem:[#allocation4 + $0x30] sm:$0xff] %v5343_v7  ;;  %896 = vst [vmem:[#allocation4 + $0x38] sm:$0xff] %v5343_v7  ;;  %v604_v12 = vld [vmem:[%s6516_s7 + $0x68] sm:$0xff]  ;;  %4247 = vmatprep.subr.bf16.mxu0 %v4246_v3  ;;  %v607_v13 = vld [vmem:[%s6516_s7 + $0x80] sm:$0xff]  ;;  %v4252_v14 = vpack.c.bf16 %v600_v11, %v597_v10 }
 0x119   : > { %4249 = vmatpush1.bf16.msra.mxu0 %v4248_v8  ;;  %v603_v15 = vld [vmem:[%s6516_s7 + $0x60] sm:$0xff]  ;;  %v4254_v16 = vpack.c.bf16 %v607_v13, %v604_v12  ;;  %v606_v17 = vld [vmem:[%s6516_s7 + $0x78] sm:$0xff]  ;;  %v593_v18 = vld [vmem:[%s6516_s7 + $0x10] sm:$0xff] }
 0x11a   : > { %4251 = vmatprep.subr.bf16.mxu0 %v4250_v9  ;;  %v596_v19 = vld [vmem:[%s6516_s7 + $0x28] sm:$0xff]  ;;  %v610_v20 = vld [vmem:[%s6516_s7 + $0x98] sm:$0xff]  ;;  %v613_v21 = vld [vmem:[%s6516_s7 + $0xb0] sm:$0xff]  ;;  %v4256_v25 = vpack.c.bf16 %v606_v17, %v603_v15 }
 0x11b   : > { %v4278_v22 = vpack.c.bf16 %v596_v19, %v593_v18  ;;  %v599_v23 = vld [vmem:[%s6516_s7 + $0x40] sm:$0xff]  ;;  %v602_v24 = vld [vmem:[%s6516_s7 + $0x58] sm:$0xff]  ;;  %v609_v26 = vld [vmem:[%s6516_s7 + $0x90] sm:$0xff]  ;;  %v4258_v28 = vpack.c.bf16 %v613_v21, %v610_v20 }
 0x11c   : > { %v4282_v27 = vpack.c.bf16 %v602_v24, %v599_v23  ;;  %v612_v29 = vld [vmem:[%s6516_s7 + $0xa8] sm:$0xff]  ;;  %v605_v30 = vld [vmem:[%s6516_s7 + $0x70] sm:$0xff]  ;;  %v619_v33 = vld [vmem:[%s6516_s7 + $0xe0] sm:$0xff] }
 0x11d   : > { %4253 = vmatpush1.bf16.msra.mxu0 %v4252_v14  ;;  %4279 = vmatprep.subr.bf16.mxu1 %v4278_v22  ;;  %v608_v31 = vld [vmem:[%s6516_s7 + $0x88] sm:$0xff]  ;;  %v611_v35 = vld [vmem:[%s6516_s7 + $0xa0] sm:$0xff]  ;;  %v614_v36 = vld [vmem:[%s6516_s7 + $0xb8] sm:$0xff]  ;;  %v4260_v37 = vpack.c.bf16 %v612_v29, %v609_v26 }
 0x11e   : > { %4255 = vmatprep.subr.bf16.mxu0 %v4254_v16  ;;  %4281 = vmatpush3.bf16.msra.mxu1 %v4278_v22  ;;  %v616_v32 = vld [vmem:[%s6516_s7 + $0xc8] sm:$0xff]  ;;  %v4286_v34 = vpack.c.bf16 %v608_v31, %v605_v30  ;;  %v615_v39 = vld [vmem:[%s6516_s7 + $0xc0] sm:$0xff]  ;;  %v618_v40 = vld [vmem:[%s6516_s7 + $0xd8] sm:$0xff]  ;;  %v4290_v43 = vpack.c.bf16 %v614_v36, %v611_v35 }
 0x11f   : > { %4283 = vmatprep.subr.bf16.mxu1 %v4282_v27  ;;  %v4262_v38 = vpack.c.bf16 %v619_v33, %v616_v32  ;;  %v622_v41 = vld [vmem:[%s6516_s7 + $0xf8] sm:$0xff]  ;;  %v625_v42 = vld [vmem:[%s6516_s7 + $0x110] sm:$0xff]  ;;  %v620_v46 = vld [vmem:[%s6516_s7 + $0xe8] sm:$0xff]  ;;  %v4264_v47 = vpack.c.bf16 %v618_v40, %v615_v39 }
 0x120   : > { %v617_v45 = vld [vmem:[%s6516_s7 + $0xd0] sm:$0xff]  ;;  %v4266_v48 = vpack.c.bf16 %v625_v42, %v622_v41  ;;  %v624_v50 = vld [vmem:[%s6516_s7 + $0x108] sm:$0xff]  ;;  %v631_v52 = vld [vmem:[%s6516_s7 + $0x140] sm:$0xff] }
 0x121   : > { %4257 = vmatpush1.bf16.msra.mxu0 %v4256_v25  ;;  %v621_v49 = vld [vmem:[%s6516_s7 + $0xf0] sm:$0xff]  ;;  %v628_v51 = vld [vmem:[%s6516_s7 + $0x128] sm:$0xff]  ;;  %v4294_v53 = vpack.c.bf16 %v620_v46, %v617_v45  ;;  %v623_v54 = vld [vmem:[%s6516_s7 + $0x100] sm:$0xff] }
 0x122   : > { %4259 = vmatprep.subr.bf16.mxu0 %v4258_v28  ;;  %4285 = vmatpush3.bf16.msra.mxu1 %v4282_v27  ;;  %v626_v55 = vld [vmem:[%s6516_s7 + $0x118] sm:$0xff]  ;;  %v4268_v56 = vpack.c.bf16 %v624_v50, %v621_v49  ;;  %v4270_v57 = vpack.c.bf16 %v631_v52, %v628_v51  ;;  %v627_v58 = vld [vmem:[%s6516_s7 + $0x120] sm:$0xff]  ;;  %v637_v61 = vld [vmem:[%s6516_s7 + $0x170] sm:$0xff] }
 0x123   : > { %4287 = vmatprep.subr.bf16.mxu1 %v4286_v34  ;;  %v630_v59 = vld [vmem:[%s6516_s7 + $0x138] sm:$0xff]  ;;  %v4298_v62 = vpack.c.bf16 %v626_v55, %v623_v54  ;;  %v629_v63 = vld [vmem:[%s6516_s7 + $0x130] sm:$0xff]  ;;  %v632_v0 = vld [vmem:[%s6516_s7 + $0x148] sm:$0xff] }
 0x124   : > { %v634_v60 = vld [vmem:[%s6516_s7 + $0x158] sm:$0xff]  ;;  %v4272_v1 = vpack.c.bf16 %v630_v59, %v627_v58  ;;  %v633_v3 = vld [vmem:[%s6516_s7 + $0x150] sm:$0xff]  ;;  %v636_v4 = vld [vmem:[%s6516_s7 + $0x168] sm:$0xff]  ;;  %v4302_v5 = vpack.c.bf16 %v632_v0, %v629_v63 }
 0x125   : > { %4261 = vmatpush1.bf16.msra.mxu0 %v4260_v37  ;;  %v4274_v2 = vpack.c.bf16 %v637_v61, %v634_v60  ;;  %v635_v6 = vld [vmem:[%s6516_s7 + $0x160] sm:$0xff]  ;;  %v638_v8 = vld [vmem:[%s6516_s7 + $0x178] sm:$0xff]  ;;  %v4276_v9 = vpack.c.bf16 %v636_v4, %v633_v3  ;;  %v584_v11 = vld [vmem:[#allocation5 + $0x8] sm:$0xff] }
 0x126   : > { %4263 = vmatprep.subr.bf16.mxu0 %v4262_v38  ;;  %4289 = vmatpush3.bf16.msra.mxu1 %v4286_v34  ;;  %v4306_v10 = vpack.c.bf16 %v638_v8, %v635_v6  ;;  %v585_v12 = vld [vmem:[#allocation5 + $0x10] sm:$0xff]  ;;  %v586_v13 = vld [vmem:[#allocation5 + $0x18] sm:$0xff]  ;;  %v587_v14 = vld [vmem:[#allocation5 + $0x20] sm:$0xff] }
 0x127   : > { %4291 = vmatprep.subr.bf16.mxu1 %v4290_v43  ;;  %v588_v15 = vld [vmem:[#allocation5 + $0x28] sm:$0xff]  ;;  %v589_v16 = vld [vmem:[#allocation5 + $0x30] sm:$0xff]  ;;  %v590_v17 = vld [vmem:[#allocation5 + $0x38] sm:$0xff] }
 0x129   : > { %4265 = vmatpush1.bf16.msra.mxu0 %v4264_v47 }
 0x12a   : > { %4267 = vmatprep.subr.bf16.mxu0 %v4266_v48  ;;  %4293 = vmatpush3.bf16.msra.mxu1 %v4290_v43 }
 0x12b   : > { %4295 = vmatprep.subr.bf16.mxu1 %v4294_v53 }
 0x12d   : > { %4269 = vmatpush1.bf16.msra.mxu0 %v4268_v56 }
 0x12e   : > { %4271 = vmatprep.subr.bf16.mxu0 %v4270_v57  ;;  %4297 = vmatpush3.bf16.msra.mxu1 %v4294_v53 }
 0x12f   : > { %4299 = vmatprep.subr.bf16.mxu1 %v4298_v62 }
 0x131   : > { %4273 = vmatpush1.bf16.msra.mxu0 %v4272_v1 }
 0x132   : > { %4275 = vmatprep.subr.bf16.mxu0 %v4274_v2  ;;  %4301 = vmatpush3.bf16.msra.mxu1 %v4298_v62 }
 0x133   : > { %4303 = vmatprep.subr.bf16.mxu1 %v4302_v5 }
 0x135   : > { %4277 = vmatpush1.bf16.msra.mxu0 %v4276_v9 }
 0x136   : > { %4305 = vmatpush3.bf16.msra.mxu1 %v4302_v5 }
 0x137   : > { %4307 = vmatprep.subr.bf16.mxu1 %v4306_v10 }
 0x138   : > { %704 = vmatmul.mubr.f32.vlgmr.msra.gmra.mrb[0].mxu0 %v583_v44 }
 0x139   : > { %709 = vmatprep.mubr.f32.mxu0 %v5343_v7 }
 0x13a   : > { %4309 = vmatpush3.bf16.msra.mxu1 %v4306_v10 }
 0x13c   : > { %710 = vmatmul.mubr.f32.gmra.mrb[2].mxu0 %v584_v11 }
 0x13d   : > { %715 = vmatprep.mubr.f32.mxu0 %v5343_v7  ;;  %3995 = vmatmul.mubr.f32.vlgmr.msra.gmra.mrb[0].mxu1 %v584_v11 }
 0x13e   : > { %3997 = vmatprep.mubr.f32.mxu1 %v585_v12 }
 0x140   : > { %716 = vmatmul.mubr.f32.gmra.mrb[4].mxu0 %v585_v12 }
 0x141   : > { %721 = vmatprep.mubr.f32.mxu0 %v5343_v7  ;;  %3998 = vmatmul.mubr.f32.gmra.mrb[2].mxu1 %v586_v13 }
 0x142   : > { %4000 = vmatprep.mubr.f32.mxu1 %v587_v14 }
 0x144   : > { %722 = vmatmul.mubr.f32.gmra.mrb[6].mxu0 %v586_v13 }
 0x145   : > { %727 = vmatprep.mubr.f32.mxu0 %v5343_v7  ;;  %4001 = vmatmul.mubr.f32.gmra.mrb[4].mxu1 %v588_v15 }
 0x146   : > { %4003 = vmatprep.mubr.f32.mxu1 %v589_v16 }
 0x148   : > { %728 = vmatmul.mubr.f32.gmra.mrb[8].mxu0 %v587_v14 }
 0x149   : > { %733 = vmatprep.mubr.f32.mxu0 %v5343_v7  ;;  %4004 = vmatmul.mubr.f32.gmra.mrb[6].mxu1 %v590_v17 }
 0x14c   : > { %734 = vmatmul.mubr.f32.gmra.mrb[10].mxu0 %v588_v15 }
 0x14d   : > { %739 = vmatprep.mubr.f32.mxu0 %v5343_v7 }
 0x150   : > { %740 = vmatmul.mubr.f32.gmra.mrb[12].mxu0 %v589_v16 }
 0x151   : > { %745 = vmatprep.mubr.f32.mxu0 %v5343_v7 }
 0x154   : > { %746 = vmatmul.mubr.f32.gmra.mrb[14].mxu0 %v590_v17 }
 0x20b   : > { %v705_v18 = vpop.f32.mrb[0].mxu0 }
 0x20c   : > { %857 = vst [vmem:[#allocation2] sm:$0xff] %v705_v18  ;;  %v707_v19 = vpop.f32.mrb[1].mxu0 }
 0x20d   : > { %858 = vst [vmem:[#allocation2 + $0x8] sm:$0xff] %v707_v19 }
 0x20f   : > { %v711_v20 = vpop.f32.mrb[2].mxu0 }
 0x210   : > { %860 = vst [vmem:[#allocation2 + $0x18] sm:$0xff] %v711_v20  ;;  %v713_v21 = vpop.f32.mrb[3].mxu0  ;;  %v3996_v22 = vpop.f32.mrb[0].mxu1 }
 0x211   : > { %861 = vst [vmem:[#allocation2 + $0x20] sm:$0xff] %v713_v21  ;;  %862 = vst [vmem:[#allocation2 + $0x28] sm:$0xff] %v3996_v22  ;;  %v818_v23 = vpop.f32.mrb[1].mxu1 }
 0x212   : > { %859 = vst [vmem:[#allocation2 + $0x10] sm:$0xff] %v818_v23 }
 0x213   : > { %v717_v24 = vpop.f32.mrb[4].mxu0 }
 0x214   : > { %863 = vst [vmem:[#allocation2 + $0x30] sm:$0xff] %v717_v24  ;;  %v719_v25 = vpop.f32.mrb[5].mxu0  ;;  %v3999_v26 = vpop.f32.mrb[2].mxu1 }
 0x215   : > { %864 = vst [vmem:[#allocation2 + $0x38] sm:$0xff] %v719_v25  ;;  %868 = vst [vmem:[#allocation2 + $0x58] sm:$0xff] %v3999_v26  ;;  %v828_v7 = vpop.f32.mrb[3].mxu1 }
 0x216   : > { %865 = vst [vmem:[#allocation2 + $0x40] sm:$0xff] %v828_v7 }
 0x217   : > { %v723_v27 = vpop.f32.mrb[6].mxu0 }
 0x218   : > { %866 = vst [vmem:[#allocation2 + $0x48] sm:$0xff] %v723_v27  ;;  %v725_v28 = vpop.f32.mrb[7].mxu0  ;;  %v4002_v29 = vpop.f32.mrb[4].mxu1 }
 0x219   : > { %867 = vst [vmem:[#allocation2 + $0x50] sm:$0xff] %v725_v28  ;;  %874 = vst [vmem:[#allocation2 + $0x88] sm:$0xff] %v4002_v29  ;;  %v838_v30 = vpop.f32.mrb[5].mxu1 }
 0x21a   : > { %871 = vst [vmem:[#allocation2 + $0x70] sm:$0xff] %v838_v30 }
 0x21b   : > { %v729_v31 = vpop.f32.mrb[8].mxu0 }
 0x21c   : > { %869 = vst [vmem:[#allocation2 + $0x60] sm:$0xff] %v729_v31  ;;  %v731_v32 = vpop.f32.mrb[9].mxu0  ;;  %v4005_v33 = vpop.f32.mrb[6].mxu1 }
 0x21d   : > { %870 = vst [vmem:[#allocation2 + $0x68] sm:$0xff] %v731_v32  ;;  %880 = vst [vmem:[#allocation2 + $0xb8] sm:$0xff] %v4005_v33  ;;  %v848_v34 = vpop.f32.mrb[7].mxu1 }
 0x21e   : > { %877 = vst [vmem:[#allocation2 + $0xa0] sm:$0xff] %v848_v34 }
 0x21f   : > { %v735_v35 = vpop.f32.mrb[10].mxu0 }
 0x220   : > { %872 = vst [vmem:[#allocation2 + $0x78] sm:$0xff] %v735_v35  ;;  %v737_v36 = vpop.f32.mrb[11].mxu0 }
 0x221   : > { %873 = vst [vmem:[#allocation2 + $0x80] sm:$0xff] %v737_v36 }
 0x223   : > { %v741_v37 = vpop.f32.mrb[12].mxu0 }
 0x224   : > { %875 = vst [vmem:[#allocation2 + $0x90] sm:$0xff] %v741_v37  ;;  %v743_v38 = vpop.f32.mrb[13].mxu0 }
 0x225   : > { %876 = vst [vmem:[#allocation2 + $0x98] sm:$0xff] %v743_v38 }
 0x227   : > { %v747_v39 = vpop.f32.mrb[14].mxu0 }
 0x228   : > { %878 = vst [vmem:[#allocation2 + $0xa8] sm:$0xff] %v747_v39  ;;  %v749_v40 = vpop.f32.mrb[15].mxu0 }
 0x229   : > { %879 = vst [vmem:[#allocation2 + $0xb0] sm:$0xff] %v749_v40 }
 0x22a PF: > { %v961_v41 = vld [vmem:[#allocation2] sm:$0xff]  ;;  %v962_v42 = vld [vmem:[#allocation2 + $0x18] sm:$0xff]  ;;  %v1164_v43 = vld [vmem:[#allocation2 + $0x10] sm:$0xff]  ;;  %v5344_v48 = vmov 0.0   ;;  %vm969_vm0 = vcmask 523264   ;;  %p3562_p6 = scmp.ne.s32.totalorder %s5436_s25, 1 }
 0x22b   : > { %v4310_v44 = vpack.c.bf16 %v962_v42, %v961_v41  ;;  %v1166_v45 = vld [vmem:[#allocation2 + $0x28] sm:$0xff]  ;;  %v1165_v47 = vld [vmem:[#allocation2 + $0x20] sm:$0xff]  ;;  %1291 = vmatprep.mubr.f32.mxu1 %v5344_v48  ;;  %v963_v51 = vld [vmem:[#allocation2 + $0x30] sm:$0xff] }
 0x22c   : > { %v1163_v46 = vld [vmem:[#allocation2 + $0x8] sm:$0xff]  ;;  %v4326_v49 = vpack.c.bf16 %v1166_v45, %v1164_v43  ;;  %v1168_v53 = vld [vmem:[#allocation2 + $0x40] sm:$0xff]  ;;  %v1170_v55 = vld [vmem:[#allocation2 + $0x58] sm:$0xff] }
 0x22d   : > { %v4328_v50 = vpack.c.bf16 %v1165_v47, %v1163_v46  ;;  %v964_v52 = vld [vmem:[#allocation2 + $0x48] sm:$0xff]  ;;  %4311 = vmatprep.subr.bf16.mxu0 %v4310_v44  ;;  %v1167_v56 = vld [vmem:[#allocation2 + $0x38] sm:$0xff]  ;;  %v1169_v57 = vld [vmem:[#allocation2 + $0x50] sm:$0xff]  ;;  %v4330_v58 = vpack.c.bf16 %v1170_v55, %v1168_v53 }
 0x22e   : > { %v4314_v54 = vpack.c.bf16 %v964_v52, %v963_v51  ;;  %4327 = vmatprep.subr.bf16.mxu1 %v4326_v49  ;;  %4313 = vmatpush3.bf16.msra.mxu0 %v4310_v44  ;;  %v965_v59 = vld [vmem:[#allocation2 + $0x60] sm:$0xff]  ;;  %v966_v60 = vld [vmem:[#allocation2 + $0x78] sm:$0xff]  ;;  %v1172_v61 = vld [vmem:[#allocation2 + $0x70] sm:$0xff]  ;;  %v4332_v62 = vpack.c.bf16 %v1169_v57, %v1167_v56 }
 0x22f   : > { %4329 = vmatpush1.bf16.msra.mxu1 %v4328_v50  ;;  %v4318_v63 = vpack.c.bf16 %v966_v60, %v965_v59  ;;  %v1174_v0 = vld [vmem:[#allocation2 + $0x88] sm:$0xff]  ;;  %v1173_v3 = vld [vmem:[#allocation2 + $0x80] sm:$0xff]  ;;  %v967_v4 = vld [vmem:[#allocation2 + $0x90] sm:$0xff] }
 0x230   : > { %4315 = vmatprep.subr.bf16.mxu0 %v4314_v54  ;;  %v1171_v1 = vld [vmem:[#allocation2 + $0x68] sm:$0xff]  ;;  %4331 = vmatprep.subr.bf16.mxu1 %v4330_v58  ;;  %v4334_v2 = vpack.c.bf16 %v1174_v0, %v1172_v61  ;;  %v1176_v6 = vld [vmem:[#allocation2 + $0xa0] sm:$0xff]  ;;  %v1178_v8 = vld [vmem:[#allocation2 + $0xb8] sm:$0xff] }
 0x231   : > { %v968_v5 = vld [vmem:[#allocation2 + $0xa8] sm:$0xff]  ;;  %v3621_v9 = vld [vmem:[%s5742_s18] sm:$0xff]   ;;  %v4336_v10 = vpack.c.bf16 %v1173_v3, %v1171_v1  ;;  %v1175_v12 = vld [vmem:[#allocation2 + $0x98] sm:$0xff]  ;;  %v4338_v14 = vpack.c.bf16 %v1178_v8, %v1176_v6 }
 0x232   : > { %4317 = vmatpush3.bf16.msra.mxu0 %v4314_v54  ;;  %v4322_v11 = vpack.c.bf16 %v968_v5, %v967_v4  ;;  %v3622_v13 = vunpack.c.l.bf16 %v3621_v9  ;;  %v1177_v15 = vld [vmem:[#allocation2 + $0xb0] sm:$0xff]  ;;  %v1404_v16 = vld [vmem:[#allocation11] sm:$0xff]  ;;  %v1405_v17 = vld [vmem:[#allocation11 + $0x8] sm:$0xff]  ;;  %v3623_v19 = vunpack.c.h.bf16 %v3621_v9 }
 0x233   : > { %4333 = vmatpush1.bf16.msra.mxu1 %v4332_v62  ;;  %4319 = vmatprep.subr.bf16.mxu0 %v4318_v63  ;;  %v4340_v18 = vpack.c.bf16 %v1177_v15, %v1175_v12  ;;  %v3589_v20 = vld [vmem:[%s5737_s12] sm:$0xff]   ;;  %v4342_v21 = vpack.c.bf16 %v1405_v17, %v1404_v16  ;;  %v3659_v22 = vld [vmem:[%s5742_s18 + $0x8] sm:$0xff]   ;;  %v1406_v23 = vld [vmem:[#allocation11 + $0x10] sm:$0xff] }
 0x234   : > { %4335 = vmatprep.subr.bf16.mxu1 %v4334_v2  ;;  %4022 = vmatprep.mubr.msk.f32.mxu0 %vm969_vm0, %v3622_v13  ;;  %v1407_v24 = vld [vmem:[#allocation11 + $0x18] sm:$0xff]  ;;  %v3590_v25 = vunpack.c.l.bf16 %v3589_v20  ;;  %v3626_v26 = vunpack.c.l.bf16 %v3659_v22  ;;  %v3660_v27 = vld [vmem:[%s5742_s18 + $0x10] sm:$0xff]   ;;  %v3627_v28 = vunpack.c.h.bf16 %v3659_v22  ;;  %v1408_v29 = vld [vmem:[#allocation11 + $0x20] sm:$0xff]  ;;  %v3591_v31 = vunpack.c.h.bf16 %v3589_v20 }
 0x235   : > { %1894 = vxpose.xlu0.b32.start [1/16] (narrow) %v3622_v13, 64  ;;  %v4346_v7 = vpack.c.bf16 %v1407_v24, %v1406_v23  ;;  %v1409_v30 = vld [vmem:[#allocation11 + $0x28] sm:$0xff]  ;;  %v3630_v32 = vunpack.c.l.bf16 %v3660_v27  ;;  %v5928_v35 = vld [vmem:[%s5742_s18 + $0x18] sm:$0xff]   ;;  %v3631_v36 = vunpack.c.h.bf16 %v3660_v27  ;;  %v1410_v37 = vld [vmem:[#allocation11 + $0x30] sm:$0xff] }
 0x236   : > { %4321 = vmatpush3.bf16.msra.mxu0 %v4318_v63  ;;  %v3652_v33 = vld [vmem:[%s5737_s12 + $0x8] sm:$0xff]   ;;  %v4350_v34 = vpack.c.bf16 %v1409_v30, %v1408_v29  ;;  %v1411_v38 = vld [vmem:[#allocation11 + $0x38] sm:$0xff]  ;;  %v3634_v40 = vunpack.c.l.bf16 %v5928_v35  ;;  %v5936_v42 = vld [vmem:[%s5742_s18 + $0x20] sm:$0xff]   ;;  %v3635_v43 = vunpack.c.h.bf16 %v5928_v35 }
 0x237   : > { %4337 = vmatpush1.bf16.msra.mxu1 %v4336_v10  ;;  %4323 = vmatprep.subr.bf16.mxu0 %v4322_v11  ;;  %v3594_v39 = vunpack.c.l.bf16 %v3652_v33  ;;  %v4354_v41 = vpack.c.bf16 %v1411_v38, %v1410_v37  ;;  %v1412_v44 = vld [vmem:[#allocation11 + $0x40] sm:$0xff]  ;;  %v1413_v45 = vld [vmem:[#allocation11 + $0x48] sm:$0xff]  ;;  %v3595_v46 = vunpack.c.h.bf16 %v3652_v33  ;;  %v3638_v47 = vunpack.c.l.bf16 %v5936_v42  ;;  %v3653_v49 = vld [vmem:[%s5737_s12 + $0x10] sm:$0xff]  }
 0x238   : > { %4339 = vmatprep.subr.bf16.mxu1 %v4338_v14  ;;  %v4358_v50 = vpack.c.bf16 %v1413_v45, %v1412_v44  ;;  %v5946_v51 = vld [vmem:[%s5742_s18 + $0x28] sm:$0xff]   ;;  %v3639_v52 = vunpack.c.h.bf16 %v5936_v42  ;;  %v1414_v53 = vld [vmem:[#allocation11 + $0x50] sm:$0xff]  ;;  %v1415_v54 = vld [vmem:[#allocation11 + $0x58] sm:$0xff]  ;;  %v3598_v55 = vunpack.c.l.bf16 %v3653_v49  ;;  %v3599_v62 = vunpack.c.h.bf16 %v3653_v49 }
 0x239   : > { %1895 = vxpose.xlu0.b32.cont [2/16] (narrow) %v3623_v19, 64  ;;  %v3642_v56 = vunpack.c.l.bf16 %v5946_v51  ;;  %v4362_v57 = vpack.c.bf16 %v1415_v54, %v1414_v53  ;;  %v5955_v58 = vld [vmem:[%s5742_s18 + $0x30] sm:$0xff]   ;;  %v3643_v59 = vunpack.c.h.bf16 %v5946_v51  ;;  %v1416_v60 = vld [vmem:[#allocation11 + $0x60] sm:$0xff]  ;;  %v1417_v61 = vld [vmem:[#allocation11 + $0x68] sm:$0xff] }
 0x23a   : > { %4325 = vmatpush3.bf16.msra.mxu0 %v4322_v11  ;;  %v3646_v63 = vunpack.c.l.bf16 %v5955_v58  ;;  %v3654_v0 = vld [vmem:[%s5737_s12 + $0x18] sm:$0xff]   ;;  %v4366_v1 = vpack.c.bf16 %v1417_v61, %v1416_v60  ;;  %v3647_v3 = vunpack.c.h.bf16 %v5955_v58  ;;  %v1418_v4 = vld [vmem:[#allocation11 + $0x70] sm:$0xff]  ;;  %v3655_v12 = vld [vmem:[%s5737_s12 + $0x20] sm:$0xff]  }
 0x23b   : > { %4341 = vmatpush1.bf16.msra.mxu1 %v4340_v18  ;;  %4343 = vmatprep.subr.bf16.mxu0 %v4342_v21  ;;  %v5965_v2 = vld [vmem:[%s5742_s18 + $0x38] sm:$0xff]   ;;  %v3602_v6 = vunpack.c.l.bf16 %v3654_v0  ;;  %v3603_v11 = vunpack.c.h.bf16 %v3654_v0  ;;  %v1388_v13 = vld [vmem:[%s5711_s16] sm:$0xff]  ;;  %v3606_v14 = vunpack.c.l.bf16 %v3655_v12  ;;  %v1389_v15 = vld [vmem:[%s5711_s16 + $0x8] sm:$0xff]  ;;  %v3607_v17 = vunpack.c.h.bf16 %v3655_v12 }
 0x23c   : > { %v1419_v5 = vld [vmem:[#allocation11 + $0x78] sm:$0xff]  ;;  %v3650_v8 = vunpack.c.l.bf16 %v5965_v2  ;;  %v3651_v10 = vunpack.c.h.bf16 %v5965_v2  ;;  %v1390_v16 = vld [vmem:[%s5711_s16 + $0x10] sm:$0xff]  ;;  %v3656_v20 = vld [vmem:[%s5737_s12 + $0x28] sm:$0xff]  }
 0x23d   : > { %4023 = vmatmul.mubr.msk.f32.vlgmr.msra.gmra.mrb[0].mxu0 %vm969_vm0, %v3623_v19  ;;  %1896 = vxpose.xlu0.b32.cont [3/16] (narrow) %v3626_v26, 64  ;;  %v4370_v9 = vpack.c.bf16 %v1419_v5, %v1418_v4  ;;  %v1391_v18 = vld [vmem:[%s5711_s16 + $0x18] sm:$0xff]  ;;  %v1392_v19 = vld [vmem:[%s5711_s16 + $0x20] sm:$0xff]  ;;  %v1393_v22 = vld [vmem:[%s5711_s16 + $0x28] sm:$0xff]  ;;  %v3611_v24 = vunpack.c.h.bf16 %v3656_v20 }
 0x23e   : > { %3482 = vmatmul.mubr.msk.f32.vlgmr.msra.gmra.mrb[0].mxu1 %vm969_vm0, %v3590_v25  ;;  %4345 = vmatpush3.bf16.msra.mxu0 %v4342_v21  ;;  %v3610_v21 = vunpack.c.l.bf16 %v3656_v20  ;;  %v1394_v23 = vld [vmem:[%s5711_s16 + $0x30] sm:$0xff]  ;;  %v1395_v25 = vld [vmem:[%s5711_s16 + $0x38] sm:$0xff]  ;;  %v1401_v35 = vld [vmem:[%s5711_s16 + $0x68] sm:$0xff] }
 0x23f   : > { %4025 = vmatprep.mubr.msk.f32.mxu0 %vm969_vm0, %v3626_v26  ;;  %1297 = vmatprep.mubr.f32.mxu1 %v5344_v48  ;;  %v1396_v26 = vld [vmem:[%s5711_s16 + $0x40] sm:$0xff]  ;;  %v1398_v29 = vld [vmem:[%s5711_s16 + $0x50] sm:$0xff]  ;;  %v3658_v33 = vld [vmem:[%s5737_s12 + $0x38] sm:$0xff]  }
 0x240   : > { %4347 = vmatprep.subr.bf16.mxu0 %v4346_v7  ;;  %v3619_v37 = vunpack.c.h.bf16 %v3658_v33  ;;  %v1403_v38 = vld [vmem:[%s5711_s16 + $0x78] sm:$0xff]  ;;  %v1647_v42 = vld [vmem:[#allocation10 + $0x10] sm:$0xff]  ;;  %v1649_v45 = vld [vmem:[#allocation10 + $0x20] sm:$0xff] }
 0x241   : > { %4026 = vmatmul.mubr.msk.f32.gmra.mrb[2].mxu0 %vm969_vm0, %v3627_v28  ;;  %1897 = vxpose.xlu0.b32.cont [4/16] (narrow) %v3627_v28, 64  ;;  %v1397_v28 = vld [vmem:[%s5711_s16 + $0x48] sm:$0xff]  ;;  %v1651_v49 = vld [vmem:[#allocation10 + $0x30] sm:$0xff]  ;;  %v1657_v58 = vld [vmem:[#allocation10 + $0x60] sm:$0xff] }
 0x242   : > { %3483 = vmatmul.mubr.msk.f32.gmra.mrb[2].mxu1 %vm969_vm0, %v3591_v31  ;;  %4349 = vmatpush3.bf16.msra.mxu0 %v4346_v7  ;;  %v3657_v7 = vld [vmem:[%s5737_s12 + $0x30] sm:$0xff]   ;;  %v1399_v31 = vld [vmem:[%s5711_s16 + $0x58] sm:$0xff]  ;;  %v1654_v53 = vld [vmem:[#allocation10 + $0x48] sm:$0xff] }
 0x243   : > { %4028 = vmatprep.mubr.msk.f32.mxu0 %vm969_vm0, %v3630_v32  ;;  %1303 = vmatprep.mubr.f32.mxu1 %v5344_v48  ;;  %v3614_v27 = vunpack.c.l.bf16 %v3657_v7  ;;  %v3615_v30 = vunpack.c.h.bf16 %v3657_v7  ;;  %v1659_v61 = vld [vmem:[#allocation10 + $0x70] sm:$0xff] }
 0x244   : > { %4351 = vmatprep.subr.bf16.mxu0 %v4350_v34 }
 0x245   : > { %4029 = vmatmul.mubr.msk.f32.gmra.mrb[4].mxu0 %vm969_vm0, %v3631_v36  ;;  %1898 = vxpose.xlu0.b32.cont [5/16] (narrow) %v3630_v32, 64  ;;  %v1400_v32 = vld [vmem:[%s5711_s16 + $0x60] sm:$0xff] }
 0x246   : > { %3484 = vmatmul.mubr.msk.f32.gmra.mrb[4].mxu1 %vm969_vm0, %v3594_v39  ;;  %4353 = vmatpush3.bf16.msra.mxu0 %v4350_v34  ;;  %v3618_v34 = vunpack.c.l.bf16 %v3658_v33  ;;  %v1645_v39 = vld [vmem:[#allocation10] sm:$0xff] }
 0x247   : > { %4031 = vmatprep.mubr.msk.f32.mxu0 %vm969_vm0, %v3634_v40  ;;  %1309 = vmatprep.mubr.f32.mxu1 %v5344_v48 }
 0x248   : > { %4355 = vmatprep.subr.bf16.mxu0 %v4354_v41 }
 0x249   : > { %4032 = vmatmul.mubr.msk.f32.gmra.mrb[6].mxu0 %vm969_vm0, %v3635_v43  ;;  %1899 = vxpose.xlu0.b32.cont [6/16] (narrow) %v3631_v36, 64  ;;  %v1402_v36 = vld [vmem:[%s5711_s16 + $0x70] sm:$0xff] }
 0x24a   : > { %3485 = vmatmul.mubr.msk.f32.gmra.mrb[6].mxu1 %vm969_vm0, %v3595_v46  ;;  %4357 = vmatpush3.bf16.msra.mxu0 %v4354_v41  ;;  %v1650_v46 = vld [vmem:[#allocation10 + $0x28] sm:$0xff] }
 0x24b   : > { %4034 = vmatprep.mubr.msk.f32.mxu0 %vm969_vm0, %v3638_v47  ;;  %1315 = vmatprep.mubr.f32.mxu1 %v5344_v48 }
 0x24c   : > { %4359 = vmatprep.subr.bf16.mxu0 %v4358_v50 }
 0x24d   : > { %4035 = vmatmul.mubr.msk.f32.gmra.mrb[8].mxu0 %vm969_vm0, %v3639_v52  ;;  %1900 = vxpose.xlu0.b32.cont [7/16] (narrow) %v3634_v40, 64  ;;  %v1646_v40 = vld [vmem:[#allocation10 + $0x8] sm:$0xff] }
 0x24e   : > { %3486 = vmatmul.mubr.msk.f32.gmra.mrb[8].mxu1 %vm969_vm0, %v3598_v55  ;;  %4361 = vmatpush3.bf16.msra.mxu0 %v4358_v50  ;;  %v4374_v41 = vpack.c.bf16 %v1646_v40, %v1645_v39  ;;  %v1652_v50 = vld [vmem:[#allocation10 + $0x38] sm:$0xff]  ;;  %v1655_v55 = vld [vmem:[#allocation10 + $0x50] sm:$0xff] }
 0x24f   : > { %4037 = vmatprep.mubr.msk.f32.mxu0 %vm969_vm0, %v3642_v56  ;;  %1321 = vmatprep.mubr.f32.mxu1 %v5344_v48  ;;  %v4386_v51 = vpack.c.bf16 %v1652_v50, %v1651_v49 }
 0x250   : > { %4363 = vmatprep.subr.bf16.mxu0 %v4362_v57 }
 0x251   : > { %4038 = vmatmul.mubr.msk.f32.gmra.mrb[10].mxu0 %vm969_vm0, %v3643_v59  ;;  %1901 = vxpose.xlu0.b32.cont [8/16] (narrow) %v3635_v43, 64  ;;  %v1648_v43 = vld [vmem:[#allocation10 + $0x18] sm:$0xff] }
 0x252   : > { %3487 = vmatmul.mubr.msk.f32.gmra.mrb[10].mxu1 %vm969_vm0, %v3599_v62  ;;  %4365 = vmatpush3.bf16.msra.mxu0 %v4362_v57  ;;  %v4378_v44 = vpack.c.bf16 %v1648_v43, %v1647_v42  ;;  %v1660_v62 = vld [vmem:[#allocation10 + $0x78] sm:$0xff] }
 0x253   : > { %4040 = vmatprep.mubr.msk.f32.mxu0 %vm969_vm0, %v3646_v63  ;;  %1327 = vmatprep.mubr.f32.mxu1 %v5344_v48 }
 0x254   : > { %4367 = vmatprep.subr.bf16.mxu0 %v4366_v1 }
 0x255   : > { %4041 = vmatmul.mubr.msk.f32.gmra.mrb[12].mxu0 %vm969_vm0, %v3647_v3  ;;  %1902 = vxpose.xlu0.b32.cont [9/16] (narrow) %v3638_v47, 64  ;;  %v4382_v47 = vpack.c.bf16 %v1650_v46, %v1649_v45 }
 0x256   : > { %3488 = vmatmul.mubr.msk.f32.gmra.mrb[12].mxu1 %vm969_vm0, %v3602_v6  ;;  %4369 = vmatpush3.bf16.msra.mxu0 %v4366_v1 }
 0x257   : > { %4043 = vmatprep.mubr.msk.f32.mxu0 %vm969_vm0, %v3650_v8  ;;  %1333 = vmatprep.mubr.f32.mxu1 %v5344_v48 }
 0x258   : > { %4371 = vmatprep.subr.bf16.mxu0 %v4370_v9 }
 0x259   : > { %4044 = vmatmul.mubr.msk.f32.gmra.mrb[14].mxu0 %vm969_vm0, %v3651_v10  ;;  %1903 = vxpose.xlu0.b32.cont [10/16] (narrow) %v3639_v52, 64  ;;  %v1653_v52 = vld [vmem:[#allocation10 + $0x40] sm:$0xff] }
 0x25a   : > { %3489 = vmatmul.mubr.msk.f32.gmra.mrb[14].mxu1 %vm969_vm0, %v3603_v11  ;;  %4373 = vmatpush3.bf16.msra.mxu0 %v4370_v9  ;;  %v4390_v54 = vpack.c.bf16 %v1654_v53, %v1653_v52 }
 0x25b   : > { %1339 = vmatprep.mubr.f32.mxu1 %v5344_v48  ;;  %4078 = vmatprep.mubr.f32.mxu0 %v1388_v13 }
 0x25c   : > { %4375 = vmatprep.subr.bf16.mxu0 %v4374_v41 }
 0x25d   : > { %4079 = vmatmul.mubr.f32.vlgmr.msra.gmra.mrb[16].mxu0 %v1389_v15  ;;  %1904 = vxpose.xlu0.b32.cont [11/16] (narrow) %v3642_v56, 64  ;;  %v1656_v56 = vld [vmem:[#allocation10 + $0x58] sm:$0xff] }
 0x25e   : > { %3490 = vmatmul.mubr.msk.f32.gmra.mrb[16].mxu1 %vm969_vm0, %v3606_v14  ;;  %4081 = vmatprep.mubr.f32.mxu0 %v1390_v16  ;;  %v4394_v57 = vpack.c.bf16 %v1656_v56, %v1655_v55 }
 0x25f   : > { %1345 = vmatprep.mubr.f32.mxu1 %v5344_v48  ;;  %4377 = vmatpush3.bf16.msra.mxu0 %v4374_v41 }
 0x260   : > { %4379 = vmatprep.subr.bf16.mxu0 %v4378_v44 }
 0x261   : > { %4082 = vmatmul.mubr.f32.gmra.mrb[18].mxu0 %v1391_v18  ;;  %1905 = vxpose.xlu0.b32.cont [12/16] (narrow) %v3643_v59, 64  ;;  %v1658_v59 = vld [vmem:[#allocation10 + $0x68] sm:$0xff] }
 0x262   : > { %3491 = vmatmul.mubr.msk.f32.gmra.mrb[18].mxu1 %vm969_vm0, %v3607_v17  ;;  %4084 = vmatprep.mubr.f32.mxu0 %v1392_v19  ;;  %v4398_v60 = vpack.c.bf16 %v1658_v59, %v1657_v58 }
 0x263   : > { %1351 = vmatprep.mubr.f32.mxu1 %v5344_v48  ;;  %4381 = vmatpush3.bf16.msra.mxu0 %v4378_v44 }
 0x264   : > { %4383 = vmatprep.subr.bf16.mxu0 %v4382_v47 }
 0x265   : > { %4085 = vmatmul.mubr.f32.gmra.mrb[20].mxu0 %v1393_v22  ;;  %1906 = vxpose.xlu0.b32.cont [13/16] (narrow) %v3646_v63, 64  ;;  %v4402_v63 = vpack.c.bf16 %v1660_v62, %v1659_v61 }
 0x266   : > { %3492 = vmatmul.mubr.msk.f32.gmra.mrb[20].mxu1 %vm969_vm0, %v3610_v21  ;;  %4087 = vmatprep.mubr.f32.mxu0 %v1394_v23 }
 0x267   : > { %1357 = vmatprep.mubr.f32.mxu1 %v5344_v48  ;;  %4385 = vmatpush3.bf16.msra.mxu0 %v4382_v47 }
 0x268   : > { %4387 = vmatprep.subr.bf16.mxu0 %v4386_v51 }
 0x269   : > { %4088 = vmatmul.mubr.f32.gmra.mrb[22].mxu0 %v1395_v25  ;;  %1907 = vxpose.xlu0.b32.cont [14/16] (narrow) %v3647_v3, 64 }
 0x26a   : > { %3493 = vmatmul.mubr.msk.f32.gmra.mrb[22].mxu1 %vm969_vm0, %v3611_v24  ;;  %4090 = vmatprep.mubr.f32.mxu0 %v1396_v26 }
 0x26b   : > { %1363 = vmatprep.mubr.f32.mxu1 %v5344_v48  ;;  %4389 = vmatpush3.bf16.msra.mxu0 %v4386_v51 }
 0x26c   : > { %4391 = vmatprep.subr.bf16.mxu0 %v4390_v54 }
 0x26d   : > { %4091 = vmatmul.mubr.f32.gmra.mrb[24].mxu0 %v1397_v28  ;;  %1908 = vxpose.xlu0.b32.cont [15/16] (narrow) %v3650_v8, 64 }
 0x26e   : > { %3494 = vmatmul.mubr.msk.f32.gmra.mrb[24].mxu1 %vm969_vm0, %v3614_v27  ;;  %4093 = vmatprep.mubr.f32.mxu0 %v1398_v29 }
 0x26f   : > { %1369 = vmatprep.mubr.f32.mxu1 %v5344_v48  ;;  %4393 = vmatpush3.bf16.msra.mxu0 %v4390_v54 }
 0x270   : > { %4395 = vmatprep.subr.bf16.mxu0 %v4394_v57 }
 0x271   : > { %4094 = vmatmul.mubr.f32.gmra.mrb[26].mxu0 %v1399_v31  ;;  %1909 = vxpose.xlu0.b32.end [16/16] (narrow) %v3651_v10, 64 }
 0x272   : > { %3495 = vmatmul.mubr.msk.f32.gmra.mrb[26].mxu1 %vm969_vm0, %v3615_v30  ;;  %4096 = vmatprep.mubr.f32.mxu0 %v1400_v32 }
 0x273   : > { %1375 = vmatprep.mubr.f32.mxu1 %v5344_v48  ;;  %4397 = vmatpush3.bf16.msra.mxu0 %v4394_v57 }
 0x274   : > { %4399 = vmatprep.subr.bf16.mxu0 %v4398_v60 }
 0x275   : > { %4097 = vmatmul.mubr.f32.gmra.mrb[28].mxu0 %v1401_v35 }
 0x276   : > { %3496 = vmatmul.mubr.msk.f32.gmra.mrb[28].mxu1 %vm969_vm0, %v3618_v34  ;;  %4099 = vmatprep.mubr.f32.mxu0 %v1402_v36 }
 0x277   : > { %1381 = vmatprep.mubr.f32.mxu1 %v5344_v48  ;;  %4401 = vmatpush3.bf16.msra.mxu0 %v4398_v60 }
 0x278   : > { %4403 = vmatprep.subr.bf16.mxu0 %v4402_v63 }
 0x279   : > { %4100 = vmatmul.mubr.f32.gmra.mrb[30].mxu0 %v1403_v38 }
 0x27a   : > { %3497 = vmatmul.mubr.msk.f32.gmra.mrb[30].mxu1 %vm969_vm0, %v3619_v37 }
 0x27b   : > { %4405 = vmatpush3.bf16.msra.mxu0 %v4402_v63 }
 0x310   : > { %v4024_v0 = vpop.f32.mrb[0].mxu0 }
 0x311   : > { %v1084_v1 = vpop.f32.mrb[1].mxu0  ;;  %v1293_v2 = vpop.f32.mrb[0].mxu1 }
 0x312   : > { %v1565_v3 = vmul.f32 %v1293_v2, %v1084_v1  ;;  %v6016_v4 = vpop.f32.mrb[1].mxu1 }
 0x314   : > { %v4027_v5 = vpop.f32.mrb[2].mxu0  ;;  %v1581_v36 = vmul.f32 0.17677669, %v1565_v3 }
 0x315   : > { %v1299_v6 = vpop.f32.mrb[2].mxu1  ;;  %v1094_v8 = vpop.f32.mrb[3].mxu0 }
 0x316   : > { %v1566_v9 = vmul.f32 %v4024_v0, %v1299_v6  ;;  %v6018_v10 = vpop.f32.mrb[3].mxu1  ;;  %v3498_v44 = vclamps-f32 %v1581_v36, 5.0 }
 0x318   : > { %v4030_v11 = vpop.f32.mrb[4].mxu0  ;;  %v1582_v35 = vmul.f32 0.17677669, %v1566_v9 }
 0x319   : > { %v1305_v12 = vpop.f32.mrb[4].mxu1  ;;  %v1104_v13 = vpop.f32.mrb[5].mxu0 }
 0x31a   : > { %v1567_v14 = vmul.f32 %v1305_v12, %v1094_v8  ;;  %v6020_v15 = vpop.f32.mrb[5].mxu1  ;;  %v3499_v42 = vclamps-f32 %v1582_v35, 5.0 }
 0x31c   : > { %v4033_v16 = vpop.f32.mrb[6].mxu0  ;;  %v1583_v45 = vmul.f32 0.17677669, %v1567_v14 }
 0x31d   : > { %v1311_v17 = vpop.f32.mrb[6].mxu1  ;;  %v1114_v18 = vpop.f32.mrb[7].mxu0 }
 0x31e   : > { %v1568_v19 = vmul.f32 %v4027_v5, %v1311_v17  ;;  %v6022_v20 = vpop.f32.mrb[7].mxu1  ;;  %v3500_v56 = vclamps-f32 %v1583_v45, 5.0 }
 0x320   : > { %v4036_v21 = vpop.f32.mrb[8].mxu0  ;;  %v1584_v43 = vmul.f32 0.17677669, %v1568_v19 }
 0x321   : > { %v1317_v22 = vpop.f32.mrb[8].mxu1  ;;  %v1124_v23 = vpop.f32.mrb[9].mxu0 }
 0x322   : > { %v1569_v24 = vmul.f32 %v1317_v22, %v1104_v13  ;;  %v6024_v25 = vpop.f32.mrb[9].mxu1  ;;  %v3501_v54 = vclamps-f32 %v1584_v43, 5.0 }
 0x324   : > { %v6026_v26 = vpop.f32.mrb[10].mxu0  ;;  %v1585_v57 = vmul.f32 0.17677669, %v1569_v24 }
 0x325   : > { %v1323_v7 = vpop.f32.mrb[10].mxu1  ;;  %v1134_v27 = vpop.f32.mrb[11].mxu0 }
 0x326   : > { %v1570_v28 = vmul.f32 %v4030_v11, %v1323_v7  ;;  %v6028_v29 = vpop.f32.mrb[11].mxu1  ;;  %v3502_v3 = vclamps-f32 %v1585_v57, 5.0 }
 0x328   : > { %v6030_v30 = vpop.f32.mrb[12].mxu0  ;;  %v1586_v55 = vmul.f32 0.17677669, %v1570_v28 }
 0x329   : > { %v1329_v31 = vpop.f32.mrb[12].mxu1  ;;  %v6032_v32 = vpop.f32.mrb[13].mxu0 }
 0x32a   : > { %v1571_v33 = vmul.f32 %v1329_v31, %v1114_v18  ;;  %v6034_v34 = vpop.f32.mrb[13].mxu1  ;;  %v3503_v1 = vclamps-f32 %v1586_v55, 5.0 }
 0x32c   : > { %v6036_v37 = vpop.f32.mrb[14].mxu0  ;;  %v1587_v5 = vmul.f32 0.17677669, %v1571_v33 }
 0x32d   : > { %v1335_v38 = vpop.f32.mrb[14].mxu1  ;;  %v6038_v39 = vpop.f32.mrb[15].mxu0 }
 0x32e   : > { %v1572_v40 = vmul.f32 %v4033_v16, %v1335_v38  ;;  %v6040_v41 = vpop.f32.mrb[15].mxu1  ;;  %v3504_v18 = vclamps-f32 %v1587_v5, 5.0 }
 0x330   : > { %v4080_v46 = vpop.f32.mrb[16].mxu0  ;;  %v1588_v2 = vmul.f32 0.17677669, %v1572_v40 }
 0x331   : > { %v1341_v47 = vpop.f32.mrb[16].mxu1  ;;  %v6042_v49 = vmul.f32 %v4080_v46, %v3499_v42  ;;  %v1486_v50 = vpop.f32.mrb[17].mxu0 }
 0x332   : > { %v1573_v51 = vmul.f32 %v1341_v47, %v1124_v23  ;;  %v6044_v52 = vmul.f32 %v3498_v44, %v1486_v50  ;;  %v6046_v53 = vpop.f32.mrb[17].mxu1  ;;  %v3505_v16 = vclamps-f32 %v1588_v2, 5.0 }
 0x334   : > { %v4083_v58 = vpop.f32.mrb[18].mxu0  ;;  %4134 = vmatprep.mubr.f32.mxu0 %v6044_v52  ;;  %v1589_v19 = vmul.f32 0.17677669, %v1573_v51 }
 0x335   : > { %v1347_v59 = vpop.f32.mrb[18].mxu1  ;;  %v6049_v60 = vmul.f32 %v4083_v58, %v3501_v54  ;;  %v1496_v61 = vpop.f32.mrb[19].mxu0  ;;  %4135 = vmatmul.mubr.f32.vlgmr.msra.gmra.mrb[32].mxu0 %v6042_v49 }
 0x336   : > { %v1574_v62 = vmul.f32 %v4036_v21, %v1347_v59  ;;  %v6052_v63 = vmul.f32 %v3500_v56, %v1496_v61  ;;  %v6054_v0 = vpop.f32.mrb[19].mxu1  ;;  %v3506_v33 = vclamps-f32 %v1589_v19, 5.0 }
 0x338   : > { %v4086_v6 = vpop.f32.mrb[20].mxu0  ;;  %4137 = vmatprep.mubr.f32.mxu0 %v6052_v63  ;;  %v1590_v17 = vmul.f32 0.17677669, %v1574_v62 }
 0x339   : > { %v1353_v8 = vpop.f32.mrb[20].mxu1  ;;  %v6057_v9 = vmul.f32 %v4086_v6, %v3503_v1  ;;  %v1506_v11 = vpop.f32.mrb[21].mxu0  ;;  %4138 = vmatmul.mubr.f32.gmra.mrb[34].mxu0 %v6049_v60 }
 0x33a   : > { %v1575_v12 = vmul.f32 %v1353_v8, %v1134_v27  ;;  %v6060_v13 = vmul.f32 %v3502_v3, %v1506_v11  ;;  %v6062_v14 = vpop.f32.mrb[21].mxu1  ;;  %v3507_v31 = vclamps-f32 %v1590_v17, 5.0 }
 0x33c   : > { %v4089_v21 = vpop.f32.mrb[22].mxu0  ;;  %4140 = vmatprep.mubr.f32.mxu0 %v6060_v13  ;;  %v1591_v35 = vmul.f32 0.17677669, %v1575_v12 }
 0x33d   : > { %v1359_v22 = vpop.f32.mrb[22].mxu1  ;;  %v6065_v23 = vmul.f32 %v4089_v21, %v3505_v16  ;;  %v1516_v24 = vpop.f32.mrb[23].mxu0  ;;  %4141 = vmatmul.mubr.f32.gmra.mrb[36].mxu0 %v6057_v9 }
 0x33e   : > { %v1576_v7 = vmul.f32 %v6026_v26, %v1359_v22  ;;  %v6069_v27 = vmul.f32 %v3504_v18, %v1516_v24  ;;  %v6071_v28 = vpop.f32.mrb[23].mxu1  ;;  %v3508_v47 = vclamps-f32 %v1591_v35, 5.0 }
 0x340   : > { %v1592_v36 = vmul.f32 0.17677669, %v1576_v7  ;;  %v4092_v38 = vpop.f32.mrb[24].mxu0  ;;  %4143 = vmatprep.mubr.f32.mxu0 %v6069_v27 }
 0x341   : > { %v1365_v40 = vpop.f32.mrb[24].mxu1  ;;  %v6074_v42 = vmul.f32 %v4092_v38, %v3507_v31  ;;  %v1526_v43 = vpop.f32.mrb[25].mxu0  ;;  %4144 = vmatmul.mubr.f32.gmra.mrb[38].mxu0 %v6065_v23 }
 0x342   : > { %v1577_v44 = vmul.f32 %v1365_v40, %v6032_v32  ;;  %v6078_v26 = vmul.f32 %v3506_v33, %v1526_v43  ;;  %v6080_v45 = vpop.f32.mrb[25].mxu1  ;;  %v3509_v46 = vclamps-f32 %v1592_v36, 5.0  ;;  %v1910_v31 = vpop.trf.xlu0 }
 0x343   : > { %4190 = vmatprep.mubr.f32.mxu1 %v1910_v31 }
 0x344   : > { %v1593_v50 = vmul.f32 0.17677669, %v1577_v44  ;;  %v4095_v51 = vpop.f32.mrb[26].mxu0  ;;  %4146 = vmatprep.mubr.f32.mxu0 %v6078_v26 }
 0x345   : > { %v1371_v54 = vpop.f32.mrb[26].mxu1  ;;  %v6083_v55 = vmul.f32 %v4095_v51, %v3509_v46  ;;  %v1536_v56 = vpop.f32.mrb[27].mxu0  ;;  %4147 = vmatmul.mubr.f32.gmra.mrb[40].mxu0 %v6074_v42 }
 0x346   : > { %v1578_v57 = vmul.f32 %v6030_v30, %v1371_v54  ;;  %v6087_v58 = vmul.f32 %v3508_v47, %v1536_v56  ;;  %v6089_v32 = vpop.f32.mrb[27].mxu1  ;;  %v3510_v59 = vclamps-f32 %v1593_v50, 5.0 }
 0x348   : > { %v1594_v61 = vmul.f32 0.17677669, %v1578_v57  ;;  %v4098_v62 = vpop.f32.mrb[28].mxu0  ;;  %4149 = vmatprep.mubr.f32.mxu0 %v6087_v58 }
 0x349   : > { %v1377_v1 = vpop.f32.mrb[28].mxu1  ;;  %v1546_v2 = vpop.f32.mrb[29].mxu0  ;;  %4150 = vmatmul.mubr.f32.gmra.mrb[42].mxu0 %v6083_v55 }
 0x34a   : > { %v3511_v3 = vclamps-f32 %v1594_v61, 5.0  ;;  %v1579_v5 = vmul.f32 %v1377_v1, %v6038_v39  ;;  %v6094_v6 = vmul.f32 %v3510_v59, %v1546_v2  ;;  %v6096_v8 = vpop.f32.mrb[29].mxu1 }
 0x34c   : > { %v1595_v30 = vmul.f32 0.17677669, %v1579_v5  ;;  %v6098_v11 = vmul.f32 %v4098_v62, %v3511_v3  ;;  %4152 = vmatprep.mubr.f32.mxu0 %v6094_v6  ;;  %v4101_v12 = vpop.f32.mrb[30].mxu0 }
 0x34d   : > { %v1383_v16 = vpop.f32.mrb[30].mxu1  ;;  %v1556_v17 = vpop.f32.mrb[31].mxu0 }
 0x34e   : > { %v3512_v18 = vclamps-f32 %v1595_v30, 5.0  ;;  %v1580_v19 = vmul.f32 %v6036_v37, %v1383_v16  ;;  %4153 = vmatmul.mubr.f32.gmra.mrb[44].mxu0 %v6098_v11  ;;  %v6103_v21 = vpop.f32.mrb[31].mxu1 }
 0x350   : > { %v1596_v39 = vmul.f32 0.17677669, %v1580_v19  ;;  %v6105_v22 = vmul.f32 %v3512_v18, %v1556_v17 }
 0x352   : > { %v3513_v24 = vclamps-f32 %v1596_v39, 5.0  ;;  %4155 = vmatprep.mubr.f32.mxu0 %v6105_v22 }
 0x354   : > { %v6108_v7 = vmul.f32 %v4101_v12, %v3513_v24 }
 0x356   : > { %4156 = vmatmul.mubr.f32.gmra.mrb[46].mxu0 %v6108_v7 }
 0x357   : > { %4234 = vmatprep.mubr.f32.mxu0 %v1910_v31 }
 0x408   : > { %v4136_v33 = vpop.f32.mrb[32].mxu0 }
 0x409   : > { %v3515_v35 = vclamps-f32 %v4136_v33, 5.0  ;;  %v1727_v37 = vpop.f32.mrb[33].mxu0 }
 0x40a   : > { %v3514_v36 = vclamps-f32 %v1727_v37, 5.0 }
 0x40b   : > { %v1840_v38 = vmul.f32 1.442695, %v3515_v35 }
 0x40c   : > { %v1838_v40 = vmul.f32 1.442695, %v3514_v36  ;;  %v4139_v43 = vpop.f32.mrb[34].mxu0 }
 0x40d   : > { %4747 = vpow2.f32 %v1840_v38  ;;  %v3517_v44 = vclamps-f32 %v4139_v43, 5.0  ;;  %v1737_v46 = vpop.f32.mrb[35].mxu0 }
 0x40e   : > { %4749 = vpow2.f32 %v1838_v40  ;;  %v3516_v47 = vclamps-f32 %v1737_v46, 5.0 }
 0x40f   : > { %v1844_v50 = vmul.f32 1.442695, %v3517_v44 }
 0x410   : > { %v1842_v51 = vmul.f32 1.442695, %v3516_v47  ;;  %v4142_v54 = vpop.f32.mrb[36].mxu0 }
 0x411   : > { %4751 = vpow2.f32 %v1844_v50  ;;  %v3519_v56 = vclamps-f32 %v4142_v54, 5.0  ;;  %v1747_v57 = vpop.f32.mrb[37].mxu0 }
 0x412   : > { %4753 = vpow2.f32 %v1842_v51  ;;  %v3518_v59 = vclamps-f32 %v1747_v57, 5.0 }
 0x413   : > { %v1848_v61 = vmul.f32 1.442695, %v3519_v56 }
 0x414   : > { %v1846_v62 = vmul.f32 1.442695, %v3518_v59  ;;  %v4145_v1 = vpop.f32.mrb[38].mxu0 }
 0x415   : > { %4755 = vpow2.f32 %v1848_v61  ;;  %v3521_v2 = vclamps-f32 %v4145_v1, 5.0  ;;  %v1757_v3 = vpop.f32.mrb[39].mxu0 }
 0x416   : > { %4757 = vpow2.f32 %v1846_v62  ;;  %v3520_v5 = vclamps-f32 %v1757_v3, 5.0 }
 0x417   : > { %v4748_v30 = vpop.eup %4747  ;;  %v1852_v12 = vmul.f32 1.442695, %v3521_v2 }
 0x418   : > { %v4750_v16 = vpop.eup %4749  ;;  %v1850_v17 = vmul.f32 1.442695, %v3520_v5  ;;  %v4148_v18 = vpop.f32.mrb[40].mxu0  ;;  %v1879_v19 = vmul.f32 %v4748_v30, %v6018_v10 }
 0x419   : > { %4759 = vpow2.f32 %v1852_v12  ;;  %v3523_v39 = vclamps-f32 %v4148_v18, 5.0  ;;  %v1767_v24 = vpop.f32.mrb[41].mxu0  ;;  %v4438_v31 = vpack.c.bf16 %v4748_v30, %v4750_v16  ;;  %v1878_v33 = vmul.f32 %v4750_v16, %v6016_v4 }
 0x41a   : > { %4761 = vpow2.f32 %v1850_v17  ;;  %v3522_v35 = vclamps-f32 %v1767_v24, 5.0 }
 0x41b   : > { %v4752_v37 = vpop.eup %4751  ;;  %v1856_v36 = vmul.f32 1.442695, %v3523_v39  ;;  %4439 = vmatprep.subr.bf16.mxu0 %v4438_v31  ;;  %v4406_v38 = vpack.c.bf16 %v1879_v19, %v1878_v33 }
 0x41c   : > { %v4754_v40 = vpop.eup %4753  ;;  %v1854_v43 = vmul.f32 1.442695, %v3522_v35  ;;  %v4151_v44 = vpop.f32.mrb[42].mxu0  ;;  %4441 = vmatpush3.bf16.msra.mxu0 %v4438_v31  ;;  %v1881_v46 = vmul.f32 %v4752_v37, %v6022_v20 }
 0x41d   : > { %4763 = vpow2.f32 %v1856_v36  ;;  %v3525_v10 = vclamps-f32 %v4151_v44, 5.0  ;;  %v1777_v47 = vpop.f32.mrb[43].mxu0  ;;  %4407 = vmatprep.subr.bf16.mxu1 %v4406_v38  ;;  %v4442_v50 = vpack.c.bf16 %v4752_v37, %v4754_v40  ;;  %v1880_v51 = vmul.f32 %v4754_v40, %v6020_v15  ;;  %v6119_v31 = vpop.trf.xlu0 }
 0x41e   : > { %4765 = vpow2.f32 %v1854_v43  ;;  %v3524_v4 = vclamps-f32 %v1777_v47, 5.0  ;;  %4409 = vmatpush3.bf16.msra.mxu1 %v4406_v38 }
 0x41f   : > { %v4756_v54 = vpop.eup %4755  ;;  %v1860_v56 = vmul.f32 1.442695, %v3525_v10  ;;  %4443 = vmatprep.subr.bf16.mxu0 %v4442_v50  ;;  %v4410_v57 = vpack.c.bf16 %v1881_v46, %v1880_v51 }
 0x420   : > { %v4758_v59 = vpop.eup %4757  ;;  %v1858_v61 = vmul.f32 1.442695, %v3524_v4  ;;  %4445 = vmatpush3.bf16.msra.mxu0 %v4442_v50  ;;  %v1883_v62 = vmul.f32 %v4756_v54, %v6028_v29 }
 0x421   : > { %4767 = vpow2.f32 %v1860_v56  ;;  %v4154_v20 = vpop.f32.mrb[44].mxu0  ;;  %4411 = vmatprep.subr.bf16.mxu1 %v4410_v57  ;;  %v4446_v1 = vpack.c.bf16 %v4756_v54, %v4758_v59  ;;  %v1882_v2 = vmul.f32 %v4758_v59, %v6024_v25  ;;  %v1912_v46 = vpop.trf.xlu0 }
 0x422   : > { %4769 = vpow2.f32 %v1858_v61  ;;  %v3527_v15 = vclamps-f32 %v4154_v20, 5.0  ;;  %v1787_v3 = vpop.f32.mrb[45].mxu0  ;;  %4413 = vmatpush3.bf16.msra.mxu1 %v4410_v57 }
 0x423   : > { %v4760_v5 = vpop.eup %4759  ;;  %v3526_v30 = vclamps-f32 %v1787_v3, 5.0  ;;  %4447 = vmatprep.subr.bf16.mxu0 %v4446_v1  ;;  %v4414_v12 = vpack.c.bf16 %v1883_v62, %v1882_v2  ;;  %v2179_v3 = vld [vmem:[#allocation16 + $0x18] sm:$0xff] }
 0x424   : > { %v4762_v16 = vpop.eup %4761  ;;  %v1864_v17 = vmul.f32 1.442695, %v3527_v15  ;;  %4449 = vmatpush3.bf16.msra.mxu0 %v4446_v1  ;;  %v1885_v18 = vmul.f32 %v4760_v5, %v6040_v41  ;;  %v2177_v15 = vld [vmem:[#allocation16 + $0x8] sm:$0xff] }
 0x425   : > { %v1862_v29 = vmul.f32 1.442695, %v3526_v30  ;;  %4415 = vmatprep.subr.bf16.mxu1 %v4414_v12  ;;  %v4450_v19 = vpack.c.bf16 %v4760_v5, %v4762_v16  ;;  %v1884_v39 = vmul.f32 %v4762_v16, %v6034_v34  ;;  %v1913_v59 = vpop.trf.xlu0  ;;  %v2176_v16 = vld [vmem:[#allocation16] sm:$0xff] }
 0x426   : > { %4771 = vpow2.f32 %v1864_v17  ;;  %4417 = vmatpush3.bf16.msra.mxu1 %v4414_v12  ;;  %v4470_v12 = vpack.c.bf16 %v2179_v3, %v2177_v15  ;;  %v2181_v17 = vld [vmem:[#allocation16 + $0x28] sm:$0xff]  ;;  %v2207_v3 = vld [vmem:[#allocation16 + $0xf8] sm:$0xff] }
 0x427   : > { %v4764_v25 = vpop.eup %4763  ;;  %4773 = vpow2.f32 %v1862_v29  ;;  %4451 = vmatprep.subr.bf16.mxu0 %v4450_v19  ;;  %v4418_v24 = vpack.c.bf16 %v1885_v18, %v1884_v39  ;;  %v2183_v18 = vld [vmem:[#allocation16 + $0x38] sm:$0xff]  ;;  %v2205_v15 = vld [vmem:[#allocation16 + $0xe8] sm:$0xff] }
 0x428   : > { %v4766_v33 = vpop.eup %4765  ;;  %4453 = vmatpush3.bf16.msra.mxu0 %v4450_v19  ;;  %v1887_v35 = vmul.f32 %v4764_v25, %v6054_v0  ;;  %v4474_v39 = vpack.c.bf16 %v2183_v18, %v2181_v17  ;;  %v2615_v17 = vld [vmem:[#allocation17 + $0xb0] sm:$0xff]  ;;  %v2616_v18 = vld [vmem:[#allocation17 + $0xb8] sm:$0xff] }
 0x429   : > { %v4157_v37 = vpop.f32.mrb[46].mxu0  ;;  %4419 = vmatprep.subr.bf16.mxu1 %v4418_v24  ;;  %v4454_v41 = vpack.c.bf16 %v4764_v25, %v4766_v33  ;;  %v1886_v36 = vmul.f32 %v4766_v33, %v6046_v53  ;;  %v2182_v25 = vld [vmem:[#allocation16 + $0x30] sm:$0xff] }
 0x42a   : > { %v3529_v38 = vclamps-f32 %v4157_v37, 5.0  ;;  %v1797_v40 = vpop.f32.mrb[47].mxu0  ;;  %4421 = vmatpush3.bf16.msra.mxu1 %v4418_v24  ;;  %v2185_v24 = vld [vmem:[#allocation16 + $0x48] sm:$0xff] }
 0x42b   : > { %v4768_v34 = vpop.eup %4767  ;;  %v3528_v43 = vclamps-f32 %v1797_v40, 5.0  ;;  %4455 = vmatprep.subr.bf16.mxu0 %v4454_v41  ;;  %v4422_v44 = vpack.c.bf16 %v1887_v35, %v1886_v36  ;;  %v2186_v36 = vld [vmem:[#allocation16 + $0x50] sm:$0xff]  ;;  %v2191_v40 = vld [vmem:[#allocation16 + $0x78] sm:$0xff] }
 0x42c   : > { %v4770_v10 = vpop.eup %4769  ;;  %v1868_v47 = vmul.f32 1.442695, %v3529_v38  ;;  %4457 = vmatpush3.bf16.msra.mxu0 %v4454_v41  ;;  %v1889_v50 = vmul.f32 %v4768_v34, %v6071_v28  ;;  %v2184_v41 = vld [vmem:[#allocation16 + $0x40] sm:$0xff]  ;;  %v2189_v38 = vld [vmem:[#allocation16 + $0x68] sm:$0xff] }
 0x42d   : > { %v1866_v51 = vmul.f32 1.442695, %v3528_v43  ;;  %4423 = vmatprep.subr.bf16.mxu1 %v4422_v44  ;;  %v4458_v0 = vpack.c.bf16 %v4768_v34, %v4770_v10  ;;  %v1888_v4 = vmul.f32 %v4770_v10, %v6062_v14  ;;  %v1914_v14 = vpop.trf.xlu0  ;;  %v4480_v34 = vpack.c.bf16 %v2186_v36, %v2184_v41  ;;  %v2193_v10 = vld [vmem:[#allocation16 + $0x88] sm:$0xff]  ;;  %v2619_v41 = vld [vmem:[#allocation17 + $0xd0] sm:$0xff]  ;;  %v2620_v36 = vld [vmem:[#allocation17 + $0xd8] sm:$0xff] }
 0x42e   : > { %4775 = vpow2.f32 %v1868_v47  ;;  %4425 = vmatpush3.bf16.msra.mxu1 %v4422_v44  ;;  %v4482_v43 = vpack.c.bf16 %v2191_v40, %v2189_v38  ;;  %v2188_v44 = vld [vmem:[#allocation16 + $0x60] sm:$0xff]  ;;  %v4522_v38 = vpack.c.bf16 %v2620_v36, %v2619_v41  ;;  %v2603_v40 = vld [vmem:[#allocation17 + $0x50] sm:$0xff] }
 0x42f   : > { %4777 = vpow2.f32 %v1866_v51  ;;  %4459 = vmatprep.subr.bf16.mxu0 %v4458_v0  ;;  %v4426_v53 = vpack.c.bf16 %v1889_v50, %v1888_v4  ;;  %v2194_v4 = vld [vmem:[#allocation16 + $0x90] sm:$0xff] }
 0x430   : > { %v4772_v54 = vpop.eup %4771  ;;  %4461 = vmatpush3.bf16.msra.mxu0 %v4458_v0  ;;  %v2192_v0 = vld [vmem:[#allocation16 + $0x80] sm:$0xff] }
 0x431   : > { %v4774_v56 = vpop.eup %4773  ;;  %4427 = vmatprep.subr.bf16.mxu1 %v4426_v53  ;;  %v1891_v57 = vmul.f32 %v4772_v54, %v6089_v32  ;;  %v1915_v29 = vpop.trf.xlu0 }
 0x432   : > { %4429 = vmatpush3.bf16.msra.mxu1 %v4426_v53  ;;  %v4462_v61 = vpack.c.bf16 %v4772_v54, %v4774_v56  ;;  %v1890_v28 = vmul.f32 %v4774_v56, %v6080_v45  ;;  %v2178_v45 = vld [vmem:[#allocation16 + $0x10] sm:$0xff]  ;;  %v2197_v53 = vld [vmem:[#allocation16 + $0xa8] sm:$0xff]  ;;  %v2199_v54 = vld [vmem:[#allocation16 + $0xb8] sm:$0xff]  ;;  %v4488_v56 = vpack.c.bf16 %v2194_v4, %v2192_v0 }
 0x433   : > { %v4472_v19 = vpack.c.bf16 %v2178_v45, %v2176_v16  ;;  %v2624_v0 = vld [vmem:[#allocation17 + $0xf8] sm:$0xff] }
 0x434   : > { %4463 = vmatprep.subr.bf16.mxu0 %v4462_v61  ;;  %v4430_v62 = vpack.c.bf16 %v1891_v57, %v1890_v28  ;;  %v4490_v57 = vpack.c.bf16 %v2199_v54, %v2197_v53  ;;  %v2201_v28 = vld [vmem:[#allocation16 + $0xc8] sm:$0xff]  ;;  %v2607_v53 = vld [vmem:[#allocation17 + $0x70] sm:$0xff]  ;;  %v2608_v54 = vld [vmem:[#allocation17 + $0x78] sm:$0xff] }
 0x435   : > { %4465 = vmatpush3.bf16.msra.mxu0 %v4462_v61  ;;  %v1916_v35 = vpop.trf.xlu0  ;;  %v2198_v61 = vld [vmem:[#allocation16 + $0xb0] sm:$0xff] }
 0x436   : > { %4431 = vmatprep.subr.bf16.mxu1 %v4430_v62 }
 0x437   : > { %4433 = vmatpush3.bf16.msra.mxu1 %v4430_v62  ;;  %v2203_v62 = vld [vmem:[#allocation16 + $0xd8] sm:$0xff] }
 0x438   : > { %v4776_v20 = vpop.eup %4775 }
 0x439   : > { %v4778_v1 = vpop.eup %4777  ;;  %v1893_v2 = vmul.f32 %v4776_v20, %v6103_v21  ;;  %v2180_v21 = vld [vmem:[#allocation16 + $0x20] sm:$0xff]  ;;  %v1917_v47 = vpop.trf.xlu0 }
 0x43a   : > { %v4466_v5 = vpack.c.bf16 %v4776_v20, %v4778_v1  ;;  %v1892_v32 = vmul.f32 %v4778_v1, %v6096_v8  ;;  %v2187_v8 = vld [vmem:[#allocation16 + $0x58] sm:$0xff]  ;;  %v4476_v33 = vpack.c.bf16 %v2182_v25, %v2180_v21  ;;  %v4494_v20 = vpack.c.bf16 %v2203_v62, %v2201_v28  ;;  %v2200_v1 = vld [vmem:[#allocation16 + $0xc0] sm:$0xff] }
 0x43b   : > { %v4478_v37 = vpack.c.bf16 %v2187_v8, %v2185_v24  ;;  %v2617_v25 = vld [vmem:[#allocation17 + $0xc0] sm:$0xff]  ;;  %v2618_v24 = vld [vmem:[#allocation17 + $0xc8] sm:$0xff] }
 0x43c   : > { %4467 = vmatprep.subr.bf16.mxu0 %v4466_v5  ;;  %v4434_v30 = vpack.c.bf16 %v1893_v2, %v1892_v32  ;;  %v2202_v2 = vld [vmem:[#allocation16 + $0xd0] sm:$0xff]  ;;  %v4498_v32 = vpack.c.bf16 %v2207_v3, %v2205_v15  ;;  %v4518_v8 = vpack.c.bf16 %v2618_v24, %v2617_v25  ;;  %v1870_v62 = vld [vmem:[#allocation3] sm:$0xff]  ;;  %v2050_v15 = vld [vmem:[#allocation4 + $0x18] sm:$0xff] }
 0x43d   : > { %4469 = vmatpush3.bf16.msra.mxu0 %v4466_v5  ;;  %v4496_v5 = vpack.c.bf16 %v2202_v2, %v2200_v1  ;;  %v1876_v25 = vld [vmem:[#allocation3 + $0x30] sm:$0xff] }
 0x43e   : > { %4435 = vmatprep.subr.bf16.mxu1 %v4434_v30 }
 0x43f   : > { %4437 = vmatpush3.bf16.msra.mxu1 %v4434_v30  ;;  %v2204_v30 = vld [vmem:[#allocation16 + $0xe0] sm:$0xff] }
 0x440   : > { %4471 = vmatprep.subr.bf16.mxu1 %v4470_v12  ;;  %4235 = vmatmul.mubr.f32.vlgmr.msra.gmra.mrb[48].mxu0 %v6119_v31  ;;  %v2206_v12 = vld [vmem:[#allocation16 + $0xf0] sm:$0xff] }
 0x441   : > { %4237 = vmatprep.mubr.f32.mxu0 %v1912_v46  ;;  %v4500_v16 = vpack.c.bf16 %v2206_v12, %v2204_v30  ;;  %v1873_v12 = vld [vmem:[#allocation3 + $0x18] sm:$0xff] }
 0x442   : > { %4191 = vmatmul.mubr.f32.vlgmr.msra.gmra.mrb[32].mxu1 %v6119_v31  ;;  %v2190_v31 = vld [vmem:[#allocation16 + $0x70] sm:$0xff] }
 0x443   : > { %4473 = vmatpush1.bf16.msra.mxu1 %v4472_v19  ;;  %4193 = vmatprep.mubr.f32.mxu1 %v1912_v46  ;;  %v2195_v46 = vld [vmem:[#allocation16 + $0x98] sm:$0xff]  ;;  %v4484_v50 = vpack.c.bf16 %v2190_v31, %v2188_v44  ;;  %v2599_v19 = vld [vmem:[#allocation17 + $0x30] sm:$0xff]  ;;  %v2621_v44 = vld [vmem:[#allocation17 + $0xe0] sm:$0xff] }
 0x444   : > { %4475 = vmatprep.subr.bf16.mxu1 %v4474_v39  ;;  %4238 = vmatmul.mubr.f32.gmra.mrb[50].mxu0 %v1913_v59  ;;  %v4486_v51 = vpack.c.bf16 %v2195_v46, %v2193_v10  ;;  %v2600_v39 = vld [vmem:[#allocation17 + $0x38] sm:$0xff]  ;;  %v2622_v31 = vld [vmem:[#allocation17 + $0xe8] sm:$0xff]  ;;  %v2605_v46 = vld [vmem:[#allocation17 + $0x60] sm:$0xff] }
 0x445   : > { %4240 = vmatprep.mubr.f32.mxu0 %v1914_v14  ;;  %v4516_v21 = vpack.c.bf16 %v2600_v39, %v2599_v19  ;;  %v4526_v10 = vpack.c.bf16 %v2622_v31, %v2621_v44  ;;  %v1877_v39 = vld [vmem:[#allocation3 + $0x38] sm:$0xff] }
 0x446   : > { %4194 = vmatmul.mubr.f32.gmra.mrb[34].mxu1 %v1913_v59  ;;  %v2196_v59 = vld [vmem:[#allocation16 + $0xa0] sm:$0xff] }
 0x447   : > { %4477 = vmatpush1.bf16.msra.mxu1 %v4476_v33  ;;  %4196 = vmatprep.mubr.f32.mxu1 %v1914_v14  ;;  %v4492_v14 = vpack.c.bf16 %v2198_v61, %v2196_v59  ;;  %v2601_v33 = vld [vmem:[#allocation17 + $0x40] sm:$0xff]  ;;  %v1871_v61 = vld [vmem:[#allocation3 + $0x8] sm:$0xff] }
 0x448   : > { %4479 = vmatprep.subr.bf16.mxu1 %v4478_v37  ;;  %4241 = vmatmul.mubr.f32.gmra.mrb[52].mxu0 %v1915_v29  ;;  %v2047_v59 = vld [vmem:[#allocation4] sm:$0xff] }
 0x449   : > { %4243 = vmatprep.mubr.f32.mxu0 %v1916_v35 }
 0x44a   : > { %4197 = vmatmul.mubr.f32.gmra.mrb[36].mxu1 %v1915_v29  ;;  %v4514_v29 = vpack.c.bf16 %v2616_v18, %v2615_v17 }
 0x44b   : > { %4481 = vmatpush1.bf16.msra.mxu1 %v4480_v34  ;;  %4199 = vmatprep.mubr.f32.mxu1 %v1916_v35  ;;  %v2602_v35 = vld [vmem:[#allocation17 + $0x48] sm:$0xff]  ;;  %v2604_v34 = vld [vmem:[#allocation17 + $0x58] sm:$0xff] }
 0x44c   : > { %4483 = vmatprep.subr.bf16.mxu1 %v4482_v43  ;;  %4244 = vmatmul.mubr.f32.gmra.mrb[54].mxu0 %v1917_v47  ;;  %v4520_v37 = vpack.c.bf16 %v2602_v35, %v2601_v33  ;;  %v4524_v43 = vpack.c.bf16 %v2604_v34, %v2603_v40 }
 0x44e   : > { %4200 = vmatmul.mubr.f32.gmra.mrb[38].mxu1 %v1917_v47  ;;  %v2606_v47 = vld [vmem:[#allocation17 + $0x68] sm:$0xff] }
 0x44f   : > { %4485 = vmatpush1.bf16.msra.mxu1 %v4484_v50  ;;  %2272 = vmatprep.mubr.f32.mxu1 %v5344_v48  ;;  %v4528_v50 = vpack.c.bf16 %v2606_v47, %v2605_v46 }
 0x450   : > { %4487 = vmatprep.subr.bf16.mxu1 %v4486_v51  ;;  %v2623_v51 = vld [vmem:[#allocation17 + $0xf0] sm:$0xff] }
 0x451   : > { %v4530_v4 = vpack.c.bf16 %v2624_v0, %v2623_v51 }
 0x453   : > { %4489 = vmatpush1.bf16.msra.mxu1 %v4488_v56  ;;  %v4532_v56 = vpack.c.bf16 %v2608_v54, %v2607_v53 }
 0x454   : > { %4491 = vmatprep.subr.bf16.mxu1 %v4490_v57  ;;  %v2048_v57 = vld [vmem:[#allocation4 + $0x8] sm:$0xff] }
 0x457   : > { %4493 = vmatpush1.bf16.msra.mxu1 %v4492_v14 }
 0x458   : > { %4495 = vmatprep.subr.bf16.mxu1 %v4494_v20 }
 0x45b   : > { %4497 = vmatpush1.bf16.msra.mxu1 %v4496_v5 }
 0x45c   : > { %4499 = vmatprep.subr.bf16.mxu1 %v4498_v32  ;;  %v2049_v32 = vld [vmem:[#allocation4 + $0x10] sm:$0xff] }
 0x45f   : > { %4501 = vmatpush1.bf16.msra.mxu1 %v4500_v16 }
 0x462   : > { %2273 = vmatmul.mubr.f32.vlgmr.msra.gmra.mrb[40].mxu1 %v6044_v52  ;;  %v2610_v52 = vld [vmem:[#allocation17 + $0x88] sm:$0xff] }
 0x463   : > { %2278 = vmatprep.mubr.f32.mxu1 %v5344_v48 }
 0x466   : > { %2279 = vmatmul.mubr.f32.gmra.mrb[42].mxu1 %v6042_v49  ;;  %v2609_v49 = vld [vmem:[#allocation17 + $0x80] sm:$0xff] }
 0x467   : > { %2284 = vmatprep.mubr.f32.mxu1 %v5344_v48 }
 0x46a   : > { %2285 = vmatmul.mubr.f32.gmra.mrb[44].mxu1 %v6052_v63  ;;  %v2593_v63 = vld [vmem:[#allocation17] sm:$0xff] }
 0x46b   : > { %2290 = vmatprep.mubr.f32.mxu1 %v5344_v48 }
 0x46e   : > { %2291 = vmatmul.mubr.f32.gmra.mrb[46].mxu1 %v6049_v60  ;;  %v4502_v60 = vpack.c.bf16 %v2610_v52, %v2609_v49  ;;  %v1872_v49 = vld [vmem:[#allocation3 + $0x10] sm:$0xff] }
 0x46f   : > { %2296 = vmatprep.mubr.f32.mxu1 %v5344_v48 }
 0x470   : > { %4503 = vmatprep.subr.bf16.mxu0 %v4502_v60  ;;  %4598 = vmatprep.subr.bf16.mxu1 %v4502_v60 }
 0x472   : > { %2297 = vmatmul.mubr.f32.gmra.mrb[48].mxu1 %v6060_v13 }
 0x473   : > { %2302 = vmatprep.mubr.f32.mxu1 %v5344_v48 }
 0x476   : > { %2303 = vmatmul.mubr.f32.gmra.mrb[50].mxu1 %v6057_v9  ;;  %v2594_v9 = vld [vmem:[#allocation17 + $0x8] sm:$0xff] }
 0x477   : > { %2308 = vmatprep.mubr.f32.mxu1 %v5344_v48  ;;  %v4504_v13 = vpack.c.bf16 %v2594_v9, %v2593_v63 }
 0x479   : > { %4505 = vmatpush3.bf16.msra.mxu0 %v4504_v13  ;;  %4606 = vmatpush3.bf16.msra.mxu1 %v4504_v13  ;;  %v2052_v13 = vld [vmem:[#allocation4 + $0x28] sm:$0xff] }
 0x47a   : > { %2309 = vmatmul.mubr.f32.gmra.mrb[52].mxu1 %v6069_v27  ;;  %v2612_v27 = vld [vmem:[#allocation17 + $0x98] sm:$0xff] }
 0x47b   : > { %2314 = vmatprep.mubr.f32.mxu1 %v5344_v48 }
 0x47e   : > { %2315 = vmatmul.mubr.f32.gmra.mrb[54].mxu1 %v6065_v23  ;;  %v2611_v23 = vld [vmem:[#allocation17 + $0x90] sm:$0xff] }
 0x47f   : > { %2320 = vmatprep.mubr.f32.mxu1 %v5344_v48 }
 0x482   : > { %2321 = vmatmul.mubr.f32.gmra.mrb[56].mxu1 %v6078_v26  ;;  %v2595_v26 = vld [vmem:[#allocation17 + $0x10] sm:$0xff] }
 0x483   : > { %2326 = vmatprep.mubr.f32.mxu1 %v5344_v48 }
 0x486   : > { %2327 = vmatmul.mubr.f32.gmra.mrb[58].mxu1 %v6074_v42  ;;  %v4506_v42 = vpack.c.bf16 %v2612_v27, %v2611_v23 }
 0x487   : > { %2332 = vmatprep.mubr.f32.mxu1 %v5344_v48 }
 0x488   : > { %4507 = vmatprep.subr.bf16.mxu0 %v4506_v42  ;;  %4599 = vmatprep.subr.bf16.mxu1 %v4506_v42  ;;  %v2051_v42 = vld [vmem:[#allocation4 + $0x20] sm:$0xff] }
 0x48a   : > { %2333 = vmatmul.mubr.f32.gmra.mrb[60].mxu1 %v6087_v58 }
 0x48b   : > { %2338 = vmatprep.mubr.f32.mxu1 %v5344_v48 }
 0x48e   : > { %2339 = vmatmul.mubr.f32.gmra.mrb[62].mxu1 %v6083_v55  ;;  %v2596_v55 = vld [vmem:[#allocation17 + $0x18] sm:$0xff] }
 0x48f   : > { %2344 = vmatprep.mubr.f32.mxu1 %v5344_v48  ;;  %v4508_v58 = vpack.c.bf16 %v2596_v55, %v2595_v26  ;;  %v1875_v55 = vld [vmem:[#allocation3 + $0x28] sm:$0xff] }
 0x491   : > { %4509 = vmatpush3.bf16.msra.mxu0 %v4508_v58  ;;  %4607 = vmatpush3.bf16.msra.mxu1 %v4508_v58 }
 0x492   : > { %2345 = vmatmul.mubr.f32.gmra.mrb[64].mxu1 %v6094_v6  ;;  %v2614_v6 = vld [vmem:[#allocation17 + $0xa8] sm:$0xff] }
 0x493   : > { %2350 = vmatprep.mubr.f32.mxu1 %v5344_v48 }
 0x496   : > { %2351 = vmatmul.mubr.f32.gmra.mrb[66].mxu1 %v6098_v11 }
 0x497   : > { %2356 = vmatprep.mubr.f32.mxu1 %v5344_v48 }
 0x49a   : > { %2357 = vmatmul.mubr.f32.gmra.mrb[68].mxu1 %v6105_v22  ;;  %v2597_v22 = vld [vmem:[#allocation17 + $0x20] sm:$0xff] }
 0x49b   : > { %2362 = vmatprep.mubr.f32.mxu1 %v5344_v48  ;;  %v2613_v48 = vld [vmem:[#allocation17 + $0xa0] sm:$0xff] }
 0x49c   : > { %v4510_v11 = vpack.c.bf16 %v2614_v6, %v2613_v48  ;;  %v1874_v48 = vld [vmem:[#allocation3 + $0x20] sm:$0xff] }
 0x49e   : > { %2363 = vmatmul.mubr.f32.gmra.mrb[70].mxu1 %v6108_v7  ;;  %v2598_v7 = vld [vmem:[#allocation17 + $0x28] sm:$0xff]  ;;  %4511 = vmatprep.subr.bf16.mxu0 %v4510_v11 }
 0x49f   : > { %v4512_v45 = vpack.c.bf16 %v2598_v7, %v2597_v22  ;;  %4600 = vmatprep.subr.bf16.mxu1 %v4510_v11 }
 0x4a1   : > { %4513 = vmatpush3.bf16.msra.mxu0 %v4512_v45  ;;  %4608 = vmatpush3.bf16.msra.mxu1 %v4512_v45  ;;  %v2054_v45 = vld [vmem:[#allocation4 + $0x38] sm:$0xff] }
 0x4a2   : > { %4515 = vmatprep.subr.bf16.mxu0 %v4514_v29  ;;  %4601 = vmatprep.subr.bf16.mxu1 %v4514_v29  ;;  %v2053_v29 = vld [vmem:[#allocation4 + $0x30] sm:$0xff] }
 0x4a5   : > { %4517 = vmatpush3.bf16.msra.mxu0 %v4516_v21  ;;  %4609 = vmatpush3.bf16.msra.mxu1 %v4516_v21 }
 0x4a6   : > { %4519 = vmatprep.subr.bf16.mxu0 %v4518_v8  ;;  %4602 = vmatprep.subr.bf16.mxu1 %v4518_v8 }
 0x4a9   : > { %4521 = vmatpush3.bf16.msra.mxu0 %v4520_v37  ;;  %4610 = vmatpush3.bf16.msra.mxu1 %v4520_v37 }
 0x4aa   : > { %4523 = vmatprep.subr.bf16.mxu0 %v4522_v38  ;;  %4603 = vmatprep.subr.bf16.mxu1 %v4522_v38 }
 0x4ad   : > { %4525 = vmatpush3.bf16.msra.mxu0 %v4524_v43  ;;  %4611 = vmatpush3.bf16.msra.mxu1 %v4524_v43 }
 0x4ae   : > { %4527 = vmatprep.subr.bf16.mxu0 %v4526_v10  ;;  %4604 = vmatprep.subr.bf16.mxu1 %v4526_v10 }
 0x4b1   : > { %4529 = vmatpush3.bf16.msra.mxu0 %v4528_v50  ;;  %4612 = vmatpush3.bf16.msra.mxu1 %v4528_v50 }
 0x4b2   : > { %4531 = vmatprep.subr.bf16.mxu0 %v4530_v4  ;;  %4605 = vmatprep.subr.bf16.mxu1 %v4530_v4 }
 0x4b5   : > { %4533 = vmatpush3.bf16.msra.mxu0 %v4532_v56  ;;  %4613 = vmatpush3.bf16.msra.mxu1 %v4532_v56 }
 0x513   : > { %v4236_v28 = vpop.f32.mrb[48].mxu0 }
 0x514   : > { %v2161_v14 = vadd.f32 %v4236_v28, %v2048_v57  ;;  %v2121_v20 = vpop.f32.mrb[49].mxu0 }
 0x515   : > { %v4192_v1 = vpop.f32.mrb[32].mxu1  ;;  %v2160_v2 = vadd.f32 %v2121_v20, %v2047_v59 }
 0x516   : > { %v2032_v3 = vadd.f32 %v4192_v1, %v1871_v61  ;;  %v1992_v5 = vpop.f32.mrb[33].mxu1  ;;  %2169 = vst [vmem:[#allocation4 + $0x8] sm:$0xff] %v2161_v14 }
 0x517   : > { %v2031_v30 = vadd.f32 %v1992_v5, %v1870_v62  ;;  %2168 = vst [vmem:[#allocation4] sm:$0xff] %v2160_v2  ;;  %v4239_v16 = vpop.f32.mrb[50].mxu0 }
 0x518   : > { %2040 = vst [vmem:[#allocation3 + $0x8] sm:$0xff] %v2032_v3  ;;  %v2163_v52 = vadd.f32 %v4239_v16, %v2050_v15  ;;  %v2131_v60 = vpop.f32.mrb[51].mxu0 }
 0x519   : > { %2039 = vst [vmem:[#allocation3] sm:$0xff] %v2031_v30  ;;  %v4195_v63 = vpop.f32.mrb[34].mxu1  ;;  %v2162_v9 = vadd.f32 %v2131_v60, %v2049_v32 }
 0x51a   : > { %v2034_v23 = vadd.f32 %v4195_v63, %v1873_v12  ;;  %v2002_v27 = vpop.f32.mrb[35].mxu1  ;;  %2171 = vst [vmem:[#allocation4 + $0x18] sm:$0xff] %v2163_v52 }
 0x51b   : > { %v2033_v26 = vadd.f32 %v2002_v27, %v1872_v49  ;;  %2170 = vst [vmem:[#allocation4 + $0x10] sm:$0xff] %v2162_v9  ;;  %v4242_v58 = vpop.f32.mrb[52].mxu0 }
 0x51c   : > { %2042 = vst [vmem:[#allocation3 + $0x18] sm:$0xff] %v2034_v23  ;;  %v2165_v6 = vadd.f32 %v4242_v58, %v2052_v13  ;;  %v2141_v11 = vpop.f32.mrb[53].mxu0 }
 0x51d   : > { %2041 = vst [vmem:[#allocation3 + $0x10] sm:$0xff] %v2033_v26  ;;  %v4198_v22 = vpop.f32.mrb[36].mxu1  ;;  %v2164_v7 = vadd.f32 %v2141_v11, %v2051_v42 }
 0x51e   : > { %v2036_v17 = vadd.f32 %v4198_v22, %v1875_v55  ;;  %v2012_v18 = vpop.f32.mrb[37].mxu1  ;;  %2173 = vst [vmem:[#allocation4 + $0x28] sm:$0xff] %v2165_v6 }
 0x51f   : > { %v2035_v19 = vadd.f32 %v2012_v18, %v1874_v48  ;;  %2172 = vst [vmem:[#allocation4 + $0x20] sm:$0xff] %v2164_v7  ;;  %v4245_v21 = vpop.f32.mrb[54].mxu0 }
 0x520   : > { %2044 = vst [vmem:[#allocation3 + $0x28] sm:$0xff] %v2036_v17  ;;  %v2167_v24 = vadd.f32 %v4245_v21, %v2054_v45  ;;  %v2151_v8 = vpop.f32.mrb[55].mxu0 }
 0x521   : > { %2043 = vst [vmem:[#allocation3 + $0x20] sm:$0xff] %v2035_v19  ;;  %v4201_v33 = vpop.f32.mrb[38].mxu1  ;;  %v2166_v35 = vadd.f32 %v2151_v8, %v2053_v29 }
 0x522   : > { %v2038_v37 = vadd.f32 %v4201_v33, %v1877_v39  ;;  %v2022_v41 = vpop.f32.mrb[39].mxu1  ;;  %2175 = vst [vmem:[#allocation4 + $0x38] sm:$0xff] %v2167_v24 }
 0x523   : > { %v2037_v36 = vadd.f32 %v2022_v41, %v1876_v25  ;;  %2174 = vst [vmem:[#allocation4 + $0x30] sm:$0xff] %v2166_v35 }
 0x524   : > { %2046 = vst [vmem:[#allocation3 + $0x38] sm:$0xff] %v2038_v37 }
 0x525   : > { %2045 = vst [vmem:[#allocation3 + $0x30] sm:$0xff] %v2037_v36 }
 0x535   : > { %v6163_v38 = vpop.f32.mrb[40].mxu1 }
 0x536   : > { %v3530_v40 = vmul.f32 -1.442695, %v6163_v38  ;;  %v2276_v34 = vpop.f32.mrb[41].mxu1 }
 0x537   : > { %v3531_v43 = vmul.f32 -1.442695, %v2276_v34 }
 0x538   : > { %4779 = vpow2.f32 %v3530_v40 }
 0x539   : > { %4781 = vpow2.f32 %v3531_v43  ;;  %v6166_v44 = vpop.f32.mrb[42].mxu1 }
 0x53a   : > { %v3532_v31 = vmul.f32 -1.442695, %v6166_v44  ;;  %v6169_v10 = vpop.f32.mrb[43].mxu1 }
 0x53b   : > { %v3533_v46 = vmul.f32 -1.442695, %v6169_v10 }
 0x53c   : > { %4783 = vpow2.f32 %v3532_v31 }
 0x53d   : > { %4785 = vpow2.f32 %v3533_v46  ;;  %v6172_v47 = vpop.f32.mrb[44].mxu1 }
 0x53e   : > { %v3534_v50 = vmul.f32 -1.442695, %v6172_v47  ;;  %v6175_v51 = vpop.f32.mrb[45].mxu1 }
 0x53f   : > { %v3535_v0 = vmul.f32 -1.442695, %v6175_v51 }
 0x540   : > { %4787 = vpow2.f32 %v3534_v50 }
 0x541   : > { %4789 = vpow2.f32 %v3535_v0  ;;  %v6178_v4 = vpop.f32.mrb[46].mxu1 }
 0x542   : > { %v4780_v53 = vpop.eup %4779  ;;  %v3536_v54 = vmul.f32 -1.442695, %v6178_v4  ;;  %v6181_v56 = vpop.f32.mrb[47].mxu1 }
 0x543   : > { %v4782_v57 = vpop.eup %4781  ;;  %v2465_v59 = vadd.f32 1.0, %v4780_v53  ;;  %v3537_v61 = vmul.f32 -1.442695, %v6181_v56 }
 0x544   : > { %v2466_v28 = vadd.f32 1.0, %v4782_v57  ;;  %4791 = vpow2.f32 %v3536_v54 }
 0x545   : > { %4793 = vrcp.f32 %v2465_v59  ;;  %v6184_v62 = vpop.f32.mrb[48].mxu1 }
 0x546   : > { %v4784_v14 = vpop.eup %4783  ;;  %4795 = vrcp.f32 %v2466_v28  ;;  %v3538_v20 = vmul.f32 -1.442695, %v6184_v62  ;;  %v6187_v1 = vpop.f32.mrb[49].mxu1 }
 0x547   : > { %v4786_v2 = vpop.eup %4785  ;;  %v2467_v15 = vadd.f32 1.0, %v4784_v14  ;;  %4797 = vpow2.f32 %v3537_v61  ;;  %v3539_v3 = vmul.f32 -1.442695, %v6187_v1 }
 0x548   : > { %v2468_v5 = vadd.f32 1.0, %v4786_v2  ;;  %4799 = vpow2.f32 %v3538_v20 }
 0x549   : > { %4801 = vrcp.f32 %v2467_v15  ;;  %v6190_v32 = vpop.f32.mrb[50].mxu1 }
 0x54a   : > { %v4788_v30 = vpop.eup %4787  ;;  %4803 = vrcp.f32 %v2468_v5  ;;  %v3540_v12 = vmul.f32 -1.442695, %v6190_v32  ;;  %v6193_v16 = vpop.f32.mrb[51].mxu1 }
 0x54b   : > { %v4790_v49 = vpop.eup %4789  ;;  %v2469_v52 = vadd.f32 1.0, %v4788_v30  ;;  %4805 = vpow2.f32 %v3539_v3  ;;  %v3541_v60 = vmul.f32 -1.442695, %v6193_v16 }
 0x54c   : > { %v2470_v63 = vadd.f32 1.0, %v4790_v49  ;;  %4807 = vpow2.f32 %v3540_v12 }
 0x54d   : > { %4809 = vrcp.f32 %v2469_v52  ;;  %v6196_v9 = vpop.f32.mrb[52].mxu1 }
 0x54e   : > { %v4792_v13 = vpop.eup %4791  ;;  %4811 = vrcp.f32 %v2470_v63  ;;  %v3542_v23 = vmul.f32 -1.442695, %v6196_v9  ;;  %v6199_v27 = vpop.f32.mrb[53].mxu1 }
 0x54f   : > { %v4794_v42 = vpop.eup %4793  ;;  %v2471_v26 = vadd.f32 1.0, %v4792_v13  ;;  %4813 = vpow2.f32 %v3541_v60  ;;  %v3543_v55 = vmul.f32 -1.442695, %v6199_v27 }
 0x550   : > { %v4796_v58 = vpop.eup %4795  ;;  %4815 = vpow2.f32 %v3542_v23  ;;  %v2561_v7 = vmul.f32 %v4794_v42, %v6163_v38 }
 0x551   : > { %v4798_v48 = vpop.eup %4797  ;;  %v2562_v6 = vmul.f32 %v4796_v58, %v2276_v34  ;;  %v6202_v11 = vpop.f32.mrb[54].mxu1  ;;  %4817 = vpow2.f32 %v3543_v55 }
 0x552   : > { %v4800_v22 = vpop.eup %4799  ;;  %v2472_v45 = vadd.f32 1.0, %v4798_v48  ;;  %v3544_v17 = vmul.f32 -1.442695, %v6202_v11  ;;  %v6206_v18 = vpop.f32.mrb[55].mxu1  ;;  %4819 = vrcp.f32 %v2471_v26 }
 0x553   : > { %v4802_v29 = vpop.eup %4801  ;;  %v2473_v19 = vadd.f32 1.0, %v4800_v22  ;;  %v3545_v39 = vmul.f32 -1.442695, %v6206_v18  ;;  %2689 = vmatprep.mubr.f32.mxu0 %v2562_v6 }
 0x554   : > { %v4804_v21 = vpop.eup %4803  ;;  %4821 = vrcp.f32 %v2472_v45  ;;  %2690 = vmatmul.mubr.f32.vlgmr.msra.gmra.mrb[56].mxu0 %v2561_v7  ;;  %v2563_v35 = vmul.f32 %v4802_v29, %v6166_v44 }
 0x555   : > { %v4806_v25 = vpop.eup %4805  ;;  %v2564_v24 = vmul.f32 %v4804_v21, %v6169_v10  ;;  %4823 = vrcp.f32 %v2473_v19  ;;  %v6210_v8 = vpop.f32.mrb[56].mxu1 }
 0x556   : > { %v4808_v33 = vpop.eup %4807  ;;  %v2474_v37 = vadd.f32 1.0, %v4806_v25  ;;  %4825 = vpow2.f32 %v3544_v17  ;;  %v3546_v41 = vmul.f32 -1.442695, %v6210_v8  ;;  %v6214_v36 = vpop.f32.mrb[57].mxu1 }
 0x557   : > { %v4810_v38 = vpop.eup %4809  ;;  %v2475_v40 = vadd.f32 1.0, %v4808_v33  ;;  %4827 = vpow2.f32 %v3545_v39  ;;  %v3547_v34 = vmul.f32 -1.442695, %v6214_v36  ;;  %2694 = vmatprep.mubr.f32.mxu0 %v2564_v24 }
 0x558   : > { %v4812_v43 = vpop.eup %4811  ;;  %4829 = vrcp.f32 %v2474_v37  ;;  %2695 = vmatmul.mubr.f32.gmra.mrb[58].mxu0 %v2563_v35  ;;  %v2565_v50 = vmul.f32 %v4810_v38, %v6172_v47 }
 0x559   : > { %v4814_v31 = vpop.eup %4813  ;;  %v2566_v10 = vmul.f32 %v4812_v43, %v6175_v51  ;;  %4831 = vrcp.f32 %v2475_v40  ;;  %v6218_v44 = vpop.f32.mrb[58].mxu1 }
 0x55a   : > { %v4816_v46 = vpop.eup %4815  ;;  %v2476_v0 = vadd.f32 1.0, %v4814_v31  ;;  %4833 = vpow2.f32 %v3546_v41  ;;  %v3548_v53 = vmul.f32 -1.442695, %v6218_v44  ;;  %v6222_v54 = vpop.f32.mrb[59].mxu1 }
 0x55b   : > { %v2477_v57 = vadd.f32 1.0, %v4816_v46  ;;  %4835 = vpow2.f32 %v3547_v34  ;;  %2699 = vmatprep.mubr.f32.mxu0 %v2566_v10  ;;  %v4818_v59 = vpop.eup %4817  ;;  %v3549_v61 = vmul.f32 -1.442695, %v6222_v54 }
 0x55c   : > { %4837 = vrcp.f32 %v2476_v0  ;;  %2700 = vmatmul.mubr.f32.gmra.mrb[60].mxu0 %v2565_v50  ;;  %v4820_v51 = vpop.eup %4819  ;;  %v2478_v28 = vadd.f32 1.0, %v4818_v59 }
 0x55d   : > { %4839 = vrcp.f32 %v2477_v57  ;;  %v6225_v14 = vpop.f32.mrb[60].mxu1  ;;  %v2567_v12 = vmul.f32 %v4820_v51, %v6178_v4 }
 0x55e   : > { %v4822_v47 = vpop.eup %4821  ;;  %4841 = vpow2.f32 %v3548_v53  ;;  %v3550_v20 = vmul.f32 -1.442695, %v6225_v14  ;;  %v6228_v2 = vpop.f32.mrb[61].mxu1 }
 0x55f   : > { %v4824_v15 = vpop.eup %4823  ;;  %v2568_v3 = vmul.f32 %v4822_v47, %v6181_v56  ;;  %4843 = vrcp.f32 %v2478_v28  ;;  %v3551_v5 = vmul.f32 -1.442695, %v6228_v2 }
 0x560   : > { %v4826_v30 = vpop.eup %4825  ;;  %4845 = vpow2.f32 %v3549_v61  ;;  %v2569_v58 = vmul.f32 %v4824_v15, %v6184_v62 }
 0x561   : > { %v4828_v49 = vpop.eup %4827  ;;  %v2479_v52 = vadd.f32 1.0, %v4826_v30  ;;  %4847 = vpow2.f32 %v3550_v20  ;;  %2704 = vmatprep.mubr.f32.mxu0 %v2568_v3  ;;  %v6233_v60 = vpop.f32.mrb[62].mxu1 }
 0x562   : > { %v4830_v63 = vpop.eup %4829  ;;  %v2480_v13 = vadd.f32 1.0, %v4828_v49  ;;  %4849 = vpow2.f32 %v3551_v5  ;;  %2705 = vmatmul.mubr.f32.gmra.mrb[62].mxu0 %v2567_v12  ;;  %v3552_v23 = vmul.f32 -1.442695, %v6233_v60  ;;  %v6236_v56 = vpop.f32.mrb[63].mxu1 }
 0x563   : > { %v4832_v42 = vpop.eup %4831  ;;  %v2570_v26 = vmul.f32 %v4830_v63, %v6187_v1  ;;  %4851 = vrcp.f32 %v2479_v52  ;;  %v3553_v4 = vmul.f32 -1.442695, %v6236_v56 }
 0x564   : > { %v4834_v55 = vpop.eup %4833  ;;  %4853 = vrcp.f32 %v2480_v13  ;;  %v2571_v21 = vmul.f32 %v4832_v42, %v6190_v32 }
 0x565   : > { %v4836_v48 = vpop.eup %4835  ;;  %v2481_v6 = vadd.f32 1.0, %v4834_v55  ;;  %4855 = vpow2.f32 %v3552_v23  ;;  %2709 = vmatprep.mubr.f32.mxu0 %v2570_v26  ;;  %v6241_v22 = vpop.f32.mrb[64].mxu1 }
 0x566   : > { %v4838_v7 = vpop.eup %4837  ;;  %v2482_v45 = vadd.f32 1.0, %v4836_v48  ;;  %4857 = vpow2.f32 %v3553_v4  ;;  %2710 = vmatmul.mubr.f32.gmra.mrb[64].mxu0 %v2569_v58  ;;  %v3554_v17 = vmul.f32 -1.442695, %v6241_v22  ;;  %v6244_v1 = vpop.f32.mrb[65].mxu1 }
 0x567   : > { %v4840_v29 = vpop.eup %4839  ;;  %v2572_v19 = vmul.f32 %v4838_v7, %v6193_v16  ;;  %4859 = vrcp.f32 %v2481_v6  ;;  %v3555_v62 = vmul.f32 -1.442695, %v6244_v1 }
 0x568   : > { %v4842_v39 = vpop.eup %4841  ;;  %4861 = vrcp.f32 %v2482_v45  ;;  %v2573_v34 = vmul.f32 %v4840_v29, %v6196_v9 }
 0x569   : > { %v4844_v25 = vpop.eup %4843  ;;  %v2483_v24 = vadd.f32 1.0, %v4842_v39  ;;  %4863 = vpow2.f32 %v3554_v17  ;;  %2714 = vmatprep.mubr.f32.mxu0 %v2572_v19  ;;  %v6249_v33 = vpop.f32.mrb[66].mxu1 }
 0x56a   : > { %v4846_v35 = vpop.eup %4845  ;;  %v2574_v37 = vmul.f32 %v4844_v25, %v6199_v27  ;;  %4865 = vpow2.f32 %v3555_v62  ;;  %2715 = vmatmul.mubr.f32.gmra.mrb[66].mxu0 %v2571_v21  ;;  %v3556_v16 = vmul.f32 -1.442695, %v6249_v33  ;;  %v6253_v41 = vpop.f32.mrb[67].mxu1 }
 0x56b   : > { %v4848_v38 = vpop.eup %4847  ;;  %4867 = vrcp.f32 %v2483_v24  ;;  %v2484_v40 = vadd.f32 1.0, %v4846_v35  ;;  %v3557_v31 = vmul.f32 -1.442695, %v6253_v41 }
 0x56c   : > { %v4850_v32 = vpop.eup %4849  ;;  %v2485_v43 = vadd.f32 1.0, %v4848_v38  ;;  %4869 = vpow2.f32 %v3556_v16  ;;  %2719 = vmatprep.mubr.f32.mxu0 %v2574_v37 }
 0x56d   : > { %v4852_v10 = vpop.eup %4851  ;;  %4871 = vrcp.f32 %v2484_v40  ;;  %v2486_v27 = vadd.f32 1.0, %v4850_v32  ;;  %v6257_v46 = vpop.f32.mrb[68].mxu1 }
 0x56e   : > { %v4854_v50 = vpop.eup %4853  ;;  %4873 = vrcp.f32 %v2485_v43  ;;  %2720 = vmatmul.mubr.f32.gmra.mrb[68].mxu0 %v2573_v34  ;;  %v3558_v0 = vmul.f32 -1.442695, %v6257_v46  ;;  %v6260_v53 = vpop.f32.mrb[69].mxu1  ;;  %v2575_v61 = vmul.f32 %v4852_v10, %v6202_v11 }
 0x56f   : > { %v4856_v57 = vpop.eup %4855  ;;  %v2576_v9 = vmul.f32 %v4854_v50, %v6206_v18  ;;  %4875 = vrcp.f32 %v2486_v27  ;;  %v3559_v28 = vmul.f32 -1.442695, %v6260_v53 }
 0x570   : > { %v4858_v59 = vpop.eup %4857  ;;  %v2487_v51 = vadd.f32 1.0, %v4856_v57  ;;  %4877 = vpow2.f32 %v3557_v31 }
 0x571   : > { %v4860_v47 = vpop.eup %4859  ;;  %v2488_v20 = vadd.f32 1.0, %v4858_v59  ;;  %4879 = vpow2.f32 %v3558_v0  ;;  %2724 = vmatprep.mubr.f32.mxu0 %v2576_v9  ;;  %v6265_v15 = vpop.f32.mrb[70].mxu1 }
 0x572   : > { %v4862_v3 = vpop.eup %4861  ;;  %4881 = vrcp.f32 %v2487_v51  ;;  %2725 = vmatmul.mubr.f32.gmra.mrb[70].mxu0 %v2575_v61  ;;  %v3560_v5 = vmul.f32 -1.442695, %v6265_v15  ;;  %v6268_v18 = vpop.f32.mrb[71].mxu1  ;;  %v2577_v49 = vmul.f32 %v4860_v47, %v6210_v8 }
 0x573   : > { %v4864_v30 = vpop.eup %4863  ;;  %v2578_v11 = vmul.f32 %v4862_v3, %v6214_v36  ;;  %4883 = vrcp.f32 %v2488_v20  ;;  %v3561_v63 = vmul.f32 -1.442695, %v6268_v18 }
 0x574   : > { %v4866_v12 = vpop.eup %4865  ;;  %v2489_v52 = vadd.f32 1.0, %v4864_v30  ;;  %4885 = vpow2.f32 %v3559_v28 }
 0x575   : > { %v4868_v13 = vpop.eup %4867  ;;  %v2490_v23 = vadd.f32 1.0, %v4866_v12  ;;  %4887 = vpow2.f32 %v3560_v5  ;;  %2729 = vmatprep.mubr.f32.mxu0 %v2578_v11 }
 0x576   : > { %v4870_v42 = vpop.eup %4869  ;;  %4889 = vrcp.f32 %v2489_v52  ;;  %2730 = vmatmul.mubr.f32.gmra.mrb[72].mxu0 %v2577_v49  ;;  %v2579_v8 = vmul.f32 %v4868_v13, %v6218_v44 }
 0x577   : > { %v4872_v26 = vpop.eup %4871  ;;  %4891 = vrcp.f32 %v2490_v23  ;;  %v2491_v55 = vadd.f32 1.0, %v4870_v42 }
 0x578   : > { %v4874_v4 = vpop.eup %4873  ;;  %v2580_v36 = vmul.f32 %v4872_v26, %v6222_v54  ;;  %4893 = vpow2.f32 %v3561_v63 }
 0x579   : > { %v4876_v58 = vpop.eup %4875  ;;  %4895 = vrcp.f32 %v2491_v55  ;;  %v2581_v62 = vmul.f32 %v4874_v4, %v6225_v14 }
 0x57a   : > { %v4878_v48 = vpop.eup %4877  ;;  %v2582_v6 = vmul.f32 %v4876_v58, %v6228_v2  ;;  %2734 = vmatprep.mubr.f32.mxu0 %v2580_v36 }
 0x57b   : > { %v4880_v7 = vpop.eup %4879  ;;  %v2492_v45 = vadd.f32 1.0, %v4878_v48  ;;  %2735 = vmatmul.mubr.f32.gmra.mrb[74].mxu0 %v2579_v8 }
 0x57c   : > { %v4882_v17 = vpop.eup %4881  ;;  %v2493_v29 = vadd.f32 1.0, %v4880_v7  ;;  %2739 = vmatprep.mubr.f32.mxu0 %v2582_v6 }
 0x57d   : > { %v4884_v19 = vpop.eup %4883  ;;  %4897 = vrcp.f32 %v2492_v45  ;;  %v2583_v35 = vmul.f32 %v4882_v17, %v6233_v60 }
 0x57e   : > { %v4886_v54 = vpop.eup %4885  ;;  %v2584_v39 = vmul.f32 %v4884_v19, %v6236_v56  ;;  %4899 = vrcp.f32 %v2493_v29 }
 0x57f   : > { %v4888_v21 = vpop.eup %4887  ;;  %v2494_v44 = vadd.f32 1.0, %v4886_v54  ;;  %2740 = vmatmul.mubr.f32.gmra.mrb[76].mxu0 %v2581_v62 }
 0x580   : > { %v4890_v25 = vpop.eup %4889  ;;  %v2495_v2 = vadd.f32 1.0, %v4888_v21  ;;  %2744 = vmatprep.mubr.f32.mxu0 %v2584_v39 }
 0x581   : > { %v4892_v24 = vpop.eup %4891  ;;  %4901 = vrcp.f32 %v2494_v44  ;;  %v2585_v14 = vmul.f32 %v4890_v25, %v6241_v22 }
 0x582   : > { %v4894_v37 = vpop.eup %4893  ;;  %v2586_v16 = vmul.f32 %v4892_v24, %v6244_v1  ;;  %4903 = vrcp.f32 %v2495_v2 }
 0x583   : > { %v2496_v38 = vadd.f32 1.0, %v4894_v37  ;;  %2745 = vmatmul.mubr.f32.gmra.mrb[78].mxu0 %v2583_v35  ;;  %v4896_v56 = vpop.eup %4895  ;;  %v2831_v37 = vld [vmem:[#allocation13 + $0x8] sm:$0xff] (!%p3562_p6) }
 0x584   : > { %2749 = vmatprep.mubr.f32.mxu1 %v2586_v16  ;;  %v2587_v34 = vmul.f32 %v4896_v56, %v6249_v33  ;;  %v2833_v16 = vld [vmem:[#allocation13 + $0x18] sm:$0xff] (!%p3562_p6)  ;;  %v2832_v56 = vld [vmem:[#allocation13 + $0x10] sm:$0xff] (!%p3562_p6) }
 0x585   : > { %4905 = vrcp.f32 %v2496_v38  ;;  %2750 = vmatmul.mubr.f32.vlgmr.msra.gmra.mrb[72].mxu1 %v2585_v14  ;;  %v2830_v14 = vld [vmem:[#allocation13] sm:$0xff] (!%p3562_p6)  ;;  %v4534_v38 = vpack.c.bf16 (!%p3562_p6), %v2833_v16, %v2831_v37  ;;  %v2803_v16 = vld [vmem:[#allocation4 + $0x28] sm:$0xff] (!%p3562_p6) }
 0x587   : > { %v4898_v40 = vpop.eup %4897  ;;  %4535 = vmatprep.subr.bf16.mxu0 (!%p3562_p6), %v4534_v38  ;;  %v2791_v38 = vld [vmem:[#allocation3 + $0x8] sm:$0xff] (!%p3562_p6) }
 0x588   : > { %v2588_v32 = vmul.f32 %v4898_v40, %v6253_v41  ;;  %v4900_v43 = vpop.eup %4899  ;;  %v2835_v40 = vld [vmem:[#allocation13 + $0x28] sm:$0xff] (!%p3562_p6) }
 0x589   : > { %v2589_v22 = vmul.f32 %v4900_v43, %v6257_v46  ;;  %v4536_v43 = vpack.c.bf16 (!%p3562_p6), %v2832_v56, %v2830_v14  ;;  %v2811_v56 = vadd.f32 (!%p3562_p6), 1e-06, %v2803_v16  ;;  %v3100_v16 = vld [vmem:[#allocation14 + $0x68] sm:$0xff] (!%p3562_p6) }
 0x58a   : > { %2754 = vmatprep.mubr.f32.mxu1 %v2588_v32  ;;  %v2837_v32 = vld [vmem:[#allocation13 + $0x38] sm:$0xff] (!%p3562_p6) }
 0x58b   : > { %v4902_v60 = vpop.eup %4901  ;;  %2755 = vmatmul.mubr.f32.gmra.mrb[74].mxu1 %v2587_v34  ;;  %v5345_v34 = vmov (!%p3562_p6), 0.0   ;;  %4537 = vmatpush1.bf16.msra.mxu0 (!%p3562_p6), %v4536_v43 }
 0x58c   : > { %v2590_v1 = vmul.f32 %v4902_v60, %v6260_v53  ;;  %v4904_v31 = vpop.eup %4903  ;;  %2926 = vmatprep.mubr.f32.mxu0 (!%p3562_p6), %v5345_v34  ;;  %v4538_v60 = vpack.c.bf16 (!%p3562_p6), %v2837_v32, %v2835_v40  ;;  %v2804_v32 = vld [vmem:[#allocation4 + $0x30] sm:$0xff] (!%p3562_p6) }
 0x58d   : > { %v2591_v41 = vmul.f32 %v4904_v31, %v6265_v15  ;;  %v2839_v31 = vld [vmem:[#allocation13 + $0x48] sm:$0xff] (!%p3562_p6) }
 0x58e   : > { %2759 = vmatprep.mubr.f32.mxu1 %v2590_v1  ;;  %v2834_v1 = vld [vmem:[#allocation13 + $0x20] sm:$0xff] (!%p3562_p6)  ;;  %4539 = vmatprep.subr.bf16.mxu0 (!%p3562_p6), %v4538_v60  ;;  %v2792_v60 = vld [vmem:[#allocation3 + $0x10] sm:$0xff] (!%p3562_p6) }
 0x58f   : > { %v4906_v10 = vpop.eup %4905  ;;  %2760 = vmatmul.mubr.f32.gmra.mrb[76].mxu1 %v2589_v22  ;;  %v2836_v22 = vld [vmem:[#allocation13 + $0x30] sm:$0xff] (!%p3562_p6) }
 0x590   : > { %v2592_v27 = vmul.f32 %v4906_v10, %v6268_v18  ;;  %v2841_v10 = vld [vmem:[#allocation13 + $0x58] sm:$0xff] (!%p3562_p6) }
 0x592   : > { %2764 = vmatprep.mubr.f32.mxu1 %v2592_v27  ;;  %v4540_v27 = vpack.c.bf16 (!%p3562_p6), %v2836_v22, %v2834_v1  ;;  %v2812_v1 = vadd.f32 (!%p3562_p6), 1e-06, %v2804_v32  ;;  %v3101_v32 = vld [vmem:[#allocation14 + $0x70] sm:$0xff] (!%p3562_p6) }
 0x593   : > { %2765 = vmatmul.mubr.f32.gmra.mrb[78].mxu1 %v2591_v41  ;;  %v4542_v41 = vpack.c.bf16 (!%p3562_p6), %v2841_v10, %v2839_v31  ;;  %v2805_v31 = vld [vmem:[#allocation4 + $0x38] sm:$0xff] (!%p3562_p6) }
 0x594   : > { %4541 = vmatpush1.bf16.msra.mxu0 (!%p3562_p6), %v4540_v27  ;;  %v2793_v27 = vld [vmem:[#allocation3 + $0x18] sm:$0xff] (!%p3562_p6) }
 0x595   : > { %4543 = vmatprep.subr.bf16.mxu0 (!%p3562_p6), %v4542_v41  ;;  %v2813_v41 = vadd.f32 (!%p3562_p6), 1e-06, %v2805_v31 }
 0x627   : > { %v3858_v33 = vpop.f32.mrb[56].mxu0 }
 0x628   : > { %v3859_v50 = vpop.f32.mrb[57].mxu0 }
 0x629   : > { %v3860_v0 = vadd.f32 %v3859_v50, %v3858_v33  ;;  %v2838_v33 = vld [vmem:[#allocation13 + $0x40] sm:$0xff] (!%p3562_p6)  ;;  %v2840_v50 = vld [vmem:[#allocation13 + $0x50] sm:$0xff] (!%p3562_p6) }
 0x62b   : > { %2770 = vst [vmem:[%s5744_s14] sm:$0xff] %v3860_v0  ;;  %v3861_v53 = vpop.f32.mrb[58].mxu0  ;;  %v2843_v0 = vld [vmem:[#allocation13 + $0x68] sm:$0xff] (!%p3562_p6) }
 0x62c   : > { %v3862_v46 = vpop.f32.mrb[59].mxu0 }
 0x62d   : > { %v3863_v57 = vadd.f32 %v3862_v46, %v3861_v53  ;;  %v2845_v53 = vld [vmem:[#allocation13 + $0x78] sm:$0xff] (!%p3562_p6)  ;;  %v4544_v46 = vpack.c.bf16 (!%p3562_p6), %v2840_v50, %v2838_v33 }
 0x62f   : > { %2771 = vst [vmem:[%s5744_s14 + $0x8] sm:$0xff] %v3863_v57  ;;  %v3864_v9 = vpop.f32.mrb[60].mxu0  ;;  %v4546_v57 = vpack.c.bf16 (!%p3562_p6), %v2845_v53, %v2843_v0  ;;  %4545 = vmatpush1.bf16.msra.mxu0 (!%p3562_p6), %v4544_v46  ;;  %v2794_v0 = vld [vmem:[#allocation3 + $0x20] sm:$0xff] (!%p3562_p6) }
 0x630   : > { %v3865_v59 = vpop.f32.mrb[61].mxu0 }
 0x631   : > { %v3866_v61 = vadd.f32 %v3865_v59, %v3864_v9  ;;  %v2842_v9 = vld [vmem:[#allocation13 + $0x60] sm:$0xff] (!%p3562_p6)  ;;  %v2844_v59 = vld [vmem:[#allocation13 + $0x70] sm:$0xff] (!%p3562_p6)  ;;  %4547 = vmatprep.subr.bf16.mxu0 (!%p3562_p6), %v4546_v57  ;;  %v2795_v57 = vld [vmem:[#allocation3 + $0x28] sm:$0xff] (!%p3562_p6) }
 0x633   : > { %2772 = vst [vmem:[%s5744_s14 + $0x10] sm:$0xff] %v3866_v61  ;;  %v2847_v61 = vld [vmem:[#allocation13 + $0x88] sm:$0xff] (!%p3562_p6) }
 0x635   : > { %v3867_v51 = vpop.f32.mrb[62].mxu0 }
 0x636   : > { %v3868_v28 = vpop.f32.mrb[63].mxu0 }
 0x637   : > { %v3869_v47 = vadd.f32 %v3868_v28, %v3867_v51  ;;  %v2849_v51 = vld [vmem:[#allocation13 + $0x98] sm:$0xff] (!%p3562_p6)  ;;  %v2798_v28 = vld [vmem:[#allocation4] sm:$0xff] (!%p3562_p6) }
 0x639   : > { %2773 = vst [vmem:[%s5744_s14 + $0x18] sm:$0xff] %v3869_v47  ;;  %v3870_v20 = vpop.f32.mrb[64].mxu0  ;;  %v4548_v47 = vpack.c.bf16 (!%p3562_p6), %v2844_v59, %v2842_v9 }
 0x63a   : > { %v3871_v15 = vpop.f32.mrb[65].mxu0 }
 0x63b   : > { %v3872_v3 = vadd.f32 %v3871_v15, %v3870_v20  ;;  %v4550_v20 = vpack.c.bf16 (!%p3562_p6), %v2849_v51, %v2847_v61  ;;  %v2846_v15 = vld [vmem:[#allocation13 + $0x80] sm:$0xff] (!%p3562_p6)  ;;  %4549 = vmatpush1.bf16.msra.mxu0 (!%p3562_p6), %v4548_v47  ;;  %v2796_v61 = vld [vmem:[#allocation3 + $0x30] sm:$0xff] (!%p3562_p6)  ;;  %v2797_v47 = vld [vmem:[#allocation3 + $0x38] sm:$0xff] (!%p3562_p6) }
 0x63d   : > { %2774 = vst [vmem:[%s5744_s14 + $0x20] sm:$0xff] %v3872_v3  ;;  %v3873_v5 = vpop.f32.mrb[66].mxu0  ;;  %v2848_v3 = vld [vmem:[#allocation13 + $0x90] sm:$0xff] (!%p3562_p6)  ;;  %4551 = vmatprep.subr.bf16.mxu0 (!%p3562_p6), %v4550_v20 }
 0x63e   : > { %v3874_v18 = vpop.f32.mrb[67].mxu0 }
 0x63f   : > { %v3875_v30 = vadd.f32 %v3874_v18, %v3873_v5  ;;  %v2851_v5 = vld [vmem:[#allocation13 + $0xa8] sm:$0xff] (!%p3562_p6)  ;;  %v2853_v18 = vld [vmem:[#allocation13 + $0xb8] sm:$0xff] (!%p3562_p6) }
 0x641   : > { %2775 = vst [vmem:[%s5744_s14 + $0x28] sm:$0xff] %v3875_v30  ;;  %v3876_v11 = vpop.f32.mrb[68].mxu0  ;;  %v2806_v30 = vadd.f32 (!%p3562_p6), 1e-06, %v2798_v28 }
 0x642   : > { %v3877_v12 = vpop.f32.mrb[69].mxu0 }
 0x643   : > { %v3878_v49 = vadd.f32 %v3877_v12, %v3876_v11  ;;  %v2799_v11 = vld [vmem:[#allocation4 + $0x8] sm:$0xff] (!%p3562_p6)  ;;  %v4552_v12 = vpack.c.bf16 (!%p3562_p6), %v2848_v3, %v2846_v15  ;;  %4907 = vrcp.f32 (!%p3562_p6), %v2806_v30  ;;  %v3087_v15 = vld [vmem:[#allocation14] sm:$0xff] (!%p3562_p6)  ;;  %v3106_v30 = vld [vmem:[#allocation14 + $0x98] sm:$0xff] (!%p3562_p6) }
 0x644   : > { %v3088_v3 = vld [vmem:[#allocation14 + $0x8] sm:$0xff] (!%p3562_p6) }
 0x645   : > { %2776 = vst [vmem:[%s5744_s14 + $0x30] sm:$0xff] %v3878_v49  ;;  %v3879_v52 = vpop.f32.mrb[70].mxu0  ;;  %v3103_v49 = vld [vmem:[#allocation14 + $0x80] sm:$0xff] (!%p3562_p6)  ;;  %4553 = vmatpush1.bf16.msra.mxu0 (!%p3562_p6), %v4552_v12  ;;  %v3089_v12 = vld [vmem:[#allocation14 + $0x10] sm:$0xff] (!%p3562_p6) }
 0x646   : > { %v3880_v63 = vpop.f32.mrb[71].mxu0 }
 0x647   : > { %v3881_v13 = vadd.f32 %v3880_v63, %v3879_v52  ;;  %v4554_v52 = vpack.c.bf16 (!%p3562_p6), %v2853_v18, %v2851_v5  ;;  %v2850_v63 = vld [vmem:[#allocation13 + $0xa0] sm:$0xff] (!%p3562_p6)  ;;  %v4568_v5 = vpack.c.bf16 (!%p3562_p6), %v3088_v3, %v3087_v15  ;;  %v3105_v18 = vld [vmem:[#allocation14 + $0x90] sm:$0xff] (!%p3562_p6) }
 0x649   : > { %2777 = vst [vmem:[%s5744_s14 + $0x38] sm:$0xff] %v3881_v13  ;;  %v3882_v23 = vpop.f32.mrb[72].mxu0  ;;  %v2852_v13 = vld [vmem:[#allocation13 + $0xb0] sm:$0xff] (!%p3562_p6)  ;;  %4555 = vmatprep.subr.bf16.mxu0 (!%p3562_p6), %v4554_v52 }
 0x64a   : > { %v3883_v42 = vpop.f32.mrb[73].mxu0 }
 0x64b   : > { %v3884_v26 = vadd.f32 %v3883_v42, %v3882_v23  ;;  %v3104_v23 = vld [vmem:[#allocation14 + $0x88] sm:$0xff] (!%p3562_p6) }
 0x64c   : > { %v2855_v42 = vld [vmem:[#allocation13 + $0xc8] sm:$0xff] (!%p3562_p6) }
 0x64d   : > { %2778 = vst [vmem:[%s5744_s14 + $0x40] sm:$0xff] %v3884_v26  ;;  %v2857_v26 = vld [vmem:[#allocation13 + $0xd8] sm:$0xff] (!%p3562_p6) }
 0x64e   : > { %v3885_v4 = vpop.f32.mrb[74].mxu0 }
 0x64f   : > { %v3886_v36 = vpop.f32.mrb[75].mxu0 }
 0x650   : > { %v3887_v55 = vadd.f32 %v3886_v36, %v3885_v4  ;;  %v2807_v4 = vadd.f32 (!%p3562_p6), 1e-06, %v2799_v11  ;;  %v4566_v36 = vpack.c.bf16 (!%p3562_p6), %v3104_v23, %v3103_v49  ;;  %v4570_v11 = vpack.c.bf16 (!%p3562_p6), %v3106_v30, %v3105_v18  ;;  %v3090_v49 = vld [vmem:[#allocation14 + $0x18] sm:$0xff] (!%p3562_p6) }
 0x651   : > { %v4572_v52 = vpack.c.bf16 (!%p3562_p6), %v3090_v49, %v3089_v12 }
 0x652   : > { %2779 = vst [vmem:[%s5744_s14 + $0x48] sm:$0xff] %v3887_v55  ;;  %v3888_v58 = vpop.f32.mrb[76].mxu0  ;;  %v2800_v55 = vld [vmem:[#allocation4 + $0x10] sm:$0xff] (!%p3562_p6)  ;;  %4567 = vmatprep.subr.bf16.mxu1 (!%p3562_p6), %v4566_v36  ;;  %4909 = vrcp.f32 (!%p3562_p6), %v2807_v4  ;;  %v3110_v36 = vld [vmem:[#allocation14 + $0xb8] sm:$0xff] (!%p3562_p6) }
 0x653   : > { %v3889_v8 = vpop.f32.mrb[77].mxu0  ;;  %4569 = vmatpush3.bf16.msra.mxu1 (!%p3562_p6), %v4568_v5 }
 0x654   : > { %v3890_v48 = vadd.f32 %v3889_v8, %v3888_v58  ;;  %v4556_v58 = vpack.c.bf16 (!%p3562_p6), %v2852_v13, %v2850_v63  ;;  %v4558_v8 = vpack.c.bf16 (!%p3562_p6), %v2857_v26, %v2855_v42  ;;  %4571 = vmatprep.subr.bf16.mxu1 (!%p3562_p6), %v4570_v11  ;;  %v3107_v63 = vld [vmem:[#allocation14 + $0xa0] sm:$0xff] (!%p3562_p6)  ;;  %v3108_v13 = vld [vmem:[#allocation14 + $0xa8] sm:$0xff] (!%p3562_p6) }
 0x655   : > { %v4574_v23 = vpack.c.bf16 (!%p3562_p6), %v3108_v13, %v3107_v63  ;;  %v3091_v42 = vld [vmem:[#allocation14 + $0x20] sm:$0xff] (!%p3562_p6)  ;;  %v3092_v26 = vld [vmem:[#allocation14 + $0x28] sm:$0xff] (!%p3562_p6) }
 0x656   : > { %2780 = vst [vmem:[%s5744_s14 + $0x50] sm:$0xff] %v3890_v48  ;;  %v3891_v6 = vpop.f32.mrb[78].mxu0  ;;  %v2854_v48 = vld [vmem:[#allocation13 + $0xc0] sm:$0xff] (!%p3562_p6)  ;;  %4557 = vmatpush1.bf16.msra.mxu0 (!%p3562_p6), %v4556_v58  ;;  %v4576_v4 = vpack.c.bf16 (!%p3562_p6), %v3092_v26, %v3091_v42  ;;  %v3093_v58 = vld [vmem:[#allocation14 + $0x30] sm:$0xff] (!%p3562_p6) }
 0x657   : > { %v3892_v7 = vpop.f32.mrb[79].mxu0  ;;  %4559 = vmatprep.subr.bf16.mxu0 (!%p3562_p6), %v4558_v8  ;;  %4573 = vmatpush3.bf16.msra.mxu1 (!%p3562_p6), %v4572_v52  ;;  %v3094_v8 = vld [vmem:[#allocation14 + $0x38] sm:$0xff] (!%p3562_p6) }
 0x658   : > { %v3893_v45 = vadd.f32 %v3892_v7, %v3891_v6  ;;  %v3894_v17 = vpop.f32.mrb[72].mxu1  ;;  %v2856_v6 = vld [vmem:[#allocation13 + $0xd0] sm:$0xff] (!%p3562_p6)  ;;  %v2859_v7 = vld [vmem:[#allocation13 + $0xe8] sm:$0xff] (!%p3562_p6)  ;;  %4575 = vmatprep.subr.bf16.mxu1 (!%p3562_p6), %v4574_v23 }
 0x659   : > { %v3895_v29 = vpop.f32.mrb[73].mxu1 }
 0x65a   : > { %2781 = vst [vmem:[%s5744_s14 + $0x58] sm:$0xff] %v3893_v45  ;;  %v3896_v19 = vadd.f32 %v3895_v29, %v3894_v17  ;;  %v2861_v45 = vld [vmem:[#allocation13 + $0xf8] sm:$0xff] (!%p3562_p6)  ;;  %v2808_v17 = vadd.f32 (!%p3562_p6), 1e-06, %v2800_v55 }
 0x65b   : > { %v2801_v29 = vld [vmem:[#allocation4 + $0x18] sm:$0xff] (!%p3562_p6)  ;;  %4577 = vmatpush3.bf16.msra.mxu1 (!%p3562_p6), %v4576_v4 }
 0x65c   : > { %2782 = vst [vmem:[%s5744_s14 + $0x60] sm:$0xff] %v3896_v19  ;;  %v4560_v19 = vpack.c.bf16 (!%p3562_p6), %v2856_v6, %v2854_v48  ;;  %4911 = vrcp.f32 (!%p3562_p6), %v2808_v17  ;;  %v4580_v48 = vpack.c.bf16 (!%p3562_p6), %v3094_v8, %v3093_v58  ;;  %v3111_v6 = vld [vmem:[#allocation14 + $0xc0] sm:$0xff] (!%p3562_p6) }
 0x65d   : > { %v3095_v17 = vld [vmem:[#allocation14 + $0x40] sm:$0xff] (!%p3562_p6) }
 0x65e   : > { %v3897_v62 = vpop.f32.mrb[74].mxu1  ;;  %4561 = vmatpush1.bf16.msra.mxu0 (!%p3562_p6), %v4560_v19 }
 0x65f   : > { %v3898_v54 = vpop.f32.mrb[75].mxu1 }
 0x660   : > { %v3899_v39 = vadd.f32 %v3898_v54, %v3897_v62  ;;  %v4562_v62 = vpack.c.bf16 (!%p3562_p6), %v2861_v45, %v2859_v7  ;;  %v2858_v54 = vld [vmem:[#allocation13 + $0xe0] sm:$0xff] (!%p3562_p6)  ;;  %v3112_v7 = vld [vmem:[#allocation14 + $0xc8] sm:$0xff] (!%p3562_p6) }
 0x661   : > { %v4582_v45 = vpack.c.bf16 (!%p3562_p6), %v3112_v7, %v3111_v6 }
 0x662   : > { %2783 = vst [vmem:[%s5744_s14 + $0x68] sm:$0xff] %v3899_v39  ;;  %v3900_v21 = vpop.f32.mrb[76].mxu1  ;;  %v2860_v39 = vld [vmem:[#allocation13 + $0xf0] sm:$0xff] (!%p3562_p6)  ;;  %4563 = vmatprep.subr.bf16.mxu0 (!%p3562_p6), %v4562_v62 }
 0x663   : > { %v3901_v44 = vpop.f32.mrb[77].mxu1  ;;  %v3113_v62 = vld [vmem:[#allocation14 + $0xd0] sm:$0xff] (!%p3562_p6) }
 0x664   : > { %v3902_v25 = vadd.f32 %v3901_v44, %v3900_v21  ;;  %2789 = sbr.rel (%p3562_p6) target bundleno = 2133 (0x855), region = 104  ;;  %v2809_v21 = vadd.f32 (!%p3562_p6), 1e-06, %v2801_v29  ;;  %v2802_v44 = vld [vmem:[#allocation4 + $0x20] sm:$0xff] (!%p3562_p6)  ;;  %v3096_v29 = vld [vmem:[#allocation14 + $0x48] sm:$0xff] (!%p3562_p6) }
 0x665   : > { %v4584_v19 = vpack.c.bf16 (!%p3562_p6), %v3096_v29, %v3095_v17 }
 0x666   : > { %2784 = vst [vmem:[%s5744_s14 + $0x70] sm:$0xff] %v3902_v25  ;;  %v3903_v2 = vpop.f32.mrb[78].mxu1  ;;  %v4908_v25 = vpop.eup (!%p3562_p6), %4907  ;;  %4913 = vrcp.f32 (!%p3562_p6), %v2809_v21  ;;  %v3097_v21 = vld [vmem:[#allocation14 + $0x50] sm:$0xff] (!%p3562_p6) }
 0x667   : > { %v3904_v24 = vpop.f32.mrb[79].mxu1  ;;  %v4910_v14 = vpop.eup (!%p3562_p6), %4909 }
 0x668   : > { %v3905_v35 = vadd.f32 %v3904_v24, %v3903_v2  ;;  %v4564_v2 = vpack.c.bf16 (!%p3562_p6), %v2860_v39, %v2858_v54  ;;  %v2790_v24 = vld [vmem:[#allocation3] sm:$0xff] (!%p3562_p6)  ;;  %v2823_v40 = vmul.f32 (!%p3562_p6), %v4910_v14, %v2791_v38  ;;  %v4912_v43 = vpop.eup (!%p3562_p6), %4911  ;;  %v3114_v54 = vld [vmem:[#allocation14 + $0xd8] sm:$0xff] (!%p3562_p6)  ;;  %v3117_v38 = vld [vmem:[#allocation14 + $0xf0] sm:$0xff] (!%p3562_p6) }
 0x669   : > { %v2822_v37 = vmul.f32 (!%p3562_p6), %v4908_v25, %v2790_v24  ;;  %v2824_v22 = vmul.f32 (!%p3562_p6), %v4912_v43, %v2792_v60  ;;  %v4586_v39 = vpack.c.bf16 (!%p3562_p6), %v3114_v54, %v3113_v62  ;;  %v3116_v24 = vld [vmem:[#allocation14 + $0xe8] sm:$0xff] (!%p3562_p6)  ;;  %v3102_v43 = vld [vmem:[#allocation14 + $0x78] sm:$0xff] (!%p3562_p6) }
 0x66a   : > { %2785 = vst [vmem:[%s5744_s14 + $0x78] sm:$0xff] %v3905_v35  ;;  %v2810_v35 = vadd.f32 (!%p3562_p6), 1e-06, %v2802_v44  ;;  %4565 = vmatpush1.bf16.msra.mxu0 (!%p3562_p6), %v4564_v2  ;;  %v3098_v44 = vld [vmem:[#allocation14 + $0x58] sm:$0xff] (!%p3562_p6)  ;;  %v3115_v2 = vld [vmem:[#allocation14 + $0xe0] sm:$0xff] (!%p3562_p6)  ;;  %v4596_v60 = vpack.c.bf16 (!%p3562_p6), %v3102_v43, %v3101_v32 }
 0x66b   : > { %v4588_v25 = vpack.c.bf16 %v3098_v44, %v3097_v21 }
 0x66c   : > { %4915 = vrcp.f32 %v2810_v35  ;;  %v4590_v35 = vpack.c.bf16 %v3116_v24, %v3115_v2 }
 0x66d   : > { %2927 = vmatmul.mubr.f32.vlgmr.msra.gmra.mrb[0].mxu0 %v2822_v37  ;;  %4917 = vrcp.f32 %v2811_v56  ;;  %v3099_v37 = vld [vmem:[#allocation14 + $0x60] sm:$0xff]  ;;  %v3118_v56 = vld [vmem:[#allocation14 + $0xf8] sm:$0xff] }
 0x66e   : > { %2932 = vmatprep.mubr.f32.mxu0 %v5345_v34  ;;  %4919 = vrcp.f32 %v2812_v1  ;;  %v4592_v14 = vpack.c.bf16 %v3100_v16, %v3099_v37 }
 0x66f   : > { %4921 = vrcp.f32 %v2813_v41 }
 0x670   : > { %v4914_v10 = vpop.eup %4913 }
 0x671   : > { %2933 = vmatmul.mubr.f32.gmra.mrb[2].mxu0 %v2823_v40  ;;  %v2825_v33 = vmul.f32 %v4914_v10, %v2793_v27  ;;  %v4594_v40 = vpack.c.bf16 %v3118_v56, %v3117_v38 }
 0x672   : > { %2938 = vmatprep.mubr.f32.mxu0 %v5345_v34 }
 0x675   : > { %2939 = vmatmul.mubr.f32.gmra.mrb[4].mxu0 %v2824_v22 }
 0x676   : > { %v4916_v50 = vpop.eup %4915  ;;  %2944 = vmatprep.mubr.f32.mxu0 %v5345_v34 }
 0x677   : > { %v2826_v53 = vmul.f32 %v4916_v50, %v2794_v0  ;;  %v4918_v46 = vpop.eup %4917 }
 0x678   : > { %v2827_v9 = vmul.f32 %v4918_v46, %v2795_v57  ;;  %v4920_v59 = vpop.eup %4919 }
 0x679   : > { %2945 = vmatmul.mubr.f32.gmra.mrb[6].mxu0 %v2825_v33  ;;  %v2828_v51 = vmul.f32 %v4920_v59, %v2796_v61  ;;  %v4922_v28 = vpop.eup %4921 }
 0x67a   : > { %2950 = vmatprep.mubr.f32.mxu0 %v5345_v34  ;;  %v2829_v20 = vmul.f32 %v4922_v28, %v2797_v47 }
 0x67d   : > { %2951 = vmatmul.mubr.f32.gmra.mrb[8].mxu0 %v2826_v53 }
 0x67e   : > { %2956 = vmatprep.mubr.f32.mxu0 %v5345_v34 }
 0x681   : > { %2957 = vmatmul.mubr.f32.gmra.mrb[10].mxu0 %v2827_v9 }
 0x682   : > { %2962 = vmatprep.mubr.f32.mxu0 %v5345_v34 }
 0x685   : > { %2963 = vmatmul.mubr.f32.gmra.mrb[12].mxu0 %v2828_v51 }
 0x686   : > { %2968 = vmatprep.mubr.f32.mxu0 %v5345_v34  ;;  %v3109_v34 = vld [vmem:[#allocation14 + $0xb0] sm:$0xff] }
 0x687   : > { %v4578_v55 = vpack.c.bf16 %v3110_v36, %v3109_v34 }
 0x689   : > { %2969 = vmatmul.mubr.f32.gmra.mrb[14].mxu0 %v2829_v20  ;;  %4579 = vmatprep.subr.bf16.mxu1 %v4578_v55 }
 0x68a   : > { %4581 = vmatpush3.bf16.msra.mxu1 %v4580_v48 }
 0x68b   : > { %4583 = vmatprep.subr.bf16.mxu1 %v4582_v45 }
 0x68e   : > { %4585 = vmatpush3.bf16.msra.mxu1 %v4584_v19 }
 0x68f   : > { %4587 = vmatprep.subr.bf16.mxu1 %v4586_v39 }
 0x692   : > { %4589 = vmatpush3.bf16.msra.mxu1 %v4588_v25 }
 0x693   : > { %4591 = vmatprep.subr.bf16.mxu1 %v4590_v35 }
 0x696   : > { %4593 = vmatpush3.bf16.msra.mxu1 %v4592_v14 }
 0x697   : > { %4595 = vmatprep.subr.bf16.mxu1 %v4594_v40 }
 0x69a   : > { %4597 = vmatpush3.bf16.msra.mxu1 %v4596_v60 }
 0x740   : > { %v6312_v1 = vpop.f32.mrb[0].mxu0 }
 0x741   : > { %v3563_v22 = vmul.f32 -1.442695, %v6312_v1  ;;  %v6315_v31 = vpop.f32.mrb[1].mxu0 }
 0x742   : > { %v3564_v10 = vmul.f32 -1.442695, %v6315_v31 }
 0x743   : > { %4923 = vpow2.f32 %v3563_v22 }
 0x744   : > { %4925 = vpow2.f32 %v3564_v10  ;;  %v6318_v27 = vpop.f32.mrb[2].mxu0 }
 0x745   : > { %v3565_v41 = vmul.f32 -1.442695, %v6318_v27  ;;  %v6321_v33 = vpop.f32.mrb[3].mxu0 }
 0x746   : > { %v3566_v50 = vmul.f32 -1.442695, %v6321_v33 }
 0x747   : > { %4927 = vpow2.f32 %v3565_v41 }
 0x748   : > { %4929 = vpow2.f32 %v3566_v50  ;;  %v6324_v0 = vpop.f32.mrb[4].mxu0 }
 0x749   : > { %v3567_v53 = vmul.f32 -1.442695, %v6324_v0  ;;  %v6327_v46 = vpop.f32.mrb[5].mxu0 }
 0x74a   : > { %v3568_v57 = vmul.f32 -1.442695, %v6327_v46 }
 0x74b   : > { %4931 = vpow2.f32 %v3567_v53 }
 0x74c   : > { %4933 = vpow2.f32 %v3568_v57  ;;  %v6330_v9 = vpop.f32.mrb[6].mxu0 }
 0x74d   : > { %v4924_v59 = vpop.eup %4923  ;;  %v3569_v61 = vmul.f32 -1.442695, %v6330_v9  ;;  %v6333_v51 = vpop.f32.mrb[7].mxu0 }
 0x74e   : > { %v4926_v28 = vpop.eup %4925  ;;  %v3023_v47 = vadd.f32 1.0, %v4924_v59  ;;  %v3570_v20 = vmul.f32 -1.442695, %v6333_v51 }
 0x74f   : > { %v3024_v15 = vadd.f32 1.0, %v4926_v28  ;;  %4935 = vpow2.f32 %v3569_v61 }
 0x750   : > { %4937 = vrcp.f32 %v3023_v47  ;;  %v6336_v3 = vpop.f32.mrb[8].mxu0 }
 0x751   : > { %v4928_v5 = vpop.eup %4927  ;;  %4939 = vrcp.f32 %v3024_v15  ;;  %v3571_v18 = vmul.f32 -1.442695, %v6336_v3  ;;  %v6339_v30 = vpop.f32.mrb[9].mxu0 }
 0x752   : > { %v4930_v11 = vpop.eup %4929  ;;  %v3025_v12 = vadd.f32 1.0, %v4928_v5  ;;  %4941 = vpow2.f32 %v3570_v20  ;;  %v3572_v49 = vmul.f32 -1.442695, %v6339_v30 }
 0x753   : > { %v3026_v52 = vadd.f32 1.0, %v4930_v11  ;;  %4943 = vpow2.f32 %v3571_v18 }
 0x754   : > { %4945 = vrcp.f32 %v3025_v12  ;;  %v6342_v63 = vpop.f32.mrb[10].mxu0 }
 0x755   : > { %v4932_v13 = vpop.eup %4931  ;;  %4947 = vrcp.f32 %v3026_v52  ;;  %v3573_v23 = vmul.f32 -1.442695, %v6342_v63  ;;  %v6345_v42 = vpop.f32.mrb[11].mxu0 }
 0x756   : > { %v4934_v26 = vpop.eup %4933  ;;  %v3027_v4 = vadd.f32 1.0, %v4932_v13  ;;  %4949 = vpow2.f32 %v3572_v49  ;;  %v3574_v34 = vmul.f32 -1.442695, %v6345_v42 }
 0x757   : > { %v3028_v36 = vadd.f32 1.0, %v4934_v26  ;;  %4951 = vpow2.f32 %v3573_v23 }
 0x758   : > { %4953 = vrcp.f32 %v3027_v4  ;;  %v6348_v55 = vpop.f32.mrb[12].mxu0 }
 0x759   : > { %v4936_v58 = vpop.eup %4935  ;;  %4955 = vrcp.f32 %v3028_v36  ;;  %v3575_v8 = vmul.f32 -1.442695, %v6348_v55  ;;  %v6351_v48 = vpop.f32.mrb[13].mxu0 }
 0x75a   : > { %v4938_v6 = vpop.eup %4937  ;;  %v3029_v7 = vadd.f32 1.0, %v4936_v58  ;;  %4957 = vpow2.f32 %v3574_v34  ;;  %v3576_v45 = vmul.f32 -1.442695, %v6351_v48 }
 0x75b   : > { %v4940_v17 = vpop.eup %4939  ;;  %4959 = vpow2.f32 %v3575_v8  ;;  %v3071_v39 = vmul.f32 %v4938_v6, %v6312_v1 }
 0x75c   : > { %v4942_v29 = vpop.eup %4941  ;;  %v6354_v19 = vpop.f32.mrb[14].mxu0  ;;  %v3072_v62 = vmul.f32 %v4940_v17, %v6315_v31  ;;  %4961 = vpow2.f32 %v3576_v45 }
 0x75d   : > { %v4944_v54 = vpop.eup %4943  ;;  %v3030_v21 = vadd.f32 1.0, %v4942_v29  ;;  %v3577_v44 = vmul.f32 -1.442695, %v6354_v19  ;;  %v6359_v25 = vpop.f32.mrb[15].mxu0  ;;  %4963 = vrcp.f32 %v3029_v7 }
 0x75e   : > { %v4946_v2 = vpop.eup %4945  ;;  %v3031_v24 = vadd.f32 1.0, %v4944_v54  ;;  %v3578_v35 = vmul.f32 -1.442695, %v6359_v25  ;;  %3183 = vmatprep.mubr.f32.mxu1 %v3072_v62 }
 0x75f   : > { %v4948_v37 = vpop.eup %4947  ;;  %4965 = vrcp.f32 %v3030_v21  ;;  %3184 = vmatmul.mubr.f32.vlgmr.msra.gmra.mrb[0].mxu1 %v3071_v39  ;;  %v3073_v56 = vmul.f32 %v4946_v2, %v6318_v27 }
 0x760   : > { %v4950_v16 = vpop.eup %4949  ;;  %v3074_v14 = vmul.f32 %v4948_v37, %v6321_v33  ;;  %4967 = vrcp.f32 %v3031_v24 }
 0x761   : > { %v4952_v38 = vpop.eup %4951  ;;  %v3032_v40 = vadd.f32 1.0, %v4950_v16  ;;  %4969 = vpow2.f32 %v3577_v44 }
 0x762   : > { %v4954_v32 = vpop.eup %4953  ;;  %v3033_v43 = vadd.f32 1.0, %v4952_v38  ;;  %4971 = vpow2.f32 %v3578_v35  ;;  %3188 = vmatprep.mubr.f32.mxu1 %v3074_v14 }
 0x763   : > { %v4956_v60 = vpop.eup %4955  ;;  %4973 = vrcp.f32 %v3032_v40  ;;  %3189 = vmatmul.mubr.f32.gmra.mrb[2].mxu1 %v3073_v56  ;;  %v3075_v10 = vmul.f32 %v4954_v32, %v6324_v0 }
 0x764   : > { %v4958_v1 = vpop.eup %4957  ;;  %v3076_v22 = vmul.f32 %v4956_v60, %v6327_v46  ;;  %4975 = vrcp.f32 %v3033_v43 }
 0x765   : > { %v4960_v31 = vpop.eup %4959  ;;  %v3034_v41 = vadd.f32 1.0, %v4958_v1 }
 0x766   : > { %v3035_v33 = vadd.f32 1.0, %v4960_v31  ;;  %3193 = vmatprep.mubr.f32.mxu1 %v3076_v22  ;;  %v4962_v27 = vpop.eup %4961 }
 0x767   : > { %4977 = vrcp.f32 %v3034_v41  ;;  %3194 = vmatmul.mubr.f32.gmra.mrb[4].mxu1 %v3075_v10  ;;  %v4964_v50 = vpop.eup %4963  ;;  %v3036_v53 = vadd.f32 1.0, %v4962_v27 }
 0x768   : > { %4979 = vrcp.f32 %v3035_v33  ;;  %v3077_v46 = vmul.f32 %v4964_v50, %v6330_v9 }
 0x769   : > { %v4966_v57 = vpop.eup %4965  ;;  %4981 = vrcp.f32 %v3036_v53 }
 0x76a   : > { %v4968_v59 = vpop.eup %4967  ;;  %v3078_v61 = vmul.f32 %v4966_v57, %v6333_v51 }
 0x76b   : > { %v4970_v28 = vpop.eup %4969  ;;  %v3079_v18 = vmul.f32 %v4968_v59, %v6336_v3 }
 0x76c   : > { %v4972_v47 = vpop.eup %4971  ;;  %v3037_v0 = vadd.f32 1.0, %v4970_v28  ;;  %3198 = vmatprep.mubr.f32.mxu1 %v3078_v61 }
 0x76d   : > { %v4974_v20 = vpop.eup %4973  ;;  %v3038_v15 = vadd.f32 1.0, %v4972_v47  ;;  %3199 = vmatmul.mubr.f32.gmra.mrb[6].mxu1 %v3077_v46 }
 0x76e   : > { %v3080_v5 = vmul.f32 %v4974_v20, %v6339_v30  ;;  %4983 = vrcp.f32 %v3037_v0  ;;  %v4976_v11 = vpop.eup %4975 }
 0x76f   : > { %4985 = vrcp.f32 %v3038_v15  ;;  %v3081_v9 = vmul.f32 %v4976_v11, %v6342_v63 }
 0x770   : > { %3203 = vmatprep.mubr.f32.mxu1 %v3080_v5 }
 0x771   : > { %v4978_v12 = vpop.eup %4977  ;;  %3204 = vmatmul.mubr.f32.gmra.mrb[8].mxu1 %v3079_v18 }
 0x772   : > { %v3082_v51 = vmul.f32 %v4978_v12, %v6345_v42  ;;  %v4980_v49 = vpop.eup %4979 }
 0x773   : > { %v4982_v52 = vpop.eup %4981  ;;  %v3083_v30 = vmul.f32 %v4980_v49, %v6348_v55 }
 0x774   : > { %3208 = vmatprep.mubr.f32.mxu1 %v3082_v51  ;;  %v3084_v13 = vmul.f32 %v4982_v52, %v6351_v48 }
 0x775   : > { %3209 = vmatmul.mubr.f32.gmra.mrb[10].mxu1 %v3081_v9 }
 0x776   : > { %3213 = vmatprep.mubr.f32.mxu1 %v3084_v13 }
 0x778   : > { %v4984_v23 = vpop.eup %4983 }
 0x779   : > { %v4986_v3 = vpop.eup %4985  ;;  %3214 = vmatmul.mubr.f32.gmra.mrb[12].mxu1 %v3083_v30  ;;  %v3085_v4 = vmul.f32 %v4984_v23, %v6354_v19 }
 0x77a   : > { %v3086_v26 = vmul.f32 %v4986_v3, %v6359_v25 }
 0x77c   : > { %3218 = vmatprep.mubr.f32.mxu1 %v3086_v26 }
 0x77d   : > { %3219 = vmatmul.mubr.f32.gmra.mrb[14].mxu1 %v3085_v4 }
 0x832   : > { %v3938_v42 = vpop.f32.mrb[0].mxu1 }
 0x833   : > { %v3939_v34 = vpop.f32.mrb[1].mxu1 }
 0x834   : > { %v3940_v63 = vadd.f32 %v3939_v34, %v3938_v42 }
 0x836   : > { %3224 = vst [vmem:[#allocation19] sm:$0xff] %v3940_v63  ;;  %v3941_v36 = vpop.f32.mrb[2].mxu1 }
 0x837   : > { %v3942_v58 = vpop.f32.mrb[3].mxu1 }
 0x838   : > { %v3943_v8 = vadd.f32 %v3942_v58, %v3941_v36 }
 0x83a   : > { %3225 = vst [vmem:[#allocation19 + $0x8] sm:$0xff] %v3943_v8  ;;  %v3944_v48 = vpop.f32.mrb[4].mxu1 }
 0x83b   : > { %v3945_v55 = vpop.f32.mrb[5].mxu1 }
 0x83c   : > { %v3946_v6 = vadd.f32 %v3945_v55, %v3944_v48 }
 0x83e   : > { %3226 = vst [vmem:[#allocation19 + $0x10] sm:$0xff] %v3946_v6 }
 0x840   : > { %v3947_v7 = vpop.f32.mrb[6].mxu1 }
 0x841   : > { %v3948_v45 = vpop.f32.mrb[7].mxu1 }
 0x842   : > { %v3949_v17 = vadd.f32 %v3948_v45, %v3947_v7 }
 0x844   : > { %3227 = vst [vmem:[#allocation19 + $0x18] sm:$0xff] %v3949_v17  ;;  %v3950_v29 = vpop.f32.mrb[8].mxu1 }
 0x845   : > { %v3951_v19 = vpop.f32.mrb[9].mxu1 }
 0x846   : > { %v3952_v62 = vadd.f32 %v3951_v19, %v3950_v29 }
 0x848   : > { %3228 = vst [vmem:[#allocation19 + $0x20] sm:$0xff] %v3952_v62  ;;  %v3953_v54 = vpop.f32.mrb[10].mxu1 }
 0x849   : > { %v3954_v39 = vpop.f32.mrb[11].mxu1 }
 0x84a   : > { %v3955_v21 = vadd.f32 %v3954_v39, %v3953_v54 }
 0x84c   : > { %3229 = vst [vmem:[#allocation19 + $0x28] sm:$0xff] %v3955_v21  ;;  %v3956_v44 = vpop.f32.mrb[12].mxu1 }
 0x84d   : > { %v3957_v25 = vpop.f32.mrb[13].mxu1 }
 0x84e   : > { %v3958_v2 = vadd.f32 %v3957_v25, %v3956_v44 }
 0x850   : > { %3230 = vst [vmem:[#allocation19 + $0x30] sm:$0xff] %v3958_v2  ;;  %v3959_v24 = vpop.f32.mrb[14].mxu1 }
 0x851   : > { %v3960_v35 = vpop.f32.mrb[15].mxu1 }
 0x852   : > { %v3961_v37 = vadd.f32 %v3960_v35, %v3959_v24 }
 0x854   : > { %3231 = vst [vmem:[#allocation19 + $0x38] sm:$0xff] %v3961_v37 }
 0x855 PF: > { %s5346_s16 = smov [#allocation19]   ;;  %p6517_p9 = scmp.eq.s32.totalorder %s5436_s25, 1 }
 0x856   : > { %s3243_s12 = sshll.u32 %s5346_s16, 4  ;;  %s3244_s12 = int_to_ptr.vmem [resolvable:$true] %s3243_s12 }
 0x857   : > { %s5213_s18 = scalar_lea.vmem %s3244_s12, 1024  ;;  %p5220_p5 = scmp.lt.s32.totalorder %s3244_s12, %s3244_s12 }
 0x858   : > { %p5214_p0 = scmp.ne.s32.totalorder %s3244_s12, %s5213_s18  ;;  %p5221_p11 = scmp.lt.s32.totalorder %s5213_s18, %s5213_s18 }
 0x85a   : > { %p5215_p4 = pnand %p5214_p0, %p6517_p9  ;;  %p5222_p10 = por %p5221_p11, %p5220_p5 }
 0x85c   : > { %p5216_p7 = pneg %p5215_p4 }
 0x85e   : > { %p5223_p3 = pnand %p5222_p10, %p5216_p7 }
 0x860   : > { %5226 = shalt.err (!%p5223_p3)
}
 0x861   : > { %s6518_s30 = sld [smem:[#allocation36_spill]]  ;;  %p6519_p8 = pmov %p6517_p9 }
 0x867   : > { %s5227_s13 = scalar_lea.hbm %s6518_s30, 1024 }
 0x868   : > { %p5228_p12 = scmp.ne.s32.totalorder %s6518_s30, %s5227_s13  ;;  %p5233_p2 = scmp.lt.u32.totalorder %s5227_s13, %s6518_s30 }
 0x86a   : > { %p5229_p1 = pnand %p5228_p12, %p6519_p8 }
 0x86c   : > { %p5230_p13 = pneg %p5229_p1 }
 0x86e   : > { %p5235_p6 = pnand %p5233_p2, %p5230_p13 }
 0x870   : > { %5238 = shalt.err (!%p5235_p6)
}
 0x871   : > { %s5347_s29 = smov 128   ;;  %s5348_s11 = smov 8  }
 0x872   : > { %p6520_p0 = pmov %p6519_p8  ;;  %s3587_s18 = sshll.u32 %s5436_s25, 11 }
 0x873   : > { %s3259_s5 = sshll.u32 %s5744_s14, 4  ;;  %s6521_s6 = sld [smem:[#allocation37_spill]]  ;;  %s6404_s5 = int_to_ptr.vmem [resolvable:$true] %s3259_s5 }
 0x874   : > { %4645 = dma.vmem_to_hbm [thread:$0]  (%p6520_p0), %s3244_s12, 1024, %s6518_s30, [#allocation7], %s5347_s29, %s5347_s29, %s5348_s11  }
 0x875   : > { %s6408_s26 = scalar_lea.sflag [#allocation21], %s488_s28  ;;  %s5239_s15 = scalar_lea.vmem %s6404_s5, 2048 }
 0x876   : > { %p5240_p9 = scmp.ne.s32.totalorder %s6404_s5, %s5239_s15  ;;  %p6522_p4 = scmp.ne.s32.totalorder %s6500_s0, 0 }
 0x877   : > { %s5349_s12 = smov [#allocation20]  }
 0x878   : > { %p5241_p7 = pnand %p5240_p9, %p6522_p4  ;;  %s5243_s14 = sshll.u32 %s5349_s12, 4  ;;  %s5244_s14 = int_to_ptr.vmem [resolvable:$false] %s5243_s14 }
 0x879   : > { %s6402_s20 = scalar_lea.hbm %s6521_s6, %s3587_s18  ;;  %s5245_s19 = scalar_lea.vmem %s5244_s14, 4096 }
 0x87a   : > { %p5242_p5 = pneg %p5241_p7  ;;  %p5246_p11 = scmp.lt.s32.totalorder %s6404_s5, %s5244_s14 }
 0x87b   : > { %p5247_p10 = scmp.lt.s32.totalorder %s5245_s19, %s5239_s15 }
 0x87d   : > { %p5248_p3 = por %p5247_p10, %p5246_p11 }
 0x87f   : > { %p5249_p12 = pnand %p5248_p3, %p5242_p5 }
 0x881   : > { %5252 = shalt.err (!%p5249_p12)
}
 0x882   : > { %s5253_s28 = scalar_lea.hbm %s6402_s20, 2048  ;;  %s5257_s17 = scalar_lea.hbm %s6521_s6, 4096 }
 0x883   : > { %p5254_p8 = scmp.ne.s32.totalorder %s6402_s20, %s5253_s28  ;;  %p5258_p2 = scmp.lt.u32.totalorder %s6402_s20, %s6521_s6 }
 0x884   : > { %p5259_p6 = scmp.lt.u32.totalorder %s5257_s17, %s5253_s28  ;;  %p5261_p9 = scmp.lt.u32.totalorder %s5253_s28, %s6402_s20 }
 0x885   : > { %p5255_p1 = pnand %p5254_p8, %p6522_p4 }
 0x886   : > { %p5260_p0 = por %p5259_p6, %p5258_p2 }
 0x887   : > { %p5256_p13 = pneg %p5255_p1 }
 0x888   : > { %p5262_p7 = por %p5261_p9, %p5260_p0 }
 0x88a   : > { %p5263_p5 = pnand %p5262_p7, %p5256_p13 }
 0x88c   : > { %5266 = shalt.err (!%p5263_p5)
}
 0x88d   : > { %4646 = dma.vmem_to_hbm [thread:$0]  (%p6522_p4), %s6404_s5, 2048, %s6402_s20, %s6408_s26, %s5347_s29, %s5347_s29, %s5348_s11  }
 0x88e   : > { %p6523_p11 = scmp.eq.s32.totalorder %s5436_s25, 1 }
 0x890   : > { %5308 = dma.done.wait (%p6523_p11), [#allocation7], 1024   ;;  %p6524_p10 = pmov %p6523_p11 }
 0x892   : > { %5310 = vsyncadd (%p6524_p10), [#allocation7], 4294966272 }
 0x893 PF: > { %s3278_s15 = sand.u32 1, %s5317_s21   ;;  %p6525_p3 = scmp.ne.s32.totalorder %s6501_s3, 0 }
 0x894   : > { %p6526_p12 = scmp.ge.s32.totalorder %s5329_s24, 2  ;;  %s3279_s0 = scalar_lea.sflag [#allocation21], %s3278_s15 }
 0x896   : > { %p4677_p8 = pnand %p6526_p12, %p6525_p3 }
 0x898   : > { %5312 = dma.done.wait (!%p4677_p8), %s3279_s0, 2048  }
 0x899   : > { %5314 = vsyncadd (!%p4677_p8), %s3279_s0, 4294965248  ;;  %p31_p4 = scmp.ge.s32.totalorder %s5625_s27, 4   ;;  %s6527_s21 = smov %s5321_s22 }
 0x89a   : > { %s6528_s22 = smov %s5325_s23  ;;  %s6529_s23 = smov %s5637_s4 }
 0x89b   : > { %s6530_s24 = smov %s5625_s27  ;;  %33 = sbr.rel (!%p31_p4) target bundleno = 19 (0x13), region = 161 }
 0x8a2   :  { %3284 = vsyncpa [#allocation6], 1 }
 0x8a3   :  { %3286 = vsyncpa [#allocation6 + $0x1], 1 }
 0x8a4   :  { %3287 = vsyncpa [#allocation9], 1 }
 0x8a5   :  { %3289 = vsyncpa [#allocation9 + $0x1], 1 }
 0x8a6   :  { %3290 = vsyncpa [#allocation12], 1 }
 0x8a7   :  { %3291 = vsyncpa [#allocation15], 1 }
 0x8a8   :  { %3292 = vsyncpa [#allocation18], 1 }
 0x8a9   :  { %3293 = vsyncpa [#allocation7], 1 }
 0x8aa   :  { %3295 = vsyncpa [#allocation7 + $0x1], 1 }
 0x8ab   :  { %3296 = vsyncpa [#allocation21], 1 }
 0x8ac   :  { %3298 = vsyncpa [#allocation21 + $0x1], 1 }

</bundles_post_ra>
